<compile_context>
chip_gen: v5e
topology: v5e:2x2
jax: 0.10.0
libtpu: 0.0.40
codegen_flags: <defaults>
</compile_context>

<pallas_src>
import math
from functools import partial

import jax
import jax.numpy as jnp
from jax.experimental import pallas as pl
from jax.experimental.pallas import tpu as pltpu


# --------------------------------------------------------------------------
# Helpers
# --------------------------------------------------------------------------

def _probe_buffered_mode():
    """Return pl.Buffered(1) if single-buffered (grid-invariant) operands are
    supported by the installed Pallas, else None (default double buffering)."""
    try:
        mode = pl.Buffered(1)

        def _k(x_ref, o_ref):
            o_ref[...] = x_ref[...] * 2.0

        y = pl.pallas_call(
            _k,
            out_shape=jax.ShapeDtypeStruct((16, 128), jnp.float32),
            grid=(2,),
            in_specs=[pl.BlockSpec((8, 128), lambda i: (0, 0), pipeline_mode=mode)],
            out_specs=pl.BlockSpec((8, 128), lambda i: (i, 0)),
        )(jnp.zeros((8, 128), jnp.float32))
        jax.block_until_ready(y)
        return mode
    except Exception:
        return None


_CONST_PIPELINE_MODE = _probe_buffered_mode()


def _const_spec(shape):
    """BlockSpec for a grid-invariant operand (weights / biases / LN params)."""
    n = len(shape)

    def idx(*_args):
        return (0,) * n

    if _CONST_PIPELINE_MODE is None:
        return pl.BlockSpec(shape, idx)
    return pl.BlockSpec(shape, idx, pipeline_mode=_CONST_PIPELINE_MODE)


def _batch_block(B, T, target_rows=256):
    """Fold batches so each grid step feeds >= target_rows rows to the MXU.
    (At demo sizes the whole batch folds into one grid step; at realistic sizes
    keep >= 2 steps so v7x megacore sharding engages.)"""
    return max(1, min(B, -(-target_rows // max(T, 1))))


def _layer_vmem_limit(Bb, T, D, FF):
    """Rough per-layer VMEM budget (bytes), clamped with generous headroom."""
    w = (3 * D * D + D * D + D * FF + FF * D) * 2          # bf16 weights (single-buffered)
    w += (3 * D + 2 * D + FF + 4 * D) * 4                  # biases + LN params (f32)
    io = 4 * Bb * T * D * 2 + 8 * Bb * D                   # double-buffered x in/out + pooled
    act = Bb * T * 3 * D * (4 + 2)                         # qkv f32 + bf16 copy
    act += 2 * Bb * T * T * 4                              # one head's scores + probs (f32)
    act += Bb * T * FF * 4 + 8 * Bb * T * D * 4            # ffn hidden + residual temps
    need = w + io + act
    return int(min(max(2 * need, 16 * 2 ** 20), 64 * 2 ** 20))


def _layernorm(y, g, b):
    # y: (M, D) f32; g/b: (1, D) f32; eps matches nn.LayerNorm default.
    mu = jnp.mean(y, axis=-1, keepdims=True)
    var = jnp.mean(jnp.square(y - mu), axis=-1, keepdims=True)
    return (y - mu) * jax.lax.rsqrt(var + 1e-5) * g + b


# --------------------------------------------------------------------------
# Kernel 1: input projection + bias + positional encoding (gridded over batch)
# --------------------------------------------------------------------------

def _inproj_pe_kernel(x_ref, w_ref, b_ref, pe_ref, o_ref):
    Bb, T, Din = x_ref.shape
    D = w_ref.shape[1]
    x = x_ref[...].reshape(Bb * T, Din).astype(jnp.bfloat16)
    y = jnp.dot(x, w_ref[...], preferred_element_type=jnp.float32) + b_ref[...]
    o_ref[...] = (y.reshape(Bb, T, D) + pe_ref[...]).astype(o_ref.dtype)


def input_proj_pe(motion, w_bf16, b, pe, *, batch_block):
    Bp, T, Din = motion.shape
    D = w_bf16.shape[1]
    Bb = batch_block
    return pl.pallas_call(
        _inproj_pe_kernel,
        out_shape=jax.ShapeDtypeStruct((Bp, T, D), jnp.bfloat16),
        grid=(Bp // Bb,),
        in_specs=[
            pl.BlockSpec((Bb, T, Din), lambda i: (i, 0, 0)),
            _const_spec((Din, D)),
            _const_spec((1, D)),
            _const_spec((T, D)),
        ],
        out_specs=pl.BlockSpec((Bb, T, D), lambda i: (i, 0, 0)),
        compiler_params=pltpu.CompilerParams(dimension_semantics=("parallel",)),
    )(motion, w_bf16, b.reshape(1, D), pe)


# --------------------------------------------------------------------------
# Kernel 2: fully fused transformer encoder layer (post-norm, ReLU FFN)
#   grid over batch blocks; lengths via scalar prefetch; masked mean pooling
#   fused as an epilogue (consumed only after the last layer).
# --------------------------------------------------------------------------

def _layer_kernel(len_ref, x_ref, wqkv_ref, bqkv_ref, wo_ref, bo_ref,
                  ln1g_ref, ln1b_ref, w1_ref, b1_ref, w2_ref, b2_ref,
                  ln2g_ref, ln2b_ref, o_ref, pooled_ref, *, num_heads):
    Bb, T, D = x_ref.shape
    H = num_heads
    dh = D // H
    scale = 1.0 / math.sqrt(dh)
    b0 = pl.program_id(0) * Bb

    x_bf = x_ref[...].reshape(Bb * T, D)                  # bf16 as stored
    x = x_bf.astype(jnp.float32)                          # f32 residual stream

    # --- fused Q/K/V projection: one MXU pass with M = Bb*T, N = 3D --------
    qkv = jnp.dot(x_bf, wqkv_ref[...],
                  preferred_element_type=jnp.float32) + bqkv_ref[...]
    qkv3 = qkv.astype(jnp.bfloat16).reshape(Bb, T, 3 * D)      # single cast

    # --- masks from per-batch length-T compare vectors ----------------------
    lens_blk = [len_ref[b0 + i] for i in range(Bb)]
    kiota_row = jax.lax.broadcasted_iota(jnp.int32, (1, 1, T), 2)
    kiota_col = jax.lax.broadcasted_iota(jnp.int32, (1, T, 1), 1)
    neg = jnp.concatenate(
        [jnp.where(kiota_row < l, 0.0, -1e30) for l in lens_blk], axis=0)   # (Bb,1,T)
    valid = jnp.concatenate(
        [(kiota_col < l).astype(jnp.float32) for l in lens_blk], axis=0)    # (Bb,T,1)

    # --- attention: one head at a time (one (Bb, T, T) score tile live) -----
    # TODO(synk): for long sequences, tile the key axis flash-style (online softmax).
    ctx_heads = []
    for h in range(H):
        qh = qkv3[:, :, h * dh:(h + 1) * dh]
        kh = qkv3[:, :, D + h * dh:D + (h + 1) * dh]
        vh = qkv3[:, :, 2 * D + h * dh:2 * D + (h + 1) * dh]
        s = jnp.einsum("bqd,bkd->bqk", qh, kh,
                       preferred_element_type=jnp.float32) * scale + neg
        m = jnp.max(s, axis=-1, keepdims=True)
        p = jnp.exp(s - m)
        inv = pl.reciprocal(jnp.sum(p, axis=-1, keepdims=True), approx=True)
        ctx_heads.append(
            jnp.einsum("bqk,bkd->bqd", (p * inv).astype(jnp.bfloat16), vh,
                       preferred_element_type=jnp.float32))
    ctx = jnp.concatenate(ctx_heads, axis=-1).reshape(Bb * T, D)            # f32

    # --- output projection + residual + LayerNorm ---------------------------
    proj = jnp.dot(ctx.astype(jnp.bfloat16), wo_ref[...],
                   preferred_element_type=jnp.float32) + bo_ref[...]
    y = _layernorm(x + proj, ln1g_ref[...], ln1b_ref[...])

    # --- FFN (ReLU) + residual + LayerNorm -----------------------------------
    h1 = jnp.dot(y.astype(jnp.bfloat16), w1_ref[...],
                 preferred_element_type=jnp.float32) + b1_ref[...]
    h1 = jnp.maximum(h1, 0.0)
    ffn = jnp.dot(h1.astype(jnp.bfloat16), w2_ref[...],
                  preferred_element_type=jnp.float32) + b2_ref[...]
    out = _layernorm(y + ffn, ln2g_ref[...], ln2b_ref[...])                 # (Bb*T, D)

    out3 = out.reshape(Bb, T, D)
    o_ref[...] = out3.astype(o_ref.dtype)

    # --- fused masked mean-pooling epilogue ----------------------------------
    cnt = jnp.sum(valid, axis=1, keepdims=True)                             # (Bb,1,1)
    inv_cnt = jnp.where(cnt > 0, 1.0 / jnp.maximum(cnt, 1.0), 0.0)
    psum = jnp.sum(out3 * valid, axis=1, keepdims=True)                     # (Bb,1,D)
    pooled_ref[...] = psum * inv_cnt


def transformer_layer(x, lengths, layer, *, num_heads, batch_block):
    Bp, T, D = x.shape
    FF = layer["W1"].shape[1]
    Bb = batch_block

    grid_spec = pltpu.PrefetchScalarGridSpec(
        num_scalar_prefetch=1,
        grid=(Bp // Bb,),
        in_specs=[
            pl.BlockSpec((Bb, T, D), lambda i, lens: (i, 0, 0)),      # x
            _const_spec((D, 3 * D)), _const_spec((1, 3 * D)),         # Wqkv, bqkv
            _const_spec((D, D)), _const_spec((1, D)),                 # Wo, bo
            _const_spec((1, D)), _const_spec((1, D)),                 # ln1 gamma/beta
            _const_spec((D, FF)), _const_spec((1, FF)),               # W1, b1
            _const_spec((FF, D)), _const_spec((1, D)),                # W2, b2
            _const_spec((1, D)), _const_spec((1, D)),                 # ln2 gamma/beta
        ],
        out_specs=[
            pl.BlockSpec((Bb, T, D), lambda i, lens: (i, 0, 0)),      # layer output
            pl.BlockSpec((Bb, 1, D), lambda i, lens: (i, 0, 0)),      # pooled block
        ],
    )
    x_out, pooled = pl.pallas_call(
        partial(_layer_kernel, num_heads=num_heads),
        out_shape=(jax.ShapeDtypeStruct((Bp, T, D), jnp.bfloat16),
                   jax.ShapeDtypeStruct((Bp, 1, D), jnp.float32)),
        grid_spec=grid_spec,
        compiler_params=pltpu.CompilerParams(
            dimension_semantics=("parallel",),
            vmem_limit_bytes=_layer_vmem_limit(Bb, T, D, FF)),
    )(lengths, x,
      layer["Wqkv"], layer["bqkv"].reshape(1, 3 * D),
      layer["Wo"], layer["bo"].reshape(1, D),
      layer["ln1_g"].reshape(1, D), layer["ln1_b"].reshape(1, D),
      layer["W1"], layer["b1"].reshape(1, FF),
      layer["W2"], layer["b2"].reshape(1, D),
      layer["ln2_g"].reshape(1, D), layer["ln2_b"].reshape(1, D))
    return x_out, pooled


# --------------------------------------------------------------------------
# Kernel 3: final fc as one batched (B, D) x (D, N) matmul
# --------------------------------------------------------------------------

def _fc_kernel(p_ref, w_ref, b_ref, o_ref):
    o_ref[...] = jnp.dot(p_ref[...].astype(jnp.bfloat16), w_ref[...],
                         preferred_element_type=jnp.float32) + b_ref[...]


def final_fc(pooled, w_bf16, b):
    Bp, D = pooled.shape
    N = w_bf16.shape[1]
    return pl.pallas_call(
        _fc_kernel,
        out_shape=jax.ShapeDtypeStruct((Bp, N), jnp.float32),
        in_specs=[pl.BlockSpec(memory_space=pltpu.MemorySpace.VMEM)] * 3,
        out_specs=pl.BlockSpec(memory_space=pltpu.MemorySpace.VMEM),
    )(pooled, w_bf16, b.reshape(1, N))


# --------------------------------------------------------------------------
# Parameter construction (deterministic, synthetic)
# --------------------------------------------------------------------------

def _dense(key, fan_in, fan_out, scale=0.02):
    kw, kb = jax.random.split(key)
    w = jax.random.normal(kw, (fan_in, fan_out), jnp.float32) * scale
    b = jax.random.normal(kb, (fan_out,), jnp.float32) * scale
    return w, b


def _positional_encoding(max_len, d_model):
    position = jnp.arange(max_len, dtype=jnp.float32)[:, None]
    div_term = jnp.exp(
        jnp.arange(0, d_model, 2, dtype=jnp.float32) * (-math.log(10000.0) / d_model))
    pe = jnp.zeros((max_len, d_model), jnp.float32)
    pe = pe.at[:, 0::2].set(jnp.sin(position * div_term))
    pe = pe.at[:, 1::2].set(jnp.cos(position * div_term))
    return pe


def init_params(key, input_dim, embed_dim, num_layers, dim_feedforward, max_seq_length):
    keys = jax.random.split(key, 2 + num_layers)
    Wp, bp = _dense(keys[0], input_dim, embed_dim)
    Wfc, bfc = _dense(keys[1], embed_dim, embed_dim)
    layers = []
    for i in range(num_layers):
        lk = jax.random.split(keys[2 + i], 6)
        Wq, bq = _dense(lk[0], embed_dim, embed_dim)
        Wk, bk = _dense(lk[1], embed_dim, embed_dim)
        Wv, bv = _dense(lk[2], embed_dim, embed_dim)
        Wo, bo = _dense(lk[3], embed_dim, embed_dim)
        W1, b1 = _dense(lk[4], embed_dim, dim_feedforward)
        W2, b2 = _dense(lk[5], dim_feedforward, embed_dim)
        layers.append(dict(
            # matmul weights stored bf16 (MXU-native, halves DMA); biases / LN f32
            Wqkv=jnp.concatenate([Wq, Wk, Wv], axis=1).astype(jnp.bfloat16),
            bqkv=jnp.concatenate([bq, bk, bv], axis=0),
            Wo=Wo.astype(jnp.bfloat16), bo=bo,
            W1=W1.astype(jnp.bfloat16), b1=b1,
            W2=W2.astype(jnp.bfloat16), b2=b2,
            ln1_g=jnp.ones((embed_dim,), jnp.float32),
            ln1_b=jnp.zeros((embed_dim,), jnp.float32),
            ln2_g=jnp.ones((embed_dim,), jnp.float32),
            ln2_b=jnp.zeros((embed_dim,), jnp.float32),
        ))
    return dict(Wp=Wp.astype(jnp.bfloat16), bp=bp,
                Wfc=Wfc.astype(jnp.bfloat16), bfc=bfc,
                layers=layers,
                pe=_positional_encoding(max_seq_length, embed_dim))


# --------------------------------------------------------------------------
# Forward pass
# --------------------------------------------------------------------------

def motion_encoder_forward(params, motion, lengths, *, num_heads, target_rows=256):
    """motion: (B, T, input_dim) f32; lengths: (B,) int32 -> (B, embed_dim)."""
    B, T, _ = motion.shape
    D = params["Wfc"].shape[0]
    lengths = lengths.astype(jnp.int32)

    Bb = _batch_block(B, T, target_rows)
    Bp = -(-B // Bb) * Bb
    if Bp != B:  # pad batch to a multiple of the batch block (padded rows: length 0)
        motion = jnp.pad(motion, ((0, Bp - B), (0, 0), (0, 0)))
        lengths = jnp.pad(lengths, (0, Bp - B))

    # input_proj + positional encoding (dropout = identity / eval mode)
    x = input_proj_pe(motion, params["Wp"], params["bp"], params["pe"][:T],
                      batch_block=Bb)

    # transformer encoder: one fused pallas_call per layer; masked mean pooling
    # is emitted as a fused epilogue (only the last layer's pooled output is used)
    pooled = None
    for layer in params["layers"]:
        x, pooled = transformer_layer(x, lengths, layer,
                                      num_heads=num_heads, batch_block=Bb)

    # final fc on the pooled features as one batched matmul (dropout = identity)
    out = final_fc(pooled.reshape(Bp, D), params["Wfc"], params["bfc"])
    return out[:B]


# TODO(synk): dropout (training mode) is stochastic; treated as identity (eval mode).

if __name__ == "__main__":
    B, T, INPUT_DIM = 2, 8, 16
    EMBED_DIM, NUM_HEADS, NUM_LAYERS, FF_DIM, MAX_LEN = 32, 4, 2, 64, 16

    key = jax.random.PRNGKey(0)
    kp, kx = jax.random.split(key)
    params = init_params(kp, INPUT_DIM, EMBED_DIM, NUM_LAYERS, FF_DIM, MAX_LEN)

    motion = jax.random.normal(kx, (B, T, INPUT_DIM), jnp.float32)
    lengths = jnp.array([8, 5], dtype=jnp.int32)

    fwd = jax.jit(partial(motion_encoder_forward, num_heads=NUM_HEADS))
    out = fwd(params, motion, lengths)
    jax.block_until_ready(out)
    assert out.shape == (B, EMBED_DIM), out.shape
    assert bool(jnp.all(jnp.isfinite(out)))
    print("KERNEL_OK")
</pallas_src>

<mosaic_0001>
module attributes {stable_mosaic.version = 11 : i64} {
  func.func @_k(%arg0: i32, %arg1: memref<8x128xf32, #tpu.memory_space<vmem>>, %arg2: memref<8x128xf32, #tpu.memory_space<vmem>>) attributes {dimension_semantics = [#tpu.dimension_semantics<arbitrary>], iteration_bounds = array<i64: 2>, scalar_prefetch = 0 : i64, scratch_operands = 0 : i64, tpu.core_type = #tpu.core_type<tc>, window_params = [{pipeline_mode = #tpu.pipeline_mode<synchronous>, transform_indices = @transform_0, window_bounds = array<i64: 8, 128>}, {transform_indices = @transform_1, window_bounds = array<i64: 8, 128>}]} {
    %c0 = arith.constant 0 : index
    %c0_0 = arith.constant 0 : index
    %0 = vector.load %arg1[%c0, %c0_0] : memref<8x128xf32, #tpu.memory_space<vmem>>, vector<8x128xf32>
    %cst = arith.constant 2.000000e+00 : f32
    %1 = vector.broadcast %cst : f32 to vector<8x128xf32>
    %2 = arith.mulf %0, %1 : vector<8x128xf32>
    %c0_1 = arith.constant 0 : index
    %c0_2 = arith.constant 0 : index
    %3 = vector.load %arg2[%c0_1, %c0_2] : memref<8x128xf32, #tpu.memory_space<vmem>>, vector<8x128xf32>
    tpu.vector_store %arg2[%c0_1, %c0_2], %2 {strides = array<i32>} : memref<8x128xf32, #tpu.memory_space<vmem>>, vector<8x128xf32>,
    return
  }
  func.func @transform_0(%arg0: i32) -> (i32, i32) {
    %c0_i32 = arith.constant 0 : i32
    %c0_i32_0 = arith.constant 0 : i32
    %c0_i32_1 = arith.constant 0 : i32
    return %c0_i32, %c0_i32_0 : i32, i32
  }
  func.func @transform_1(%arg0: i32) -> (i32, i32) {
    %c0_i32 = arith.constant 0 : i32
    %c0_i32_0 = arith.constant 0 : i32
    return %arg0, %c0_i32 : i32, i32
  }
}

module attributes {stable_mosaic.version = 11 : i64} {
  func.func @_layer_kernel(%arg0: i32, %arg1: memref<2xi32, #tpu.memory_space<smem>>, %arg2: memref<2x8x32xbf16, #tpu.memory_space<vmem>>, %arg3: memref<32x96xbf16, #tpu.memory_space<vmem>>, %arg4: memref<1x96xf32, #tpu.memory_space<vmem>>, %arg5: memref<32x32xbf16, #tpu.memory_space<vmem>>, %arg6: memref<1x32xf32, #tpu.memory_space<vmem>>, %arg7: memref<1x32xf32, #tpu.memory_space<vmem>>, %arg8: memref<1x32xf32, #tpu.memory_space<vmem>>, %arg9: memref<32x64xbf16, #tpu.memory_space<vmem>>, %arg10: memref<1x64xf32, #tpu.memory_space<vmem>>, %arg11: memref<64x32xbf16, #tpu.memory_space<vmem>>, %arg12: memref<1x32xf32, #tpu.memory_space<vmem>>, %arg13: memref<1x32xf32, #tpu.memory_space<vmem>>, %arg14: memref<1x32xf32, #tpu.memory_space<vmem>>, %arg15: memref<2x8x32xbf16, #tpu.memory_space<vmem>>, %arg16: memref<2x1x32xf32, #tpu.memory_space<vmem>>) attributes {dimension_semantics = [#tpu.dimension_semantics<parallel>], iteration_bounds = array<i64: 1>, scalar_prefetch = 1 : i64, scratch_operands = 0 : i64, tpu.core_type = #tpu.core_type<tc>, window_params = [{transform_indices = @transform_0, window_bounds = array<i64: 2, 8, 32>}, {pipeline_mode = #tpu.pipeline_mode<synchronous>, transform_indices = @transform_1, window_bounds = array<i64: 32, 96>}, {pipeline_mode = #tpu.pipeline_mode<synchronous>, transform_indices = @transform_2, window_bounds = array<i64: 1, 96>}, {pipeline_mode = #tpu.pipeline_mode<synchronous>, transform_indices = @transform_3, window_bounds = array<i64: 32, 32>}, {pipeline_mode = #tpu.pipeline_mode<synchronous>, transform_indices = @transform_4, window_bounds = array<i64: 1, 32>}, {pipeline_mode = #tpu.pipeline_mode<synchronous>, transform_indices = @transform_5, window_bounds = array<i64: 1, 32>}, {pipeline_mode = #tpu.pipeline_mode<synchronous>, transform_indices = @transform_6, window_bounds = array<i64: 1, 32>}, {pipeline_mode = #tpu.pipeline_mode<synchronous>, transform_indices = @transform_7, window_bounds = array<i64: 32, 64>}, {pipeline_mode = #tpu.pipeline_mode<synchronous>, transform_indices = @transform_8, window_bounds = array<i64: 1, 64>}, {pipeline_mode = #tpu.pipeline_mode<synchronous>, transform_indices = @transform_9, window_bounds = array<i64: 64, 32>}, {pipeline_mode = #tpu.pipeline_mode<synchronous>, transform_indices = @transform_10, window_bounds = array<i64: 1, 32>}, {pipeline_mode = #tpu.pipeline_mode<synchronous>, transform_indices = @transform_11, window_bounds = array<i64: 1, 32>}, {pipeline_mode = #tpu.pipeline_mode<synchronous>, transform_indices = @transform_12, window_bounds = array<i64: 1, 32>}, {transform_indices = @transform_13, window_bounds = array<i64: 2, 8, 32>}, {transform_indices = @transform_14, window_bounds = array<i64: 2, 1, 32>}]} {
    %c2_i32 = arith.constant 2 : i32
    %0 = arith.muli %arg0, %c2_i32 : i32
    %c0 = arith.constant 0 : index
    %c0_0 = arith.constant 0 : index
    %c0_1 = arith.constant 0 : index
    %1 = vector.load %arg2[%c0, %c0_0, %c0_1] : memref<2x8x32xbf16, #tpu.memory_space<vmem>>, vector<2x8x32xbf16>
    %2 = vector.shape_cast %1 : vector<2x8x32xbf16> to vector<16x32xbf16>
    %3 = arith.extf %2 : vector<16x32xbf16> to vector<16x32xf32>
    %c0_2 = arith.constant 0 : index
    %c0_3 = arith.constant 0 : index
    %4 = vector.load %arg3[%c0_2, %c0_3] : memref<32x96xbf16, #tpu.memory_space<vmem>>, vector<32x96xbf16>
    %cst = arith.constant dense<0.000000e+00> : vector<16x96xf32>
    %5 = tpu.matmul %2, %4, %cst {dimension_numbers = #tpu.dot_dimension_numbers<[1], [0], [0], [1], [0, 0, 1, 1], [], []>} : vector<16x32xbf16>, vector<32x96xbf16>, vector<16x96xf32> -> vector<16x96xf32>
    %c0_4 = arith.constant 0 : index
    %c0_5 = arith.constant 0 : index
    %6 = vector.load %arg4[%c0_4, %c0_5] : memref<1x96xf32, #tpu.memory_space<vmem>>, vector<1x96xf32>
    %7 = vector.broadcast %6 : vector<1x96xf32> to vector<16x96xf32>
    %8 = arith.addf %5, %7 : vector<16x96xf32>
    %9 = arith.truncf %8 : vector<16x96xf32> to vector<16x96xbf16>
    %10 = vector.shape_cast %9 : vector<16x96xbf16> to vector<2x8x96xbf16>
    %c0_i32 = arith.constant 0 : i32
    %11 = arith.addi %0, %c0_i32 : i32
    %12 = arith.index_cast %11 : i32 to index
    %13 = memref.load %arg1[%12] : memref<2xi32, #tpu.memory_space<smem>>
    %c1_i32 = arith.constant 1 : i32
    %14 = arith.addi %0, %c1_i32 : i32
    %15 = arith.index_cast %14 : i32 to index
    %16 = memref.load %arg1[%15] : memref<2xi32, #tpu.memory_space<smem>>
    %17 = tpu.iota {dimensions = array<i32: 2>} : vector<1x1x8xi32>
    %18 = tpu.iota {dimensions = array<i32: 1>} : vector<1x8x1xi32>
    %19 = vector.broadcast %13 : i32 to vector<1x1x8xi32>
    %20 = arith.cmpi slt, %17, %19 : vector<1x1x8xi32>
    %cst_6 = arith.constant 0.000000e+00 : f32
    %cst_7 = arith.constant -1.000000e+30 : f32
    %21 = vector.broadcast %cst_6 : f32 to vector<1x1x8xf32>
    %22 = vector.broadcast %cst_7 : f32 to vector<1x1x8xf32>
    %23 = arith.select %20, %21, %22 : vector<1x1x8xi1>, vector<1x1x8xf32>
    %24 = vector.broadcast %16 : i32 to vector<1x1x8xi32>
    %25 = arith.cmpi slt, %17, %24 : vector<1x1x8xi32>
    %cst_8 = arith.constant 0.000000e+00 : f32
    %cst_9 = arith.constant -1.000000e+30 : f32
    %26 = vector.broadcast %cst_8 : f32 to vector<1x1x8xf32>
    %27 = vector.broadcast %cst_9 : f32 to vector<1x1x8xf32>
    %28 = arith.select %25, %26, %27 : vector<1x1x8xi1>, vector<1x1x8xf32>
    %29 = tpu.concatenate %23, %28 in 0 : vector<1x1x8xf32>, vector<1x1x8xf32> -> vector<2x1x8xf32>
    %30 = vector.broadcast %13 : i32 to vector<1x8x1xi32>
    %31 = arith.cmpi slt, %18, %30 : vector<1x8x1xi32>
    %32 = arith.extui %31 : vector<1x8x1xi1> to vector<1x8x1xi32>
    %33 = arith.sitofp %32 : vector<1x8x1xi32> to vector<1x8x1xf32>
    %34 = vector.broadcast %16 : i32 to vector<1x8x1xi32>
    %35 = arith.cmpi slt, %18, %34 : vector<1x8x1xi32>
    %36 = arith.extui %35 : vector<1x8x1xi1> to vector<1x8x1xi32>
    %37 = arith.sitofp %36 : vector<1x8x1xi32> to vector<1x8x1xf32>
    %38 = tpu.concatenate %33, %37 in 0 : vector<1x8x1xf32>, vector<1x8x1xf32> -> vector<2x8x1xf32>
    %39 = vector.extract_strided_slice %10 {offsets = [0, 0, 0], sizes = [2, 8, 8], strides = [1, 1, 1]} : vector<2x8x96xbf16> to vector<2x8x8xbf16>
    %40 = vector.extract_strided_slice %10 {offsets = [0, 0, 32], sizes = [2, 8, 8], strides = [1, 1, 1]} : vector<2x8x96xbf16> to vector<2x8x8xbf16>
    %41 = vector.extract_strided_slice %10 {offsets = [0, 0, 64], sizes = [2, 8, 8], strides = [1, 1, 1]} : vector<2x8x96xbf16> to vector<2x8x8xbf16>
    "tpu.trace_start"() <{level = 10 : i32, message = "bqd,bkd->bqk"}> : () -> ()
    %cst_10 = arith.constant dense<0.000000e+00> : vector<2x8x8xf32>
    %42 = tpu.matmul %39, %40, %cst_10 {dimension_numbers = #tpu.dot_dimension_numbers<[2], [2], [1], [1], [0, 0, 0, 1, 1, 1], [0], [0]>} : vector<2x8x8xbf16>, vector<2x8x8xbf16>, vector<2x8x8xf32> -> vector<2x8x8xf32>
    "tpu.trace_stop"() : () -> ()
    %cst_11 = arith.constant 0.353553385 : f32
    %43 = vector.broadcast %cst_11 : f32 to vector<2x8x8xf32>
    %44 = arith.mulf %42, %43 : vector<2x8x8xf32>
    %45 = vector.broadcast %29 : vector<2x1x8xf32> to vector<2x8x8xf32>
    %46 = arith.addf %44, %45 : vector<2x8x8xf32>
    %cst_12 = arith.constant dense<0xFF800000> : vector<2x8xf32>
    %47 = vector.multi_reduction <maximumf>, %46, %cst_12 [2] : vector<2x8x8xf32> to vector<2x8xf32>
    %48 = vector.shape_cast %47 : vector<2x8xf32> to vector<2x8x1xf32>
    %49 = vector.broadcast %48 : vector<2x8x1xf32> to vector<2x8x8xf32>
    %50 = arith.subf %46, %49 : vector<2x8x8xf32>
    %51 = math.exp %50 : vector<2x8x8xf32>
    %cst_13 = arith.constant dense<0.000000e+00> : vector<2x8xf32>
    %52 = vector.multi_reduction <add>, %51, %cst_13 [2] : vector<2x8x8xf32> to vector<2x8xf32>
    %53 = vector.shape_cast %52 : vector<2x8xf32> to vector<2x8x1xf32>
    %54 = tpu.reciprocal %53 {approx = true} : vector<2x8x1xf32> -> vector<2x8x1xf32>
    %55 = vector.broadcast %54 : vector<2x8x1xf32> to vector<2x8x8xf32>
    %56 = arith.mulf %51, %55 : vector<2x8x8xf32>
    %57 = arith.truncf %56 : vector<2x8x8xf32> to vector<2x8x8xbf16>
    "tpu.trace_start"() <{level = 10 : i32, message = "bqk,bkd->bqd"}> : () -> ()
    %cst_14 = arith.constant dense<0.000000e+00> : vector<2x8x8xf32>
    %58 = tpu.matmul %57, %41, %cst_14 {dimension_numbers = #tpu.dot_dimension_numbers<[2], [1], [1], [2], [0, 0, 0, 1, 1, 2], [0], [0]>} : vector<2x8x8xbf16>, vector<2x8x8xbf16>, vector<2x8x8xf32> -> vector<2x8x8xf32>
    "tpu.trace_stop"() : () -> ()
    %59 = vector.extract_strided_slice %10 {offsets = [0, 0, 8], sizes = [2, 8, 8], strides = [1, 1, 1]} : vector<2x8x96xbf16> to vector<2x8x8xbf16>
    %60 = vector.extract_strided_slice %10 {offsets = [0, 0, 40], sizes = [2, 8, 8], strides = [1, 1, 1]} : vector<2x8x96xbf16> to vector<2x8x8xbf16>
    %61 = vector.extract_strided_slice %10 {offsets = [0, 0, 72], sizes = [2, 8, 8], strides = [1, 1, 1]} : vector<2x8x96xbf16> to vector<2x8x8xbf16>
    "tpu.trace_start"() <{level = 10 : i32, message = "bqd,bkd->bqk"}> : () -> ()
    %cst_15 = arith.constant dense<0.000000e+00> : vector<2x8x8xf32>
    %62 = tpu.matmul %59, %60, %cst_15 {dimension_numbers = #tpu.dot_dimension_numbers<[2], [2], [1], [1], [0, 0, 0, 1, 1, 1], [0], [0]>} : vector<2x8x8xbf16>, vector<2x8x8xbf16>, vector<2x8x8xf32> -> vector<2x8x8xf32>
    "tpu.trace_stop"() : () -> ()
    %cst_16 = arith.constant 0.353553385 : f32
    %63 = vector.broadcast %cst_16 : f32 to vector<2x8x8xf32>
    %64 = arith.mulf %62, %63 : vector<2x8x8xf32>
    %65 = vector.broadcast %29 : vector<2x1x8xf32> to vector<2x8x8xf32>
    %66 = arith.addf %64, %65 : vector<2x8x8xf32>
    %cst_17 = arith.constant dense<0xFF800000> : vector<2x8xf32>
    %67 = vector.multi_reduction <maximumf>, %66, %cst_17 [2] : vector<2x8x8xf32> to vector<2x8xf32>
    %68 = vector.shape_cast %67 : vector<2x8xf32> to vector<2x8x1xf32>
    %69 = vector.broadcast %68 : vector<2x8x1xf32> to vector<2x8x8xf32>
    %70 = arith.subf %66, %69 : vector<2x8x8xf32>
    %71 = math.exp %70 : vector<2x8x8xf32>
    %cst_18 = arith.constant dense<0.000000e+00> : vector<2x8xf32>
    %72 = vector.multi_reduction <add>, %71, %cst_18 [2] : vector<2x8x8xf32> to vector<2x8xf32>
    %73 = vector.shape_cast %72 : vector<2x8xf32> to vector<2x8x1xf32>
    %74 = tpu.reciprocal %73 {approx = true} : vector<2x8x1xf32> -> vector<2x8x1xf32>
    %75 = vector.broadcast %74 : vector<2x8x1xf32> to vector<2x8x8xf32>
    %76 = arith.mulf %71, %75 : vector<2x8x8xf32>
    %77 = arith.truncf %76 : vector<2x8x8xf32> to vector<2x8x8xbf16>
    "tpu.trace_start"() <{level = 10 : i32, message = "bqk,bkd->bqd"}> : () -> ()
    %cst_19 = arith.constant dense<0.000000e+00> : vector<2x8x8xf32>
    %78 = tpu.matmul %77, %61, %cst_19 {dimension_numbers = #tpu.dot_dimension_numbers<[2], [1], [1], [2], [0, 0, 0, 1, 1, 2], [0], [0]>} : vector<2x8x8xbf16>, vector<2x8x8xbf16>, vector<2x8x8xf32> -> vector<2x8x8xf32>
    "tpu.trace_stop"() : () -> ()
    %79 = vector.extract_strided_slice %10 {offsets = [0, 0, 16], sizes = [2, 8, 8], strides = [1, 1, 1]} : vector<2x8x96xbf16> to vector<2x8x8xbf16>
    %80 = vector.extract_strided_slice %10 {offsets = [0, 0, 48], sizes = [2, 8, 8], strides = [1, 1, 1]} : vector<2x8x96xbf16> to vector<2x8x8xbf16>
    %81 = vector.extract_strided_slice %10 {offsets = [0, 0, 80], sizes = [2, 8, 8], strides = [1, 1, 1]} : vector<2x8x96xbf16> to vector<2x8x8xbf16>
    "tpu.trace_start"() <{level = 10 : i32, message = "bqd,bkd->bqk"}> : () -> ()
    %cst_20 = arith.constant dense<0.000000e+00> : vector<2x8x8xf32>
    %82 = tpu.matmul %79, %80, %cst_20 {dimension_numbers = #tpu.dot_dimension_numbers<[2], [2], [1], [1], [0, 0, 0, 1, 1, 1], [0], [0]>} : vector<2x8x8xbf16>, vector<2x8x8xbf16>, vector<2x8x8xf32> -> vector<2x8x8xf32>
    "tpu.trace_stop"() : () -> ()
    %cst_21 = arith.constant 0.353553385 : f32
    %83 = vector.broadcast %cst_21 : f32 to vector<2x8x8xf32>
    %84 = arith.mulf %82, %83 : vector<2x8x8xf32>
    %85 = vector.broadcast %29 : vector<2x1x8xf32> to vector<2x8x8xf32>
    %86 = arith.addf %84, %85 : vector<2x8x8xf32>
    %cst_22 = arith.constant dense<0xFF800000> : vector<2x8xf32>
    %87 = vector.multi_reduction <maximumf>, %86, %cst_22 [2] : vector<2x8x8xf32> to vector<2x8xf32>
    %88 = vector.shape_cast %87 : vector<2x8xf32> to vector<2x8x1xf32>
    %89 = vector.broadcast %88 : vector<2x8x1xf32> to vector<2x8x8xf32>
    %90 = arith.subf %86, %89 : vector<2x8x8xf32>
    %91 = math.exp %90 : vector<2x8x8xf32>
    %cst_23 = arith.constant dense<0.000000e+00> : vector<2x8xf32>
    %92 = vector.multi_reduction <add>, %91, %cst_23 [2] : vector<2x8x8xf32> to vector<2x8xf32>
    %93 = vector.shape_cast %92 : vector<2x8xf32> to vector<2x8x1xf32>
    %94 = tpu.reciprocal %93 {approx = true} : vector<2x8x1xf32> -> vector<2x8x1xf32>
    %95 = vector.broadcast %94 : vector<2x8x1xf32> to vector<2x8x8xf32>
    %96 = arith.mulf %91, %95 : vector<2x8x8xf32>
    %97 = arith.truncf %96 : vector<2x8x8xf32> to vector<2x8x8xbf16>
    "tpu.trace_start"() <{level = 10 : i32, message = "bqk,bkd->bqd"}> : () -> ()
    %cst_24 = arith.constant dense<0.000000e+00> : vector<2x8x8xf32>
    %98 = tpu.matmul %97, %81, %cst_24 {dimension_numbers = #tpu.dot_dimension_numbers<[2], [1], [1], [2], [0, 0, 0, 1, 1, 2], [0], [0]>} : vector<2x8x8xbf16>, vector<2x8x8xbf16>, vector<2x8x8xf32> -> vector<2x8x8xf32>
    "tpu.trace_stop"() : () -> ()
    %99 = vector.extract_strided_slice %10 {offsets = [0, 0, 24], sizes = [2, 8, 8], strides = [1, 1, 1]} : vector<2x8x96xbf16> to vector<2x8x8xbf16>
    %100 = vector.extract_strided_slice %10 {offsets = [0, 0, 56], sizes = [2, 8, 8], strides = [1, 1, 1]} : vector<2x8x96xbf16> to vector<2x8x8xbf16>
    %101 = vector.extract_strided_slice %10 {offsets = [0, 0, 88], sizes = [2, 8, 8], strides = [1, 1, 1]} : vector<2x8x96xbf16> to vector<2x8x8xbf16>
    "tpu.trace_start"() <{level = 10 : i32, message = "bqd,bkd->bqk"}> : () -> ()
    %cst_25 = arith.constant dense<0.000000e+00> : vector<2x8x8xf32>
    %102 = tpu.matmul %99, %100, %cst_25 {dimension_numbers = #tpu.dot_dimension_numbers<[2], [2], [1], [1], [0, 0, 0, 1, 1, 1], [0], [0]>} : vector<2x8x8xbf16>, vector<2x8x8xbf16>, vector<2x8x8xf32> -> vector<2x8x8xf32>
    "tpu.trace_stop"() : () -> ()
    %cst_26 = arith.constant 0.353553385 : f32
    %103 = vector.broadcast %cst_26 : f32 to vector<2x8x8xf32>
    %104 = arith.mulf %102, %103 : vector<2x8x8xf32>
    %105 = vector.broadcast %29 : vector<2x1x8xf32> to vector<2x8x8xf32>
    %106 = arith.addf %104, %105 : vector<2x8x8xf32>
    %cst_27 = arith.constant dense<0xFF800000> : vector<2x8xf32>
    %107 = vector.multi_reduction <maximumf>, %106, %cst_27 [2] : vector<2x8x8xf32> to vector<2x8xf32>
    %108 = vector.shape_cast %107 : vector<2x8xf32> to vector<2x8x1xf32>
    %109 = vector.broadcast %108 : vector<2x8x1xf32> to vector<2x8x8xf32>
    %110 = arith.subf %106, %109 : vector<2x8x8xf32>
    %111 = math.exp %110 : vector<2x8x8xf32>
    %cst_28 = arith.constant dense<0.000000e+00> : vector<2x8xf32>
    %112 = vector.multi_reduction <add>, %111, %cst_28 [2] : vector<2x8x8xf32> to vector<2x8xf32>
    %113 = vector.shape_cast %112 : vector<2x8xf32> to vector<2x8x1xf32>
    %114 = tpu.reciprocal %113 {approx = true} : vector<2x8x1xf32> -> vector<2x8x1xf32>
    %115 = vector.broadcast %114 : vector<2x8x1xf32> to vector<2x8x8xf32>
    %116 = arith.mulf %111, %115 : vector<2x8x8xf32>
    %117 = arith.truncf %116 : vector<2x8x8xf32> to vector<2x8x8xbf16>
    "tpu.trace_start"() <{level = 10 : i32, message = "bqk,bkd->bqd"}> : () -> ()
    %cst_29 = arith.constant dense<0.000000e+00> : vector<2x8x8xf32>
    %118 = tpu.matmul %117, %101, %cst_29 {dimension_numbers = #tpu.dot_dimension_numbers<[2], [1], [1], [2], [0, 0, 0, 1, 1, 2], [0], [0]>} : vector<2x8x8xbf16>, vector<2x8x8xbf16>, vector<2x8x8xf32> -> vector<2x8x8xf32>
    "tpu.trace_stop"() : () -> ()
    %119 = tpu.concatenate %58, %78, %98, %118 in 2 : vector<2x8x8xf32>, vector<2x8x8xf32>, vector<2x8x8xf32>, vector<2x8x8xf32> -> vector<2x8x32xf32>
    %120 = vector.shape_cast %119 : vector<2x8x32xf32> to vector<16x32xf32>
    %121 = arith.truncf %120 : vector<16x32xf32> to vector<16x32xbf16>
    %c0_30 = arith.constant 0 : index
    %c0_31 = arith.constant 0 : index
    %122 = vector.load %arg5[%c0_30, %c0_31] : memref<32x32xbf16, #tpu.memory_space<vmem>>, vector<32x32xbf16>
    %cst_32 = arith.constant dense<0.000000e+00> : vector<16x32xf32>
    %123 = tpu.matmul %121, %122, %cst_32 {dimension_numbers = #tpu.dot_dimension_numbers<[1], [0], [0], [1], [0, 0, 1, 1], [], []>} : vector<16x32xbf16>, vector<32x32xbf16>, vector<16x32xf32> -> vector<16x32xf32>
    %c0_33 = arith.constant 0 : index
    %c0_34 = arith.constant 0 : index
    %124 = vector.load %arg6[%c0_33, %c0_34] : memref<1x32xf32, #tpu.memory_space<vmem>>, vector<1x32xf32>
    %125 = vector.broadcast %124 : vector<1x32xf32> to vector<16x32xf32>
    %126 = arith.addf %123, %125 : vector<16x32xf32>
    %127 = arith.addf %3, %126 : vector<16x32xf32>
    %c0_35 = arith.constant 0 : index
    %c0_36 = arith.constant 0 : index
    %128 = vector.load %arg7[%c0_35, %c0_36] : memref<1x32xf32, #tpu.memory_space<vmem>>, vector<1x32xf32>
    %c0_37 = arith.constant 0 : index
    %c0_38 = arith.constant 0 : index
    %129 = vector.load %arg8[%c0_37, %c0_38] : memref<1x32xf32, #tpu.memory_space<vmem>>, vector<1x32xf32>
    %cst_39 = arith.constant dense<0.000000e+00> : vector<16xf32>
    %130 = vector.multi_reduction <add>, %127, %cst_39 [1] : vector<16x32xf32> to vector<16xf32>
    %131 = vector.shape_cast %130 : vector<16xf32> to vector<16x1xf32>
    %cst_40 = arith.constant 3.200000e+01 : f32
    %132 = vector.broadcast %cst_40 : f32 to vector<16x1xf32>
    %133 = arith.divf %131, %132 : vector<16x1xf32>
    %134 = vector.broadcast %133 : vector<16x1xf32> to vector<16x32xf32>
    %135 = arith.subf %127, %134 : vector<16x32xf32>
    %136 = arith.mulf %135, %135 : vector<16x32xf32>
    %cst_41 = arith.constant dense<0.000000e+00> : vector<16xf32>
    %137 = vector.multi_reduction <add>, %136, %cst_41 [1] : vector<16x32xf32> to vector<16xf32>
    %138 = vector.shape_cast %137 : vector<16xf32> to vector<16x1xf32>
    %cst_42 = arith.constant 3.200000e+01 : f32
    %139 = vector.broadcast %cst_42 : f32 to vector<16x1xf32>
    %140 = arith.divf %138, %139 : vector<16x1xf32>
    %141 = vector.broadcast %133 : vector<16x1xf32> to vector<16x32xf32>
    %142 = arith.subf %127, %141 : vector<16x32xf32>
    %cst_43 = arith.constant 9.99999974E-6 : f32
    %143 = vector.broadcast %cst_43 : f32 to vector<16x1xf32>
    %144 = arith.addf %140, %143 : vector<16x1xf32>
    %145 = math.rsqrt %144 : vector<16x1xf32>
    %146 = vector.broadcast %145 : vector<16x1xf32> to vector<16x32xf32>
    %147 = arith.mulf %142, %146 : vector<16x32xf32>
    %148 = vector.broadcast %128 : vector<1x32xf32> to vector<16x32xf32>
    %149 = arith.mulf %147, %148 : vector<16x32xf32>
    %150 = vector.broadcast %129 : vector<1x32xf32> to vector<16x32xf32>
    %151 = arith.addf %149, %150 : vector<16x32xf32>
    %152 = arith.truncf %151 : vector<16x32xf32> to vector<16x32xbf16>
    %c0_44 = arith.constant 0 : index
    %c0_45 = arith.constant 0 : index
    %153 = vector.load %arg9[%c0_44, %c0_45] : memref<32x64xbf16, #tpu.memory_space<vmem>>, vector<32x64xbf16>
    %cst_46 = arith.constant dense<0.000000e+00> : vector<16x64xf32>
    %154 = tpu.matmul %152, %153, %cst_46 {dimension_numbers = #tpu.dot_dimension_numbers<[1], [0], [0], [1], [0, 0, 1, 1], [], []>} : vector<16x32xbf16>, vector<32x64xbf16>, vector<16x64xf32> -> vector<16x64xf32>
    %c0_47 = arith.constant 0 : index
    %c0_48 = arith.constant 0 : index
    %155 = vector.load %arg10[%c0_47, %c0_48] : memref<1x64xf32, #tpu.memory_space<vmem>>, vector<1x64xf32>
    %156 = vector.broadcast %155 : vector<1x64xf32> to vector<16x64xf32>
    %157 = arith.addf %154, %156 : vector<16x64xf32>
    %cst_49 = arith.constant 0.000000e+00 : f32
    %158 = vector.broadcast %cst_49 : f32 to vector<16x64xf32>
    %159 = arith.maximumf %157, %158 : vector<16x64xf32>
    %160 = arith.truncf %159 : vector<16x64xf32> to vector<16x64xbf16>
    %c0_50 = arith.constant 0 : index
    %c0_51 = arith.constant 0 : index
    %161 = vector.load %arg11[%c0_50, %c0_51] : memref<64x32xbf16, #tpu.memory_space<vmem>>, vector<64x32xbf16>
    %cst_52 = arith.constant dense<0.000000e+00> : vector<16x32xf32>
    %162 = tpu.matmul %160, %161, %cst_52 {dimension_numbers = #tpu.dot_dimension_numbers<[1], [0], [0], [1], [0, 0, 1, 1], [], []>} : vector<16x64xbf16>, vector<64x32xbf16>, vector<16x32xf32> -> vector<16x32xf32>
    %c0_53 = arith.constant 0 : index
    %c0_54 = arith.constant 0 : index
    %163 = vector.load %arg12[%c0_53, %c0_54] : memref<1x32xf32, #tpu.memory_space<vmem>>, vector<1x32xf32>
    %164 = vector.broadcast %163 : vector<1x32xf32> to vector<16x32xf32>
    %165 = arith.addf %162, %164 : vector<16x32xf32>
    %166 = arith.addf %151, %165 : vector<16x32xf32>
    %c0_55 = arith.constant 0 : index
    %c0_56 = arith.constant 0 : index
    %167 = vector.load %arg13[%c0_55, %c0_56] : memref<1x32xf32, #tpu.memory_space<vmem>>, vector<1x32xf32>
    %c0_57 = arith.constant 0 : index
    %c0_58 = arith.constant 0 : index
    %168 = vector.load %arg14[%c0_57, %c0_58] : memref<1x32xf32, #tpu.memory_space<vmem>>, vector<1x32xf32>
    %cst_59 = arith.constant dense<0.000000e+00> : vector<16xf32>
    %169 = vector.multi_reduction <add>, %166, %cst_59 [1] : vector<16x32xf32> to vector<16xf32>
    %170 = vector.shape_cast %169 : vector<16xf32> to vector<16x1xf32>
    %cst_60 = arith.constant 3.200000e+01 : f32
    %171 = vector.broadcast %cst_60 : f32 to vector<16x1xf32>
    %172 = arith.divf %170, %171 : vector<16x1xf32>
    %173 = vector.broadcast %172 : vector<16x1xf32> to vector<16x32xf32>
    %174 = arith.subf %166, %173 : vector<16x32xf32>
    %175 = arith.mulf %174, %174 : vector<16x32xf32>
    %cst_61 = arith.constant dense<0.000000e+00> : vector<16xf32>
    %176 = vector.multi_reduction <add>, %175, %cst_61 [1] : vector<16x32xf32> to vector<16xf32>
    %177 = vector.shape_cast %176 : vector<16xf32> to vector<16x1xf32>
    %cst_62 = arith.constant 3.200000e+01 : f32
    %178 = vector.broadcast %cst_62 : f32 to vector<16x1xf32>
    %179 = arith.divf %177, %178 : vector<16x1xf32>
    %180 = vector.broadcast %172 : vector<16x1xf32> to vector<16x32xf32>
    %181 = arith.subf %166, %180 : vector<16x32xf32>
    %cst_63 = arith.constant 9.99999974E-6 : f32
    %182 = vector.broadcast %cst_63 : f32 to vector<16x1xf32>
    %183 = arith.addf %179, %182 : vector<16x1xf32>
    %184 = math.rsqrt %183 : vector<16x1xf32>
    %185 = vector.broadcast %184 : vector<16x1xf32> to vector<16x32xf32>
    %186 = arith.mulf %181, %185 : vector<16x32xf32>
    %187 = vector.broadcast %167 : vector<1x32xf32> to vector<16x32xf32>
    %188 = arith.mulf %186, %187 : vector<16x32xf32>
    %189 = vector.broadcast %168 : vector<1x32xf32> to vector<16x32xf32>
    %190 = arith.addf %188, %189 : vector<16x32xf32>
    %191 = vector.shape_cast %190 : vector<16x32xf32> to vector<2x8x32xf32>
    %192 = arith.truncf %191 : vector<2x8x32xf32> to vector<2x8x32xbf16>
    %c0_64 = arith.constant 0 : index
    %c0_65 = arith.constant 0 : index
    %c0_66 = arith.constant 0 : index
    %193 = vector.load %arg15[%c0_64, %c0_65, %c0_66] : memref<2x8x32xbf16, #tpu.memory_space<vmem>>, vector<2x8x32xbf16>
    tpu.vector_store %arg15[%c0_64, %c0_65, %c0_66], %192 {strides = array<i32>} : memref<2x8x32xbf16, #tpu.memory_space<vmem>>, vector<2x8x32xbf16>,
    %cst_67 = arith.constant dense<0.000000e+00> : vector<2x1xf32>
    %194 = vector.multi_reduction <add>, %38, %cst_67 [1] : vector<2x8x1xf32> to vector<2x1xf32>
    %195 = vector.shape_cast %194 : vector<2x1xf32> to vector<2x1x1xf32>
    %cst_68 = arith.constant 0.000000e+00 : f32
    %196 = vector.broadcast %cst_68 : f32 to vector<2x1x1xf32>
    %197 = arith.cmpf ogt, %195, %196 : vector<2x1x1xf32>
    %cst_69 = arith.constant 1.000000e+00 : f32
    %198 = vector.broadcast %cst_69 : f32 to vector<2x1x1xf32>
    %199 = arith.maximumf %195, %198 : vector<2x1x1xf32>
    %cst_70 = arith.constant 1.000000e+00 : f32
    %200 = vector.broadcast %cst_70 : f32 to vector<2x1x1xf32>
    %201 = arith.divf %200, %199 : vector<2x1x1xf32>
    %cst_71 = arith.constant 0.000000e+00 : f32
    %202 = vector.broadcast %cst_71 : f32 to vector<2x1x1xf32>
    %203 = arith.select %197, %201, %202 : vector<2x1x1xi1>, vector<2x1x1xf32>
    %204 = vector.broadcast %38 : vector<2x8x1xf32> to vector<2x8x32xf32>
    %205 = arith.mulf %191, %204 : vector<2x8x32xf32>
    %cst_72 = arith.constant dense<0.000000e+00> : vector<2x32xf32>
    %206 = vector.multi_reduction <add>, %205, %cst_72 [1] : vector<2x8x32xf32> to vector<2x32xf32>
    %207 = vector.shape_cast %206 : vector<2x32xf32> to vector<2x1x32xf32>
    %208 = vector.broadcast %203 : vector<2x1x1xf32> to vector<2x1x32xf32>
    %209 = arith.mulf %207, %208 : vector<2x1x32xf32>
    %c0_73 = arith.constant 0 : index
    %c0_74 = arith.constant 0 : index
    %c0_75 = arith.constant 0 : index
    %210 = vector.load %arg16[%c0_73, %c0_74, %c0_75] : memref<2x1x32xf32, #tpu.memory_space<vmem>>, vector<2x1x32xf32>
    tpu.vector_store %arg16[%c0_73, %c0_74, %c0_75], %209 {strides = array<i32>} : memref<2x1x32xf32, #tpu.memory_space<vmem>>, vector<2x1x32xf32>,
    return
  }
  func.func @transform_0(%arg0: i32, %arg1: memref<2xi32, #tpu.memory_space<smem>>) -> (i32, i32, i32) {
    %c0_i32 = arith.constant 0 : i32
    %c0_i32_0 = arith.constant 0 : i32
    %c0_i32_1 = arith.constant 0 : i32
    return %arg0, %c0_i32, %c0_i32_0 : i32, i32, i32
  }
  func.func @transform_1(%arg0: i32, %arg1: memref<2xi32, #tpu.memory_space<smem>>) -> (i32, i32) {
    %c0_i32 = arith.constant 0 : i32
    %c0_i32_0 = arith.constant 0 : i32
    %c0_i32_1 = arith.constant 0 : i32
    return %c0_i32, %c0_i32_0 : i32, i32
  }
  func.func @transform_2(%arg0: i32, %arg1: memref<2xi32, #tpu.memory_space<smem>>) -> (i32, i32) {
    %c0_i32 = arith.constant 0 : i32
    %c0_i32_0 = arith.constant 0 : i32
    %c0_i32_1 = arith.constant 0 : i32
    return %c0_i32, %c0_i32_0 : i32, i32
  }
  func.func @transform_3(%arg0: i32, %arg1: memref<2xi32, #tpu.memory_space<smem>>) -> (i32, i32) {
    %c0_i32 = arith.constant 0 : i32
    %c0_i32_0 = arith.constant 0 : i32
    %c0_i32_1 = arith.constant 0 : i32
    return %c0_i32, %c0_i32_0 : i32, i32
  }
  func.func @transform_4(%arg0: i32, %arg1: memref<2xi32, #tpu.memory_space<smem>>) -> (i32, i32) {
    %c0_i32 = arith.constant 0 : i32
    %c0_i32_0 = arith.constant 0 : i32
    %c0_i32_1 = arith.constant 0 : i32
    return %c0_i32, %c0_i32_0 : i32, i32
  }
  func.func @transform_5(%arg0: i32, %arg1: memref<2xi32, #tpu.memory_space<smem>>) -> (i32, i32) {
    %c0_i32 = arith.constant 0 : i32
    %c0_i32_0 = arith.constant 0 : i32
    %c0_i32_1 = arith.constant 0 : i32
    return %c0_i32, %c0_i32_0 : i32, i32
  }
  func.func @transform_6(%arg0: i32, %arg1: memref<2xi32, #tpu.memory_space<smem>>) -> (i32, i32) {
    %c0_i32 = arith.constant 0 : i32
    %c0_i32_0 = arith.constant 0 : i32
    %c0_i32_1 = arith.constant 0 : i32
    return %c0_i32, %c0_i32_0 : i32, i32
  }
  func.func @transform_7(%arg0: i32, %arg1: memref<2xi32, #tpu.memory_space<smem>>) -> (i32, i32) {
    %c0_i32 = arith.constant 0 : i32
    %c0_i32_0 = arith.constant 0 : i32
    %c0_i32_1 = arith.constant 0 : i32
    return %c0_i32, %c0_i32_0 : i32, i32
  }
  func.func @transform_8(%arg0: i32, %arg1: memref<2xi32, #tpu.memory_space<smem>>) -> (i32, i32) {
    %c0_i32 = arith.constant 0 : i32
    %c0_i32_0 = arith.constant 0 : i32
    %c0_i32_1 = arith.constant 0 : i32
    return %c0_i32, %c0_i32_0 : i32, i32
  }
  func.func @transform_9(%arg0: i32, %arg1: memref<2xi32, #tpu.memory_space<smem>>) -> (i32, i32) {
    %c0_i32 = arith.constant 0 : i32
    %c0_i32_0 = arith.constant 0 : i32
    %c0_i32_1 = arith.constant 0 : i32
    return %c0_i32, %c0_i32_0 : i32, i32
  }
  func.func @transform_10(%arg0: i32, %arg1: memref<2xi32, #tpu.memory_space<smem>>) -> (i32, i32) {
    %c0_i32 = arith.constant 0 : i32
    %c0_i32_0 = arith.constant 0 : i32
    %c0_i32_1 = arith.constant 0 : i32
    return %c0_i32, %c0_i32_0 : i32, i32
  }
  func.func @transform_11(%arg0: i32, %arg1: memref<2xi32, #tpu.memory_space<smem>>) -> (i32, i32) {
    %c0_i32 = arith.constant 0 : i32
    %c0_i32_0 = arith.constant 0 : i32
    %c0_i32_1 = arith.constant 0 : i32
    return %c0_i32, %c0_i32_0 : i32, i32
  }
  func.func @transform_12(%arg0: i32, %arg1: memref<2xi32, #tpu.memory_space<smem>>) -> (i32, i32) {
    %c0_i32 = arith.constant 0 : i32
    %c0_i32_0 = arith.constant 0 : i32
    %c0_i32_1 = arith.constant 0 : i32
    return %c0_i32, %c0_i32_0 : i32, i32
  }
  func.func @transform_13(%arg0: i32, %arg1: memref<2xi32, #tpu.memory_space<smem>>) -> (i32, i32, i32) {
    %c0_i32 = arith.constant 0 : i32
    %c0_i32_0 = arith.constant 0 : i32
    %c0_i32_1 = arith.constant 0 : i32
    return %arg0, %c0_i32, %c0_i32_0 : i32, i32, i32
  }
  func.func @transform_14(%arg0: i32, %arg1: memref<2xi32, #tpu.memory_space<smem>>) -> (i32, i32, i32) {
    %c0_i32 = arith.constant 0 : i32
    %c0_i32_0 = arith.constant 0 : i32
    %c0_i32_1 = arith.constant 0 : i32
    return %arg0, %c0_i32, %c0_i32_0 : i32, i32, i32
  }
}

module attributes {stable_mosaic.version = 11 : i64} {
  func.func @_inproj_pe_kernel(%arg0: i32, %arg1: memref<2x8x16xf32, #tpu.memory_space<vmem>>, %arg2: memref<16x32xbf16, #tpu.memory_space<vmem>>, %arg3: memref<1x32xf32, #tpu.memory_space<vmem>>, %arg4: memref<8x32xf32, #tpu.memory_space<vmem>>, %arg5: memref<2x8x32xbf16, #tpu.memory_space<vmem>>) attributes {dimension_semantics = [#tpu.dimension_semantics<parallel>], iteration_bounds = array<i64: 1>, scalar_prefetch = 0 : i64, scratch_operands = 0 : i64, tpu.core_type = #tpu.core_type<tc>, window_params = [{transform_indices = @transform_0, window_bounds = array<i64: 2, 8, 16>}, {pipeline_mode = #tpu.pipeline_mode<synchronous>, transform_indices = @transform_1, window_bounds = array<i64: 16, 32>}, {pipeline_mode = #tpu.pipeline_mode<synchronous>, transform_indices = @transform_2, window_bounds = array<i64: 1, 32>}, {pipeline_mode = #tpu.pipeline_mode<synchronous>, transform_indices = @transform_3, window_bounds = array<i64: 8, 32>}, {transform_indices = @transform_4, window_bounds = array<i64: 2, 8, 32>}]} {
    %c0 = arith.constant 0 : index
    %c0_0 = arith.constant 0 : index
    %c0_1 = arith.constant 0 : index
    %0 = vector.load %arg1[%c0, %c0_0, %c0_1] : memref<2x8x16xf32, #tpu.memory_space<vmem>>, vector<2x8x16xf32>
    %1 = vector.shape_cast %0 : vector<2x8x16xf32> to vector<16x16xf32>
    %2 = arith.truncf %1 : vector<16x16xf32> to vector<16x16xbf16>
    %c0_2 = arith.constant 0 : index
    %c0_3 = arith.constant 0 : index
    %3 = vector.load %arg2[%c0_2, %c0_3] : memref<16x32xbf16, #tpu.memory_space<vmem>>, vector<16x32xbf16>
    %cst = arith.constant dense<0.000000e+00> : vector<16x32xf32>
    %4 = tpu.matmul %2, %3, %cst {dimension_numbers = #tpu.dot_dimension_numbers<[1], [0], [0], [1], [0, 0, 1, 1], [], []>} : vector<16x16xbf16>, vector<16x32xbf16>, vector<16x32xf32> -> vector<16x32xf32>
    %c0_4 = arith.constant 0 : index
    %c0_5 = arith.constant 0 : index
    %5 = vector.load %arg3[%c0_4, %c0_5] : memref<1x32xf32, #tpu.memory_space<vmem>>, vector<1x32xf32>
    %6 = vector.broadcast %5 : vector<1x32xf32> to vector<16x32xf32>
    %7 = arith.addf %4, %6 : vector<16x32xf32>
    %8 = vector.shape_cast %7 : vector<16x32xf32> to vector<2x8x32xf32>
    %c0_6 = arith.constant 0 : index
    %c0_7 = arith.constant 0 : index
    %9 = vector.load %arg4[%c0_6, %c0_7] : memref<8x32xf32, #tpu.memory_space<vmem>>, vector<8x32xf32>
    %10 = vector.shape_cast %9 : vector<8x32xf32> to vector<1x8x32xf32>
    %11 = vector.broadcast %10 : vector<1x8x32xf32> to vector<2x8x32xf32>
    %12 = arith.addf %8, %11 : vector<2x8x32xf32>
    %13 = arith.truncf %12 : vector<2x8x32xf32> to vector<2x8x32xbf16>
    %c0_8 = arith.constant 0 : index
    %c0_9 = arith.constant 0 : index
    %c0_10 = arith.constant 0 : index
    %14 = vector.load %arg5[%c0_8, %c0_9, %c0_10] : memref<2x8x32xbf16, #tpu.memory_space<vmem>>, vector<2x8x32xbf16>
    tpu.vector_store %arg5[%c0_8, %c0_9, %c0_10], %13 {strides = array<i32>} : memref<2x8x32xbf16, #tpu.memory_space<vmem>>, vector<2x8x32xbf16>,
    return
  }
  func.func @transform_0(%arg0: i32) -> (i32, i32, i32) {
    %c0_i32 = arith.constant 0 : i32
    %c0_i32_0 = arith.constant 0 : i32
    %c0_i32_1 = arith.constant 0 : i32
    return %arg0, %c0_i32, %c0_i32_0 : i32, i32, i32
  }
  func.func @transform_1(%arg0: i32) -> (i32, i32) {
    %c0_i32 = arith.constant 0 : i32
    %c0_i32_0 = arith.constant 0 : i32
    %c0_i32_1 = arith.constant 0 : i32
    return %c0_i32, %c0_i32_0 : i32, i32
  }
  func.func @transform_2(%arg0: i32) -> (i32, i32) {
    %c0_i32 = arith.constant 0 : i32
    %c0_i32_0 = arith.constant 0 : i32
    %c0_i32_1 = arith.constant 0 : i32
    return %c0_i32, %c0_i32_0 : i32, i32
  }
  func.func @transform_3(%arg0: i32) -> (i32, i32) {
    %c0_i32 = arith.constant 0 : i32
    %c0_i32_0 = arith.constant 0 : i32
    %c0_i32_1 = arith.constant 0 : i32
    return %c0_i32, %c0_i32_0 : i32, i32
  }
  func.func @transform_4(%arg0: i32) -> (i32, i32, i32) {
    %c0_i32 = arith.constant 0 : i32
    %c0_i32_0 = arith.constant 0 : i32
    %c0_i32_1 = arith.constant 0 : i32
    return %arg0, %c0_i32, %c0_i32_0 : i32, i32, i32
  }
}

module attributes {stable_mosaic.version = 11 : i64} {
  func.func @_layer_kernel(%arg0: i32, %arg1: memref<2xi32, #tpu.memory_space<smem>>, %arg2: memref<2x8x32xbf16, #tpu.memory_space<vmem>>, %arg3: memref<32x96xbf16, #tpu.memory_space<vmem>>, %arg4: memref<1x96xf32, #tpu.memory_space<vmem>>, %arg5: memref<32x32xbf16, #tpu.memory_space<vmem>>, %arg6: memref<1x32xf32, #tpu.memory_space<vmem>>, %arg7: memref<1x32xf32, #tpu.memory_space<vmem>>, %arg8: memref<1x32xf32, #tpu.memory_space<vmem>>, %arg9: memref<32x64xbf16, #tpu.memory_space<vmem>>, %arg10: memref<1x64xf32, #tpu.memory_space<vmem>>, %arg11: memref<64x32xbf16, #tpu.memory_space<vmem>>, %arg12: memref<1x32xf32, #tpu.memory_space<vmem>>, %arg13: memref<1x32xf32, #tpu.memory_space<vmem>>, %arg14: memref<1x32xf32, #tpu.memory_space<vmem>>, %arg15: memref<2x8x32xbf16, #tpu.memory_space<vmem>>, %arg16: memref<2x1x32xf32, #tpu.memory_space<vmem>>) attributes {dimension_semantics = [#tpu.dimension_semantics<parallel>], iteration_bounds = array<i64: 1>, scalar_prefetch = 1 : i64, scratch_operands = 0 : i64, tpu.core_type = #tpu.core_type<tc>, window_params = [{transform_indices = @transform_0, window_bounds = array<i64: 2, 8, 32>}, {pipeline_mode = #tpu.pipeline_mode<synchronous>, transform_indices = @transform_1, window_bounds = array<i64: 32, 96>}, {pipeline_mode = #tpu.pipeline_mode<synchronous>, transform_indices = @transform_2, window_bounds = array<i64: 1, 96>}, {pipeline_mode = #tpu.pipeline_mode<synchronous>, transform_indices = @transform_3, window_bounds = array<i64: 32, 32>}, {pipeline_mode = #tpu.pipeline_mode<synchronous>, transform_indices = @transform_4, window_bounds = array<i64: 1, 32>}, {pipeline_mode = #tpu.pipeline_mode<synchronous>, transform_indices = @transform_5, window_bounds = array<i64: 1, 32>}, {pipeline_mode = #tpu.pipeline_mode<synchronous>, transform_indices = @transform_6, window_bounds = array<i64: 1, 32>}, {pipeline_mode = #tpu.pipeline_mode<synchronous>, transform_indices = @transform_7, window_bounds = array<i64: 32, 64>}, {pipeline_mode = #tpu.pipeline_mode<synchronous>, transform_indices = @transform_8, window_bounds = array<i64: 1, 64>}, {pipeline_mode = #tpu.pipeline_mode<synchronous>, transform_indices = @transform_9, window_bounds = array<i64: 64, 32>}, {pipeline_mode = #tpu.pipeline_mode<synchronous>, transform_indices = @transform_10, window_bounds = array<i64: 1, 32>}, {pipeline_mode = #tpu.pipeline_mode<synchronous>, transform_indices = @transform_11, window_bounds = array<i64: 1, 32>}, {pipeline_mode = #tpu.pipeline_mode<synchronous>, transform_indices = @transform_12, window_bounds = array<i64: 1, 32>}, {transform_indices = @transform_13, window_bounds = array<i64: 2, 8, 32>}, {transform_indices = @transform_14, window_bounds = array<i64: 2, 1, 32>}]} {
    %c2_i32 = arith.constant 2 : i32
    %0 = arith.muli %arg0, %c2_i32 : i32
    %c0 = arith.constant 0 : index
    %c0_0 = arith.constant 0 : index
    %c0_1 = arith.constant 0 : index
    %1 = vector.load %arg2[%c0, %c0_0, %c0_1] : memref<2x8x32xbf16, #tpu.memory_space<vmem>>, vector<2x8x32xbf16>
    %2 = vector.shape_cast %1 : vector<2x8x32xbf16> to vector<16x32xbf16>
    %3 = arith.extf %2 : vector<16x32xbf16> to vector<16x32xf32>
    %c0_2 = arith.constant 0 : index
    %c0_3 = arith.constant 0 : index
    %4 = vector.load %arg3[%c0_2, %c0_3] : memref<32x96xbf16, #tpu.memory_space<vmem>>, vector<32x96xbf16>
    %cst = arith.constant dense<0.000000e+00> : vector<16x96xf32>
    %5 = tpu.matmul %2, %4, %cst {dimension_numbers = #tpu.dot_dimension_numbers<[1], [0], [0], [1], [0, 0, 1, 1], [], []>} : vector<16x32xbf16>, vector<32x96xbf16>, vector<16x96xf32> -> vector<16x96xf32>
    %c0_4 = arith.constant 0 : index
    %c0_5 = arith.constant 0 : index
    %6 = vector.load %arg4[%c0_4, %c0_5] : memref<1x96xf32, #tpu.memory_space<vmem>>, vector<1x96xf32>
    %7 = vector.broadcast %6 : vector<1x96xf32> to vector<16x96xf32>
    %8 = arith.addf %5, %7 : vector<16x96xf32>
    %9 = arith.truncf %8 : vector<16x96xf32> to vector<16x96xbf16>
    %10 = vector.shape_cast %9 : vector<16x96xbf16> to vector<2x8x96xbf16>
    %c0_i32 = arith.constant 0 : i32
    %11 = arith.addi %0, %c0_i32 : i32
    %12 = arith.index_cast %11 : i32 to index
    %13 = memref.load %arg1[%12] : memref<2xi32, #tpu.memory_space<smem>>
    %c1_i32 = arith.constant 1 : i32
    %14 = arith.addi %0, %c1_i32 : i32
    %15 = arith.index_cast %14 : i32 to index
    %16 = memref.load %arg1[%15] : memref<2xi32, #tpu.memory_space<smem>>
    %17 = tpu.iota {dimensions = array<i32: 2>} : vector<1x1x8xi32>
    %18 = tpu.iota {dimensions = array<i32: 1>} : vector<1x8x1xi32>
    %19 = vector.broadcast %13 : i32 to vector<1x1x8xi32>
    %20 = arith.cmpi slt, %17, %19 : vector<1x1x8xi32>
    %cst_6 = arith.constant 0.000000e+00 : f32
    %cst_7 = arith.constant -1.000000e+30 : f32
    %21 = vector.broadcast %cst_6 : f32 to vector<1x1x8xf32>
    %22 = vector.broadcast %cst_7 : f32 to vector<1x1x8xf32>
    %23 = arith.select %20, %21, %22 : vector<1x1x8xi1>, vector<1x1x8xf32>
    %24 = vector.broadcast %16 : i32 to vector<1x1x8xi32>
    %25 = arith.cmpi slt, %17, %24 : vector<1x1x8xi32>
    %cst_8 = arith.constant 0.000000e+00 : f32
    %cst_9 = arith.constant -1.000000e+30 : f32
    %26 = vector.broadcast %cst_8 : f32 to vector<1x1x8xf32>
    %27 = vector.broadcast %cst_9 : f32 to vector<1x1x8xf32>
    %28 = arith.select %25, %26, %27 : vector<1x1x8xi1>, vector<1x1x8xf32>
    %29 = tpu.concatenate %23, %28 in 0 : vector<1x1x8xf32>, vector<1x1x8xf32> -> vector<2x1x8xf32>
    %30 = vector.broadcast %13 : i32 to vector<1x8x1xi32>
    %31 = arith.cmpi slt, %18, %30 : vector<1x8x1xi32>
    %32 = arith.extui %31 : vector<1x8x1xi1> to vector<1x8x1xi32>
    %33 = arith.sitofp %32 : vector<1x8x1xi32> to vector<1x8x1xf32>
    %34 = vector.broadcast %16 : i32 to vector<1x8x1xi32>
    %35 = arith.cmpi slt, %18, %34 : vector<1x8x1xi32>
    %36 = arith.extui %35 : vector<1x8x1xi1> to vector<1x8x1xi32>
    %37 = arith.sitofp %36 : vector<1x8x1xi32> to vector<1x8x1xf32>
    %38 = tpu.concatenate %33, %37 in 0 : vector<1x8x1xf32>, vector<1x8x1xf32> -> vector<2x8x1xf32>
    %39 = vector.extract_strided_slice %10 {offsets = [0, 0, 0], sizes = [2, 8, 8], strides = [1, 1, 1]} : vector<2x8x96xbf16> to vector<2x8x8xbf16>
    %40 = vector.extract_strided_slice %10 {offsets = [0, 0, 32], sizes = [2, 8, 8], strides = [1, 1, 1]} : vector<2x8x96xbf16> to vector<2x8x8xbf16>
    %41 = vector.extract_strided_slice %10 {offsets = [0, 0, 64], sizes = [2, 8, 8], strides = [1, 1, 1]} : vector<2x8x96xbf16> to vector<2x8x8xbf16>
    "tpu.trace_start"() <{level = 10 : i32, message = "bqd,bkd->bqk"}> : () -> ()
    %cst_10 = arith.constant dense<0.000000e+00> : vector<2x8x8xf32>
    %42 = tpu.matmul %39, %40, %cst_10 {dimension_numbers = #tpu.dot_dimension_numbers<[2], [2], [1], [1], [0, 0, 0, 1, 1, 1], [0], [0]>} : vector<2x8x8xbf16>, vector<2x8x8xbf16>, vector<2x8x8xf32> -> vector<2x8x8xf32>
    "tpu.trace_stop"() : () -> ()
    %cst_11 = arith.constant 0.353553385 : f32
    %43 = vector.broadcast %cst_11 : f32 to vector<2x8x8xf32>
    %44 = arith.mulf %42, %43 : vector<2x8x8xf32>
    %45 = vector.broadcast %29 : vector<2x1x8xf32> to vector<2x8x8xf32>
    %46 = arith.addf %44, %45 : vector<2x8x8xf32>
    %cst_12 = arith.constant dense<0xFF800000> : vector<2x8xf32>
    %47 = vector.multi_reduction <maximumf>, %46, %cst_12 [2] : vector<2x8x8xf32> to vector<2x8xf32>
    %48 = vector.shape_cast %47 : vector<2x8xf32> to vector<2x8x1xf32>
    %49 = vector.broadcast %48 : vector<2x8x1xf32> to vector<2x8x8xf32>
    %50 = arith.subf %46, %49 : vector<2x8x8xf32>
    %51 = math.exp %50 : vector<2x8x8xf32>
    %cst_13 = arith.constant dense<0.000000e+00> : vector<2x8xf32>
    %52 = vector.multi_reduction <add>, %51, %cst_13 [2] : vector<2x8x8xf32> to vector<2x8xf32>
    %53 = vector.shape_cast %52 : vector<2x8xf32> to vector<2x8x1xf32>
    %54 = tpu.reciprocal %53 {approx = true} : vector<2x8x1xf32> -> vector<2x8x1xf32>
    %55 = vector.broadcast %54 : vector<2x8x1xf32> to vector<2x8x8xf32>
    %56 = arith.mulf %51, %55 : vector<2x8x8xf32>
    %57 = arith.truncf %56 : vector<2x8x8xf32> to vector<2x8x8xbf16>
    "tpu.trace_start"() <{level = 10 : i32, message = "bqk,bkd->bqd"}> : () -> ()
    %cst_14 = arith.constant dense<0.000000e+00> : vector<2x8x8xf32>
    %58 = tpu.matmul %57, %41, %cst_14 {dimension_numbers = #tpu.dot_dimension_numbers<[2], [1], [1], [2], [0, 0, 0, 1, 1, 2], [0], [0]>} : vector<2x8x8xbf16>, vector<2x8x8xbf16>, vector<2x8x8xf32> -> vector<2x8x8xf32>
    "tpu.trace_stop"() : () -> ()
    %59 = vector.extract_strided_slice %10 {offsets = [0, 0, 8], sizes = [2, 8, 8], strides = [1, 1, 1]} : vector<2x8x96xbf16> to vector<2x8x8xbf16>
    %60 = vector.extract_strided_slice %10 {offsets = [0, 0, 40], sizes = [2, 8, 8], strides = [1, 1, 1]} : vector<2x8x96xbf16> to vector<2x8x8xbf16>
    %61 = vector.extract_strided_slice %10 {offsets = [0, 0, 72], sizes = [2, 8, 8], strides = [1, 1, 1]} : vector<2x8x96xbf16> to vector<2x8x8xbf16>
    "tpu.trace_start"() <{level = 10 : i32, message = "bqd,bkd->bqk"}> : () -> ()
    %cst_15 = arith.constant dense<0.000000e+00> : vector<2x8x8xf32>
    %62 = tpu.matmul %59, %60, %cst_15 {dimension_numbers = #tpu.dot_dimension_numbers<[2], [2], [1], [1], [0, 0, 0, 1, 1, 1], [0], [0]>} : vector<2x8x8xbf16>, vector<2x8x8xbf16>, vector<2x8x8xf32> -> vector<2x8x8xf32>
    "tpu.trace_stop"() : () -> ()
    %cst_16 = arith.constant 0.353553385 : f32
    %63 = vector.broadcast %cst_16 : f32 to vector<2x8x8xf32>
    %64 = arith.mulf %62, %63 : vector<2x8x8xf32>
    %65 = vector.broadcast %29 : vector<2x1x8xf32> to vector<2x8x8xf32>
    %66 = arith.addf %64, %65 : vector<2x8x8xf32>
    %cst_17 = arith.constant dense<0xFF800000> : vector<2x8xf32>
    %67 = vector.multi_reduction <maximumf>, %66, %cst_17 [2] : vector<2x8x8xf32> to vector<2x8xf32>
    %68 = vector.shape_cast %67 : vector<2x8xf32> to vector<2x8x1xf32>
    %69 = vector.broadcast %68 : vector<2x8x1xf32> to vector<2x8x8xf32>
    %70 = arith.subf %66, %69 : vector<2x8x8xf32>
    %71 = math.exp %70 : vector<2x8x8xf32>
    %cst_18 = arith.constant dense<0.000000e+00> : vector<2x8xf32>
    %72 = vector.multi_reduction <add>, %71, %cst_18 [2] : vector<2x8x8xf32> to vector<2x8xf32>
    %73 = vector.shape_cast %72 : vector<2x8xf32> to vector<2x8x1xf32>
    %74 = tpu.reciprocal %73 {approx = true} : vector<2x8x1xf32> -> vector<2x8x1xf32>
    %75 = vector.broadcast %74 : vector<2x8x1xf32> to vector<2x8x8xf32>
    %76 = arith.mulf %71, %75 : vector<2x8x8xf32>
    %77 = arith.truncf %76 : vector<2x8x8xf32> to vector<2x8x8xbf16>
    "tpu.trace_start"() <{level = 10 : i32, message = "bqk,bkd->bqd"}> : () -> ()
    %cst_19 = arith.constant dense<0.000000e+00> : vector<2x8x8xf32>
    %78 = tpu.matmul %77, %61, %cst_19 {dimension_numbers = #tpu.dot_dimension_numbers<[2], [1], [1], [2], [0, 0, 0, 1, 1, 2], [0], [0]>} : vector<2x8x8xbf16>, vector<2x8x8xbf16>, vector<2x8x8xf32> -> vector<2x8x8xf32>
    "tpu.trace_stop"() : () -> ()
    %79 = vector.extract_strided_slice %10 {offsets = [0, 0, 16], sizes = [2, 8, 8], strides = [1, 1, 1]} : vector<2x8x96xbf16> to vector<2x8x8xbf16>
    %80 = vector.extract_strided_slice %10 {offsets = [0, 0, 48], sizes = [2, 8, 8], strides = [1, 1, 1]} : vector<2x8x96xbf16> to vector<2x8x8xbf16>
    %81 = vector.extract_strided_slice %10 {offsets = [0, 0, 80], sizes = [2, 8, 8], strides = [1, 1, 1]} : vector<2x8x96xbf16> to vector<2x8x8xbf16>
    "tpu.trace_start"() <{level = 10 : i32, message = "bqd,bkd->bqk"}> : () -> ()
    %cst_20 = arith.constant dense<0.000000e+00> : vector<2x8x8xf32>
    %82 = tpu.matmul %79, %80, %cst_20 {dimension_numbers = #tpu.dot_dimension_numbers<[2], [2], [1], [1], [0, 0, 0, 1, 1, 1], [0], [0]>} : vector<2x8x8xbf16>, vector<2x8x8xbf16>, vector<2x8x8xf32> -> vector<2x8x8xf32>
    "tpu.trace_stop"() : () -> ()
    %cst_21 = arith.constant 0.353553385 : f32
    %83 = vector.broadcast %cst_21 : f32 to vector<2x8x8xf32>
    %84 = arith.mulf %82, %83 : vector<2x8x8xf32>
    %85 = vector.broadcast %29 : vector<2x1x8xf32> to vector<2x8x8xf32>
    %86 = arith.addf %84, %85 : vector<2x8x8xf32>
    %cst_22 = arith.constant dense<0xFF800000> : vector<2x8xf32>
    %87 = vector.multi_reduction <maximumf>, %86, %cst_22 [2] : vector<2x8x8xf32> to vector<2x8xf32>
    %88 = vector.shape_cast %87 : vector<2x8xf32> to vector<2x8x1xf32>
    %89 = vector.broadcast %88 : vector<2x8x1xf32> to vector<2x8x8xf32>
    %90 = arith.subf %86, %89 : vector<2x8x8xf32>
    %91 = math.exp %90 : vector<2x8x8xf32>
    %cst_23 = arith.constant dense<0.000000e+00> : vector<2x8xf32>
    %92 = vector.multi_reduction <add>, %91, %cst_23 [2] : vector<2x8x8xf32> to vector<2x8xf32>
    %93 = vector.shape_cast %92 : vector<2x8xf32> to vector<2x8x1xf32>
    %94 = tpu.reciprocal %93 {approx = true} : vector<2x8x1xf32> -> vector<2x8x1xf32>
    %95 = vector.broadcast %94 : vector<2x8x1xf32> to vector<2x8x8xf32>
    %96 = arith.mulf %91, %95 : vector<2x8x8xf32>
    %97 = arith.truncf %96 : vector<2x8x8xf32> to vector<2x8x8xbf16>
    "tpu.trace_start"() <{level = 10 : i32, message = "bqk,bkd->bqd"}> : () -> ()
    %cst_24 = arith.constant dense<0.000000e+00> : vector<2x8x8xf32>
    %98 = tpu.matmul %97, %81, %cst_24 {dimension_numbers = #tpu.dot_dimension_numbers<[2], [1], [1], [2], [0, 0, 0, 1, 1, 2], [0], [0]>} : vector<2x8x8xbf16>, vector<2x8x8xbf16>, vector<2x8x8xf32> -> vector<2x8x8xf32>
    "tpu.trace_stop"() : () -> ()
    %99 = vector.extract_strided_slice %10 {offsets = [0, 0, 24], sizes = [2, 8, 8], strides = [1, 1, 1]} : vector<2x8x96xbf16> to vector<2x8x8xbf16>
    %100 = vector.extract_strided_slice %10 {offsets = [0, 0, 56], sizes = [2, 8, 8], strides = [1, 1, 1]} : vector<2x8x96xbf16> to vector<2x8x8xbf16>
    %101 = vector.extract_strided_slice %10 {offsets = [0, 0, 88], sizes = [2, 8, 8], strides = [1, 1, 1]} : vector<2x8x96xbf16> to vector<2x8x8xbf16>
    "tpu.trace_start"() <{level = 10 : i32, message = "bqd,bkd->bqk"}> : () -> ()
    %cst_25 = arith.constant dense<0.000000e+00> : vector<2x8x8xf32>
    %102 = tpu.matmul %99, %100, %cst_25 {dimension_numbers = #tpu.dot_dimension_numbers<[2], [2], [1], [1], [0, 0, 0, 1, 1, 1], [0], [0]>} : vector<2x8x8xbf16>, vector<2x8x8xbf16>, vector<2x8x8xf32> -> vector<2x8x8xf32>
    "tpu.trace_stop"() : () -> ()
    %cst_26 = arith.constant 0.353553385 : f32
    %103 = vector.broadcast %cst_26 : f32 to vector<2x8x8xf32>
    %104 = arith.mulf %102, %103 : vector<2x8x8xf32>
    %105 = vector.broadcast %29 : vector<2x1x8xf32> to vector<2x8x8xf32>
    %106 = arith.addf %104, %105 : vector<2x8x8xf32>
    %cst_27 = arith.constant dense<0xFF800000> : vector<2x8xf32>
    %107 = vector.multi_reduction <maximumf>, %106, %cst_27 [2] : vector<2x8x8xf32> to vector<2x8xf32>
    %108 = vector.shape_cast %107 : vector<2x8xf32> to vector<2x8x1xf32>
    %109 = vector.broadcast %108 : vector<2x8x1xf32> to vector<2x8x8xf32>
    %110 = arith.subf %106, %109 : vector<2x8x8xf32>
    %111 = math.exp %110 : vector<2x8x8xf32>
    %cst_28 = arith.constant dense<0.000000e+00> : vector<2x8xf32>
    %112 = vector.multi_reduction <add>, %111, %cst_28 [2] : vector<2x8x8xf32> to vector<2x8xf32>
    %113 = vector.shape_cast %112 : vector<2x8xf32> to vector<2x8x1xf32>
    %114 = tpu.reciprocal %113 {approx = true} : vector<2x8x1xf32> -> vector<2x8x1xf32>
    %115 = vector.broadcast %114 : vector<2x8x1xf32> to vector<2x8x8xf32>
    %116 = arith.mulf %111, %115 : vector<2x8x8xf32>
    %117 = arith.truncf %116 : vector<2x8x8xf32> to vector<2x8x8xbf16>
    "tpu.trace_start"() <{level = 10 : i32, message = "bqk,bkd->bqd"}> : () -> ()
    %cst_29 = arith.constant dense<0.000000e+00> : vector<2x8x8xf32>
    %118 = tpu.matmul %117, %101, %cst_29 {dimension_numbers = #tpu.dot_dimension_numbers<[2], [1], [1], [2], [0, 0, 0, 1, 1, 2], [0], [0]>} : vector<2x8x8xbf16>, vector<2x8x8xbf16>, vector<2x8x8xf32> -> vector<2x8x8xf32>
    "tpu.trace_stop"() : () -> ()
    %119 = tpu.concatenate %58, %78, %98, %118 in 2 : vector<2x8x8xf32>, vector<2x8x8xf32>, vector<2x8x8xf32>, vector<2x8x8xf32> -> vector<2x8x32xf32>
    %120 = vector.shape_cast %119 : vector<2x8x32xf32> to vector<16x32xf32>
    %121 = arith.truncf %120 : vector<16x32xf32> to vector<16x32xbf16>
    %c0_30 = arith.constant 0 : index
    %c0_31 = arith.constant 0 : index
    %122 = vector.load %arg5[%c0_30, %c0_31] : memref<32x32xbf16, #tpu.memory_space<vmem>>, vector<32x32xbf16>
    %cst_32 = arith.constant dense<0.000000e+00> : vector<16x32xf32>
    %123 = tpu.matmul %121, %122, %cst_32 {dimension_numbers = #tpu.dot_dimension_numbers<[1], [0], [0], [1], [0, 0, 1, 1], [], []>} : vector<16x32xbf16>, vector<32x32xbf16>, vector<16x32xf32> -> vector<16x32xf32>
    %c0_33 = arith.constant 0 : index
    %c0_34 = arith.constant 0 : index
    %124 = vector.load %arg6[%c0_33, %c0_34] : memref<1x32xf32, #tpu.memory_space<vmem>>, vector<1x32xf32>
    %125 = vector.broadcast %124 : vector<1x32xf32> to vector<16x32xf32>
    %126 = arith.addf %123, %125 : vector<16x32xf32>
    %127 = arith.addf %3, %126 : vector<16x32xf32>
    %c0_35 = arith.constant 0 : index
    %c0_36 = arith.constant 0 : index
    %128 = vector.load %arg7[%c0_35, %c0_36] : memref<1x32xf32, #tpu.memory_space<vmem>>, vector<1x32xf32>
    %c0_37 = arith.constant 0 : index
    %c0_38 = arith.constant 0 : index
    %129 = vector.load %arg8[%c0_37, %c0_38] : memref<1x32xf32, #tpu.memory_space<vmem>>, vector<1x32xf32>
    %cst_39 = arith.constant dense<0.000000e+00> : vector<16xf32>
    %130 = vector.multi_reduction <add>, %127, %cst_39 [1] : vector<16x32xf32> to vector<16xf32>
    %131 = vector.shape_cast %130 : vector<16xf32> to vector<16x1xf32>
    %cst_40 = arith.constant 3.200000e+01 : f32
    %132 = vector.broadcast %cst_40 : f32 to vector<16x1xf32>
    %133 = arith.divf %131, %132 : vector<16x1xf32>
    %134 = vector.broadcast %133 : vector<16x1xf32> to vector<16x32xf32>
    %135 = arith.subf %127, %134 : vector<16x32xf32>
    %136 = arith.mulf %135, %135 : vector<16x32xf32>
    %cst_41 = arith.constant dense<0.000000e+00> : vector<16xf32>
    %137 = vector.multi_reduction <add>, %136, %cst_41 [1] : vector<16x32xf32> to vector<16xf32>
    %138 = vector.shape_cast %137 : vector<16xf32> to vector<16x1xf32>
    %cst_42 = arith.constant 3.200000e+01 : f32
    %139 = vector.broadcast %cst_42 : f32 to vector<16x1xf32>
    %140 = arith.divf %138, %139 : vector<16x1xf32>
    %141 = vector.broadcast %133 : vector<16x1xf32> to vector<16x32xf32>
    %142 = arith.subf %127, %141 : vector<16x32xf32>
    %cst_43 = arith.constant 9.99999974E-6 : f32
    %143 = vector.broadcast %cst_43 : f32 to vector<16x1xf32>
    %144 = arith.addf %140, %143 : vector<16x1xf32>
    %145 = math.rsqrt %144 : vector<16x1xf32>
    %146 = vector.broadcast %145 : vector<16x1xf32> to vector<16x32xf32>
    %147 = arith.mulf %142, %146 : vector<16x32xf32>
    %148 = vector.broadcast %128 : vector<1x32xf32> to vector<16x32xf32>
    %149 = arith.mulf %147, %148 : vector<16x32xf32>
    %150 = vector.broadcast %129 : vector<1x32xf32> to vector<16x32xf32>
    %151 = arith.addf %149, %150 : vector<16x32xf32>
    %152 = arith.truncf %151 : vector<16x32xf32> to vector<16x32xbf16>
    %c0_44 = arith.constant 0 : index
    %c0_45 = arith.constant 0 : index
    %153 = vector.load %arg9[%c0_44, %c0_45] : memref<32x64xbf16, #tpu.memory_space<vmem>>, vector<32x64xbf16>
    %cst_46 = arith.constant dense<0.000000e+00> : vector<16x64xf32>
    %154 = tpu.matmul %152, %153, %cst_46 {dimension_numbers = #tpu.dot_dimension_numbers<[1], [0], [0], [1], [0, 0, 1, 1], [], []>} : vector<16x32xbf16>, vector<32x64xbf16>, vector<16x64xf32> -> vector<16x64xf32>
    %c0_47 = arith.constant 0 : index
    %c0_48 = arith.constant 0 : index
    %155 = vector.load %arg10[%c0_47, %c0_48] : memref<1x64xf32, #tpu.memory_space<vmem>>, vector<1x64xf32>
    %156 = vector.broadcast %155 : vector<1x64xf32> to vector<16x64xf32>
    %157 = arith.addf %154, %156 : vector<16x64xf32>
    %cst_49 = arith.constant 0.000000e+00 : f32
    %158 = vector.broadcast %cst_49 : f32 to vector<16x64xf32>
    %159 = arith.maximumf %157, %158 : vector<16x64xf32>
    %160 = arith.truncf %159 : vector<16x64xf32> to vector<16x64xbf16>
    %c0_50 = arith.constant 0 : index
    %c0_51 = arith.constant 0 : index
    %161 = vector.load %arg11[%c0_50, %c0_51] : memref<64x32xbf16, #tpu.memory_space<vmem>>, vector<64x32xbf16>
    %cst_52 = arith.constant dense<0.000000e+00> : vector<16x32xf32>
    %162 = tpu.matmul %160, %161, %cst_52 {dimension_numbers = #tpu.dot_dimension_numbers<[1], [0], [0], [1], [0, 0, 1, 1], [], []>} : vector<16x64xbf16>, vector<64x32xbf16>, vector<16x32xf32> -> vector<16x32xf32>
    %c0_53 = arith.constant 0 : index
    %c0_54 = arith.constant 0 : index
    %163 = vector.load %arg12[%c0_53, %c0_54] : memref<1x32xf32, #tpu.memory_space<vmem>>, vector<1x32xf32>
    %164 = vector.broadcast %163 : vector<1x32xf32> to vector<16x32xf32>
    %165 = arith.addf %162, %164 : vector<16x32xf32>
    %166 = arith.addf %151, %165 : vector<16x32xf32>
    %c0_55 = arith.constant 0 : index
    %c0_56 = arith.constant 0 : index
    %167 = vector.load %arg13[%c0_55, %c0_56] : memref<1x32xf32, #tpu.memory_space<vmem>>, vector<1x32xf32>
    %c0_57 = arith.constant 0 : index
    %c0_58 = arith.constant 0 : index
    %168 = vector.load %arg14[%c0_57, %c0_58] : memref<1x32xf32, #tpu.memory_space<vmem>>, vector<1x32xf32>
    %cst_59 = arith.constant dense<0.000000e+00> : vector<16xf32>
    %169 = vector.multi_reduction <add>, %166, %cst_59 [1] : vector<16x32xf32> to vector<16xf32>
    %170 = vector.shape_cast %169 : vector<16xf32> to vector<16x1xf32>
    %cst_60 = arith.constant 3.200000e+01 : f32
    %171 = vector.broadcast %cst_60 : f32 to vector<16x1xf32>
    %172 = arith.divf %170, %171 : vector<16x1xf32>
    %173 = vector.broadcast %172 : vector<16x1xf32> to vector<16x32xf32>
    %174 = arith.subf %166, %173 : vector<16x32xf32>
    %175 = arith.mulf %174, %174 : vector<16x32xf32>
    %cst_61 = arith.constant dense<0.000000e+00> : vector<16xf32>
    %176 = vector.multi_reduction <add>, %175, %cst_61 [1] : vector<16x32xf32> to vector<16xf32>
    %177 = vector.shape_cast %176 : vector<16xf32> to vector<16x1xf32>
    %cst_62 = arith.constant 3.200000e+01 : f32
    %178 = vector.broadcast %cst_62 : f32 to vector<16x1xf32>
    %179 = arith.divf %177, %178 : vector<16x1xf32>
    %180 = vector.broadcast %172 : vector<16x1xf32> to vector<16x32xf32>
    %181 = arith.subf %166, %180 : vector<16x32xf32>
    %cst_63 = arith.constant 9.99999974E-6 : f32
    %182 = vector.broadcast %cst_63 : f32 to vector<16x1xf32>
    %183 = arith.addf %179, %182 : vector<16x1xf32>
    %184 = math.rsqrt %183 : vector<16x1xf32>
    %185 = vector.broadcast %184 : vector<16x1xf32> to vector<16x32xf32>
    %186 = arith.mulf %181, %185 : vector<16x32xf32>
    %187 = vector.broadcast %167 : vector<1x32xf32> to vector<16x32xf32>
    %188 = arith.mulf %186, %187 : vector<16x32xf32>
    %189 = vector.broadcast %168 : vector<1x32xf32> to vector<16x32xf32>
    %190 = arith.addf %188, %189 : vector<16x32xf32>
    %191 = vector.shape_cast %190 : vector<16x32xf32> to vector<2x8x32xf32>
    %192 = arith.truncf %191 : vector<2x8x32xf32> to vector<2x8x32xbf16>
    %c0_64 = arith.constant 0 : index
    %c0_65 = arith.constant 0 : index
    %c0_66 = arith.constant 0 : index
    %193 = vector.load %arg15[%c0_64, %c0_65, %c0_66] : memref<2x8x32xbf16, #tpu.memory_space<vmem>>, vector<2x8x32xbf16>
    tpu.vector_store %arg15[%c0_64, %c0_65, %c0_66], %192 {strides = array<i32>} : memref<2x8x32xbf16, #tpu.memory_space<vmem>>, vector<2x8x32xbf16>,
    %cst_67 = arith.constant dense<0.000000e+00> : vector<2x1xf32>
    %194 = vector.multi_reduction <add>, %38, %cst_67 [1] : vector<2x8x1xf32> to vector<2x1xf32>
    %195 = vector.shape_cast %194 : vector<2x1xf32> to vector<2x1x1xf32>
    %cst_68 = arith.constant 0.000000e+00 : f32
    %196 = vector.broadcast %cst_68 : f32 to vector<2x1x1xf32>
    %197 = arith.cmpf ogt, %195, %196 : vector<2x1x1xf32>
    %cst_69 = arith.constant 1.000000e+00 : f32
    %198 = vector.broadcast %cst_69 : f32 to vector<2x1x1xf32>
    %199 = arith.maximumf %195, %198 : vector<2x1x1xf32>
    %cst_70 = arith.constant 1.000000e+00 : f32
    %200 = vector.broadcast %cst_70 : f32 to vector<2x1x1xf32>
    %201 = arith.divf %200, %199 : vector<2x1x1xf32>
    %cst_71 = arith.constant 0.000000e+00 : f32
    %202 = vector.broadcast %cst_71 : f32 to vector<2x1x1xf32>
    %203 = arith.select %197, %201, %202 : vector<2x1x1xi1>, vector<2x1x1xf32>
    %204 = vector.broadcast %38 : vector<2x8x1xf32> to vector<2x8x32xf32>
    %205 = arith.mulf %191, %204 : vector<2x8x32xf32>
    %cst_72 = arith.constant dense<0.000000e+00> : vector<2x32xf32>
    %206 = vector.multi_reduction <add>, %205, %cst_72 [1] : vector<2x8x32xf32> to vector<2x32xf32>
    %207 = vector.shape_cast %206 : vector<2x32xf32> to vector<2x1x32xf32>
    %208 = vector.broadcast %203 : vector<2x1x1xf32> to vector<2x1x32xf32>
    %209 = arith.mulf %207, %208 : vector<2x1x32xf32>
    %c0_73 = arith.constant 0 : index
    %c0_74 = arith.constant 0 : index
    %c0_75 = arith.constant 0 : index
    %210 = vector.load %arg16[%c0_73, %c0_74, %c0_75] : memref<2x1x32xf32, #tpu.memory_space<vmem>>, vector<2x1x32xf32>
    tpu.vector_store %arg16[%c0_73, %c0_74, %c0_75], %209 {strides = array<i32>} : memref<2x1x32xf32, #tpu.memory_space<vmem>>, vector<2x1x32xf32>,
    return
  }
  func.func @transform_0(%arg0: i32, %arg1: memref<2xi32, #tpu.memory_space<smem>>) -> (i32, i32, i32) {
    %c0_i32 = arith.constant 0 : i32
    %c0_i32_0 = arith.constant 0 : i32
    %c0_i32_1 = arith.constant 0 : i32
    return %arg0, %c0_i32, %c0_i32_0 : i32, i32, i32
  }
  func.func @transform_1(%arg0: i32, %arg1: memref<2xi32, #tpu.memory_space<smem>>) -> (i32, i32) {
    %c0_i32 = arith.constant 0 : i32
    %c0_i32_0 = arith.constant 0 : i32
    %c0_i32_1 = arith.constant 0 : i32
    return %c0_i32, %c0_i32_0 : i32, i32
  }
  func.func @transform_2(%arg0: i32, %arg1: memref<2xi32, #tpu.memory_space<smem>>) -> (i32, i32) {
    %c0_i32 = arith.constant 0 : i32
    %c0_i32_0 = arith.constant 0 : i32
    %c0_i32_1 = arith.constant 0 : i32
    return %c0_i32, %c0_i32_0 : i32, i32
  }
  func.func @transform_3(%arg0: i32, %arg1: memref<2xi32, #tpu.memory_space<smem>>) -> (i32, i32) {
    %c0_i32 = arith.constant 0 : i32
    %c0_i32_0 = arith.constant 0 : i32
    %c0_i32_1 = arith.constant 0 : i32
    return %c0_i32, %c0_i32_0 : i32, i32
  }
  func.func @transform_4(%arg0: i32, %arg1: memref<2xi32, #tpu.memory_space<smem>>) -> (i32, i32) {
    %c0_i32 = arith.constant 0 : i32
    %c0_i32_0 = arith.constant 0 : i32
    %c0_i32_1 = arith.constant 0 : i32
    return %c0_i32, %c0_i32_0 : i32, i32
  }
  func.func @transform_5(%arg0: i32, %arg1: memref<2xi32, #tpu.memory_space<smem>>) -> (i32, i32) {
    %c0_i32 = arith.constant 0 : i32
    %c0_i32_0 = arith.constant 0 : i32
    %c0_i32_1 = arith.constant 0 : i32
    return %c0_i32, %c0_i32_0 : i32, i32
  }
  func.func @transform_6(%arg0: i32, %arg1: memref<2xi32, #tpu.memory_space<smem>>) -> (i32, i32) {
    %c0_i32 = arith.constant 0 : i32
    %c0_i32_0 = arith.constant 0 : i32
    %c0_i32_1 = arith.constant 0 : i32
    return %c0_i32, %c0_i32_0 : i32, i32
  }
  func.func @transform_7(%arg0: i32, %arg1: memref<2xi32, #tpu.memory_space<smem>>) -> (i32, i32) {
    %c0_i32 = arith.constant 0 : i32
    %c0_i32_0 = arith.constant 0 : i32
    %c0_i32_1 = arith.constant 0 : i32
    return %c0_i32, %c0_i32_0 : i32, i32
  }
  func.func @transform_8(%arg0: i32, %arg1: memref<2xi32, #tpu.memory_space<smem>>) -> (i32, i32) {
    %c0_i32 = arith.constant 0 : i32
    %c0_i32_0 = arith.constant 0 : i32
    %c0_i32_1 = arith.constant 0 : i32
    return %c0_i32, %c0_i32_0 : i32, i32
  }
  func.func @transform_9(%arg0: i32, %arg1: memref<2xi32, #tpu.memory_space<smem>>) -> (i32, i32) {
    %c0_i32 = arith.constant 0 : i32
    %c0_i32_0 = arith.constant 0 : i32
    %c0_i32_1 = arith.constant 0 : i32
    return %c0_i32, %c0_i32_0 : i32, i32
  }
  func.func @transform_10(%arg0: i32, %arg1: memref<2xi32, #tpu.memory_space<smem>>) -> (i32, i32) {
    %c0_i32 = arith.constant 0 : i32
    %c0_i32_0 = arith.constant 0 : i32
    %c0_i32_1 = arith.constant 0 : i32
    return %c0_i32, %c0_i32_0 : i32, i32
  }
  func.func @transform_11(%arg0: i32, %arg1: memref<2xi32, #tpu.memory_space<smem>>) -> (i32, i32) {
    %c0_i32 = arith.constant 0 : i32
    %c0_i32_0 = arith.constant 0 : i32
    %c0_i32_1 = arith.constant 0 : i32
    return %c0_i32, %c0_i32_0 : i32, i32
  }
  func.func @transform_12(%arg0: i32, %arg1: memref<2xi32, #tpu.memory_space<smem>>) -> (i32, i32) {
    %c0_i32 = arith.constant 0 : i32
    %c0_i32_0 = arith.constant 0 : i32
    %c0_i32_1 = arith.constant 0 : i32
    return %c0_i32, %c0_i32_0 : i32, i32
  }
  func.func @transform_13(%arg0: i32, %arg1: memref<2xi32, #tpu.memory_space<smem>>) -> (i32, i32, i32) {
    %c0_i32 = arith.constant 0 : i32
    %c0_i32_0 = arith.constant 0 : i32
    %c0_i32_1 = arith.constant 0 : i32
    return %arg0, %c0_i32, %c0_i32_0 : i32, i32, i32
  }
  func.func @transform_14(%arg0: i32, %arg1: memref<2xi32, #tpu.memory_space<smem>>) -> (i32, i32, i32) {
    %c0_i32 = arith.constant 0 : i32
    %c0_i32_0 = arith.constant 0 : i32
    %c0_i32_1 = arith.constant 0 : i32
    return %arg0, %c0_i32, %c0_i32_0 : i32, i32, i32
  }
}

module attributes {stable_mosaic.version = 11 : i64} {
  func.func @_fc_kernel(%arg0: memref<2x32xf32, #tpu.memory_space<vmem>>, %arg1: memref<32x32xbf16, #tpu.memory_space<vmem>>, %arg2: memref<1x32xf32, #tpu.memory_space<vmem>>, %arg3: memref<2x32xf32, #tpu.memory_space<vmem>>) attributes {dimension_semantics = [], scalar_prefetch = 0 : i64, scratch_operands = 0 : i64, tpu.core_type = #tpu.core_type<tc>} {
    %c0 = arith.constant 0 : index
    %c0_0 = arith.constant 0 : index
    %0 = vector.load %arg0[%c0, %c0_0] : memref<2x32xf32, #tpu.memory_space<vmem>>, vector<2x32xf32>
    %1 = arith.truncf %0 : vector<2x32xf32> to vector<2x32xbf16>
    %c0_1 = arith.constant 0 : index
    %c0_2 = arith.constant 0 : index
    %2 = vector.load %arg1[%c0_1, %c0_2] : memref<32x32xbf16, #tpu.memory_space<vmem>>, vector<32x32xbf16>
    %cst = arith.constant dense<0.000000e+00> : vector<2x32xf32>
    %3 = tpu.matmul %1, %2, %cst {dimension_numbers = #tpu.dot_dimension_numbers<[1], [0], [0], [1], [0, 0, 1, 1], [], []>} : vector<2x32xbf16>, vector<32x32xbf16>, vector<2x32xf32> -> vector<2x32xf32>
    %c0_3 = arith.constant 0 : index
    %c0_4 = arith.constant 0 : index
    %4 = vector.load %arg2[%c0_3, %c0_4] : memref<1x32xf32, #tpu.memory_space<vmem>>, vector<1x32xf32>
    %5 = vector.broadcast %4 : vector<1x32xf32> to vector<2x32xf32>
    %6 = arith.addf %3, %5 : vector<2x32xf32>
    %c0_5 = arith.constant 0 : index
    %c0_6 = arith.constant 0 : index
    %7 = vector.load %arg3[%c0_5, %c0_6] : memref<2x32xf32, #tpu.memory_space<vmem>>, vector<2x32xf32>
    tpu.vector_store %arg3[%c0_5, %c0_6], %6 {strides = array<i32>} : memref<2x32xf32, #tpu.memory_space<vmem>>, vector<2x32xf32>,
    return
  }
}

</mosaic_0001>

<bundles_post_ra>
// kernel: tpu_custom_call.1
= control target key start
LH: loop header
LB: loop body
LE: loop exit
PB: predicated region body
PF: predicated region fallthrough
CT: control target
= control target key end

     0   :  { %6 = vsyncpa [#allocation3], 0  ;;  %s441_s0 = inlined_call_operand.hbm [shape: f32[8,128], index: 0, kind: input, shape index: {}]   ;;  %s442_s1 = inlined_call_operand.hbm [shape: f32[16,128], index: 1, kind: output, shape index: {}]  }
   0x1   :  { %7 = vsyncpa [#allocation4], 0 }
   0x2   :  { %9 = vsyncpa [#allocation4 + $0x1], 0  ;;  %s357_s6 = smov 0   ;;  %s359_s7 = smov 0  }
   0x3   :  { %s361_s8 = smov 0   ;;  %s363_s9 = smov 0  }
   0x4 LB: > { %s378_s10 = sadd.s32 4294967295, %s344_s9   ;;  %s188_s11 = sadd.s32 4294967294, %s344_s9   ;;  %s344_s9 = sphi %s363_s9, %s448_s9   ;;  %s340_s8 = sphi %s361_s8, %s447_s8   ;;  %s336_s7 = sphi %s359_s7, %s446_s7   ;;  %s332_s6 = sphi %s357_s6, %s445_s6  }
   0x5   : > { %s382_s12 = sadd.s32 1, %s344_s9   ;;  %s43_s13 = sadd.s32 1, %s340_s8 }
   0x6   : > { %s40_s14 = ssub.s32 %s344_s9, %s382_s12  ;;  %p53_p0 = scmp.ne.s32.totalorder %s340_s8, %s336_s7 }
   0x7   : > { %p41_p1 = scmp.eq.s32.totalorder %s40_s14, 0  ;;  %p54_p2 = scmp.eq.s32.totalorder %s378_s10, 1 }
   0x8   : > { %p59_p3 = scmp.ne.s32.totalorder %s336_s7, %s332_s6  ;;  %p60_p4 = scmp.eq.s32.totalorder %s188_s11, 1 }
   0x9   : > { %s393_s15 = scalar_select %p41_p1, %s340_s8, %s43_s13  }
   0xa   : > { %p395_p5 = por %p54_p2, %p53_p0  ;;  %p399_p6 = por %p60_p4, %p59_p3 }
   0xb   : > { %p189_p7 = scmp.ge.s32.totalorder %s344_s9, 1  ;;  %p67_p8 = scmp.lt.s32.totalorder %s344_s9, 3 }
   0xc   : > { %p212_p9 = scmp.eq.s32.totalorder %s378_s10, 0  ;;  %s79_s20 = sshll.u32 %s441_s0, 4  ;;  %s80_s20 = int_to_ptr.hbm [resolvable:$true] %s79_s20 }
   0xd   : > { %p68_p10 = pnand %p189_p7, %p67_p8  ;;  %s346_s21 = smov [#allocation2]  }
   0xe   : > { %s81_s22 = sshll.u32 %s346_s21, 4  ;;  %s82_s22 = int_to_ptr.vmem [resolvable:$true] %s81_s22 }
   0xf   : > { %p204_p11 = pneg %p68_p10  ;;  %94 = sbr.rel (%p68_p10) target bundleno = 37 (0x25), region = 24 }
  0x11   : > { %p205_p12 = pnand %p212_p9, %p204_p11 }
  0x13   : > { %207 = dma.hbm_to_vmem [thread:$0]  (!%p205_p12), %s80_s20, 128, %s82_s22, [#allocation3]  }
  0x14   : > { %323 = dma.done.wait (%p212_p9), [#allocation3], 128  }
  0x15   : > { %325 = vsyncadd (%p212_p9), [#allocation3], 4294967168  ;;  %s107_s23 = sand.u32 1, %s336_s7   ;;  %s195_s24 = sshll.u32 %s378_s10, 3  ;;  %v110_v0 = vld [vmem:[#allocation2] sm:$0xff] }
  0x16   : > { %s193_s25 = sshll.u32 %s107_s23, 3  ;;  %s124_s28 = scalar_lea.hbm %s442_s1, %s195_s24  ;;  %v111_v1 = vmul.f32 2.0, %v110_v0 }
  0x17   : > { %s109_s29 = scalar_lea.vmem [#allocation5], %s193_s25  ;;  %s128_s2 = sshll.u32 %s124_s28, 4  ;;  %s129_s2 = int_to_ptr.hbm [resolvable:$true] %s128_s2 }
  0x18   : > { %s126_s30 = sshll.u32 %s109_s29, 4  ;;  %112 = vst [vmem:[%s109_s29] sm:$0xff] %v111_v1  ;;  %s114_s3 = scalar_lea.sflag [#allocation4], %s107_s23  ;;  %s127_s30 = int_to_ptr.vmem [resolvable:$true] %s126_s30 }
  0x19   : > { %s292_s4 = sshra.s32 %s129_s2, 4  ;;  %s298_s13 = scalar_lea.hbm %s442_s1, 16  ;;  %s293_s4 = int_to_ptr.hbm [resolvable:$true] %s292_s4 }
  0x1a   : > { %s294_s5 = scalar_lea.hbm %s293_s4, 8  ;;  %p299_p2 = scmp.lt.s32.totalorder %s293_s4, %s442_s1 }
  0x1b   : > { %p295_p13 = scmp.ne.s32.totalorder %s293_s4, %s294_s5  ;;  %p300_p3 = scmp.lt.s32.totalorder %s298_s13, %s294_s5 }
  0x1d   : > { %p296_p0 = pnand %p295_p13, %p395_p5  ;;  %p301_p4 = por %p300_p3, %p299_p2 }
  0x1f   : > { %p297_p1 = pneg %p296_p0 }
  0x21   : > { %p302_p7 = pnand %p301_p4, %p297_p1 }
  0x23   : > { %305 = shalt.err (!%p302_p7)
}
  0x24   : > { %202 = dma.vmem_to_hbm [thread:$0]  (%p395_p5), %s127_s30, 128, %s129_s2, %s114_s3  }
  0x25 PF: > { %p214_p8 = scmp.ge.s32.totalorder %s344_s9, 2  ;;  %s140_s19 = sand.u32 1, %s332_s6  }
  0x26   : > { %s141_s20 = scalar_lea.sflag [#allocation4], %s140_s19 }
  0x27   : > { %p209_p9 = pnand %p214_p8, %p399_p6 }
  0x29   : > { %p210_p10 = pneg %p209_p9 }
  0x2b   : > { %327 = dma.done.wait (%p210_p10), %s141_s20, 128  }
  0x2c   : > { %329 = vsyncadd (%p210_p10), %s141_s20, 4294967168  ;;  %p12_p11 = scmp.ge.s32.totalorder %s382_s12, 4   ;;  %s445_s6 = smov %s336_s7 }
  0x2d   : > { %s446_s7 = smov %s340_s8  ;;  %s447_s8 = smov %s393_s15 }
  0x2e   : > { %s448_s9 = smov %s382_s12  ;;  %14 = sbr.rel (!%p12_p11) target bundleno = 4 (0x4), region = 61 }
  0x33   :  { %147 = vsyncpa [#allocation3], 1 }
  0x34   :  { %149 = vsyncpa [#allocation3 + $0x1], 1 }
  0x35   :  { %150 = vsyncpa [#allocation4], 1 }
  0x36   :  { %152 = vsyncpa [#allocation4 + $0x1], 1 }

// kernel: motion_encoder_forward.4
= control target key start
LH: loop header
LB: loop body
LE: loop exit
PB: predicated region body
PF: predicated region fallthrough
CT: control target
= control target key end

     0   :  { %9 = vsyncpa [#allocation3], 0  ;;  %s208_s0 = inlined_call_operand.vmem [shape: f32[2,8,16], index: 0, kind: input, shape index: {}]   ;;  %s209_s1 = inlined_call_operand.hbm [shape: bf16[16,32], index: 1, kind: input, shape index: {}]   ;;  %s210_s2 = inlined_call_operand.hbm [shape: f32[1,32], index: 2, kind: input, shape index: {}]   ;;  %s211_s3 = inlined_call_operand.vmem [shape: f32[8,32], index: 3, kind: input, shape index: {}]   ;;  %s212_s4 = inlined_call_operand.vmem [shape: bf16[2,8,32], index: 4, kind: output, shape index: {}]  }
   0x1   :  { %s17_s17 = sshll.u32 %s209_s1, 4  ;;  %s18_s17 = int_to_ptr.hbm [resolvable:$true] %s17_s17 }
   0x2   :  { %10 = vsyncpa [#allocation5], 0  ;;  %s158_s18 = smov [#allocation2]   ;;  %s31_s22 = sshll.u32 %s210_s2, 4  ;;  %s32_s22 = int_to_ptr.hbm [resolvable:$true] %s31_s22 }
   0x3   :  { %s19_s19 = sshll.u32 %s158_s18, 4  ;;  %s159_s23 = smov 64   ;;  %s20_s19 = int_to_ptr.vmem [resolvable:$true] %s19_s19 }
   0x4   :  { %s160_s24 = smov 4   ;;  %s161_s25 = smov [#allocation4]  }
   0x5   :  { %25 = dma.hbm_to_vmem [thread:$0]  %s18_s17, 128, %s20_s19, [#allocation3], %s159_s23, %s159_s23, %s160_s24  }
   0x6   :  { %s33_s26 = sshll.u32 %s161_s25, 4  ;;  %s34_s26 = int_to_ptr.vmem [resolvable:$true] %s33_s26 }
   0x7   :  { %36 = dma.hbm_to_vmem [thread:$0]  %s32_s22, 16, %s34_s26, [#allocation5]  }
   0x8   :  { %154 = dma.done.wait [#allocation3], 128  }
   0x9   :  { %155 = vsyncadd [#allocation3], 4294967168 }
   0xa   :  { %156 = dma.done.wait [#allocation5], 16  }
   0xb   :  { %157 = vsyncadd [#allocation5], 4294967280  ;;  %v100_v0 = vld [vmem:[#allocation2] sm:$0xff]  ;;  %v49_v2 = vld [vmem:[%s208_s0 + $0x8] sm:$0xff]  ;;  %vm63_vm0 = vcmask 130048   ;;  %vm86_vm1 = vcmask 257024  }
   0xc   :  { %v48_v1 = vld [vmem:[%s208_s0] sm:$0xff]  ;;  %74 = vmatpush.bf16.msra.mxu0 %v100_v0  ;;  %v105_v4 = vld [vmem:[#allocation4] ss:$0 sm:$0xff] }
   0xd   :  { %v50_v3 = vpack.c.bf16 %v49_v2, %v48_v1  ;;  %v81_v6 = vld [vmem:[%s211_s3] sm:$0xff] }
   0xf   :  { %99 = vmatmul.msk.bf16.vlgmr.msra.gmra.mxu0 %vm63_vm0, %v50_v3 }
  0x8c   :  { %v76_v5 = vpop.f32.mrf.mxu0 }
  0x8d   :  { %v77_v7 = vadd.f32 %v105_v4, %v76_v5 }
  0x8f   :  { %v82_v8 = vadd.f32 %v81_v6, %v77_v7 }
  0x91   :  { %v84_v9 = vpack.c.bf16 %v82_v8, %v82_v8 }
  0x93   :  { %87 = vst.msk [vmem:[%s212_s4] sm:$0xf] %vm86_vm1, %v84_v9 }
  0x94   :  { %v78_v10 = vpop.f32.mrf.mxu0 }
  0x95   :  { %v79_v11 = vadd.f32 %v105_v4, %v78_v10 }
  0x97   :  { %v83_v12 = vadd.f32 %v81_v6, %v79_v11 }
  0x99   :  { %v85_v13 = vpack.c.bf16 %v83_v12, %v83_v12 }
  0x9b   :  { %88 = vst.msk [vmem:[%s212_s4 + $0x4] sm:$0xf] %vm86_vm1, %v85_v13 }
  0x9c   :  { %93 = vsyncpa [#allocation3], 1 }
  0x9d   :  { %94 = vsyncpa [#allocation5], 1 }

// kernel: motion_encoder_forward.7
= control target key start
LH: loop header
LB: loop body
LE: loop exit
PB: predicated region body
PF: predicated region fallthrough
CT: control target
= control target key end

     0   :  { %8 = vsyncpa [#allocation3], 0  ;;  %s194_s0 = inlined_call_operand.vmem [shape: f32[2,32], index: 0, kind: input, shape index: {}]   ;;  %s195_s1 = inlined_call_operand.hbm [shape: bf16[32,32], index: 1, kind: input, shape index: {}]   ;;  %s196_s2 = inlined_call_operand.vmem [shape: f32[1,32], index: 2, kind: input, shape index: {}]   ;;  %s197_s3 = inlined_call_operand.hbm [shape: f32[2,32], index: 3, kind: output, shape index: {}]  }
   0x1   :  { %9 = vsyncpa [#allocation4], 0  ;;  %s16_s14 = sshll.u32 %s195_s1, 4  ;;  %s158_s15 = smov [#allocation2]   ;;  %s17_s14 = int_to_ptr.hbm [resolvable:$true] %s16_s14 }
   0x2   :  { %s18_s16 = sshll.u32 %s158_s15, 4  ;;  %s159_s17 = smov 64   ;;  %s19_s16 = int_to_ptr.vmem [resolvable:$true] %s18_s16 }
   0x3   :  { %s160_s18 = smov 4  }
   0x4   :  { %24 = dma.hbm_to_vmem [thread:$0]  %s17_s14, 256, %s19_s16, [#allocation3], %s159_s17, %s159_s17, %s160_s18  }
   0x5   :  { %154 = dma.done.wait [#allocation3], 256  }
   0x6   :  { %155 = vsyncadd [#allocation3], 4294967040  ;;  %v100_v0 = vld [vmem:[#allocation2 + $0x8] sm:$0xff]  ;;  %v99_v1 = vld [vmem:[#allocation2] sm:$0xff]  ;;  %vm54_vm0 = vcmask 261120   ;;  %s161_s22 = smov [#allocation5]  }
   0x7   :  { %64 = vmatpush.bf16.msra.mxu0 %v100_v0  ;;  %v32_v2 = vld [vmem:[%s194_s0] sm:$0x3]  ;;  %s78_s23 = sshll.u32 %s161_s22, 4  ;;  %s80_s26 = sshll.u32 %s197_s3, 4  ;;  %vm71_vm1 = vcmask 254976   ;;  %s79_s23 = int_to_ptr.vmem [resolvable:$true] %s78_s23  ;;  %s81_s26 = int_to_ptr.hbm [resolvable:$true] %s80_s26 }
   0x8   :  { %v33_v3 = vpack.c.bf16 %v32_v2, %v32_v2  ;;  %v105_v4 = vld [vmem:[%s196_s2] ss:$0 sm:$0xff] }
   0xb   :  { %65 = vmatpush.bf16.msra.mxu0 %v99_v1 }
   0xe   :  { %98 = vmatmul.msk.bf16.vlgmr.msra.gmra.mxu0 %vm54_vm0, %v33_v3 }
  0x8b   :  { %v67_v5 = vpop.f32.mrf.mxu0 }
  0x8c   :  { %v68_v6 = vadd.f32 %v105_v4, %v67_v5 }
  0x8e   :  { %72 = vst.msk [vmem:[#allocation5] sm:$0x3] %vm71_vm1, %v68_v6 }
  0x8f   :  { %83 = dma.vmem_to_hbm [thread:$0]  %s79_s23, 32, %s81_s26, [#allocation4]  }
  0x93   :  { %v69_v7 = vpop.f32.mrf.mxu0 }
  0x94   :  { %156 = dma.done.wait [#allocation4], 32  }
  0x95   :  { %157 = vsyncadd [#allocation4], 4294967264 }
  0x96   :  { %88 = vsyncpa [#allocation3], 1 }
  0x97   :  { %89 = vsyncpa [#allocation4], 1 }

// kernel: motion_encoder_forward.6
= control target key start
LH: loop header
LB: loop body
LE: loop exit
PB: predicated region body
PF: predicated region fallthrough
CT: control target
= control target key end

     0   :  { %s1219_s21 = smov [#allocation3]   ;;  %s1547_s0 = inlined_call_operand.vmem [shape: s32[2], index: 0, kind: input, shape index: {}]   ;;  %s1548_s1 = inlined_call_operand.vmem [shape: bf16[2,8,32], index: 1, kind: input, shape index: {}]   ;;  %s1549_s2 = inlined_call_operand.vmem [shape: bf16[32,96], index: 2, kind: input, shape index: {}]   ;;  %s1550_s3 = inlined_call_operand.vmem [shape: f32[1,96], index: 3, kind: input, shape index: {}]   ;;  %s1551_s4 = inlined_call_operand.vmem [shape: bf16[32,32], index: 4, kind: input, shape index: {}]   ;;  %s1552_s5 = inlined_call_operand.vmem [shape: f32[1,32], index: 5, kind: input, shape index: {}]   ;;  %s1553_s6 = inlined_call_operand.vmem [shape: f32[1,32], index: 6, kind: input, shape index: {}]   ;;  %s1554_s7 = inlined_call_operand.vmem [shape: f32[1,32], index: 7, kind: input, shape index: {}]   ;;  %s1555_s8 = inlined_call_operand.vmem [shape: bf16[32,64], index: 8, kind: input, shape index: {}]   ;;  %s1556_s9 = inlined_call_operand.vmem [shape: f32[1,64], index: 9, kind: input, shape index: {}]   ;;  %s1557_s10 = inlined_call_operand.vmem [shape: bf16[64,32], index: 10, kind: input, shape index: {}]   ;;  %s1558_s11 = inlined_call_operand.vmem [shape: f32[1,32], index: 11, kind: input, shape index: {}]   ;;  %s1559_s12 = inlined_call_operand.vmem [shape: f32[1,32], index: 12, kind: input, shape index: {}]   ;;  %s1560_s13 = inlined_call_operand.vmem [shape: f32[1,32], index: 13, kind: input, shape index: {}]   ;;  %s1561_s14 = inlined_call_operand.hbm [shape: bf16[2,8,32], index: 14, kind: output, shape index: {0}]   ;;  %s1562_s15 = inlined_call_operand.vmem [shape: f32[2,1,32], index: 15, kind: output, shape index: {1}]  }
   0x1   :  { %s22_s20 = sshll.u32 %s1547_s0, 4  ;;  %s23_s20 = int_to_ptr.vmem [resolvable:$true] %s22_s20 }
   0x2   :  { %25 = dma.vmem_to_smem %s23_s20, 16, %s1219_s21, [#allocation2] }
   0x3   :  { %1215 = dma.done.wait [#allocation2], 16 }
   0x4   :  { %1216 = vsyncadd [#allocation2], 4294967280 }
   0x5   :  { %28 = sfence }
   0x6   :  { %v1072_v0 = vld [vmem:[%s1549_s2 + $0x8] sm:$0xff]  ;;  %v1071_v1 = vld [vmem:[%s1549_s2] sm:$0xff] }
   0x7   :  { %97 = vmatpush.bf16.msra.mxu0 %v1072_v0 }
   0x8   :  { %29 = vsyncpa [#allocation5], 0  ;;  %v1070_v2 = vld [vmem:[%s1548_s1] sm:$0xff]  ;;  %vm87_vm0 = vcmask 261120   ;;  %s1220_s2 = smov 120   ;;  %s1221_s29 = smov 88   ;;  %v110_v36 = vlaneseq }
   0x9   :  { %v1125_v3 = vld [vmem:[%s1550_s3] ss:$0 sm:$0xff]  ;;  %s1222_s30 = smov 96   ;;  %s1223_s3 = smov 112   ;;  %vm131_vm1 = vcmask 64512   ;;  %vm210_vm4 = vcmask 1043456  }
   0xa   :  { %s1224_s16 = smov 80   ;;  %s1225_s17 = smov 72   ;;  %v111_v37 = vand.u32 127, %v110_v36  ;;  %v1227_v39 = vmov -1e+30   ;;  %vm622_vm5 = vcmask 130048  }
   0xb   :  { %98 = vmatpush.bf16.msra.mxu0 %v1071_v1  ;;  %s1226_s18 = smov 104   ;;  %s1370_s19 = sld [smem:[#allocation3]]  ;;  %vm625_vm6 = vcmask 195584   ;;  %vm808_vm14 = vcmask 523264   ;;  %vm889_vm15 = vcmask 7168  }
   0xc   :  { %s1376_s20 = sld [smem:[#allocation3 + $0x1]]  ;;  %s1228_s21 = smov 64  }
   0xd   :  { %s1229_s22 = smov 56   ;;  %s1230_s23 = smov 48  }
   0xe   :  { %1015 = vmatmul.msk.bf16.vlgmr.msra.gmra.mxu0 %vm87_vm0, %v1070_v2  ;;  %s1231_s24 = smov 40   ;;  %s1232_s25 = smov 8  }
   0xf   :  { %s1233_s26 = smov 16   ;;  %s1234_s27 = smov 24  }
  0x11   :  { %v114_v38 = vstv %s1370_s19 }
  0x12   :  { %vm115_vm2 = vcmp.lt.s32.totalorder %v111_v37, %v114_v38  ;;  %v117_v49 = vstv %s1376_s20 }
  0x13   :  { %v116_v40 = vsel %vm115_vm2, 0.0, %v1227_v39  ;;  %vm118_vm3 = vcmp.lt.s32.totalorder %v111_v37, %v117_v49 }
  0x14   :  { %v177_v41 = vperm.slane %v116_v40, 0  ;;  %v119_v53 = vsel %vm118_vm3, 0.0, %v1227_v39 }
  0x15   :  { %v178_v54 = vperm.slane %v119_v53, 0 }
  0x8b   :  { %v100_v4 = vpop.f32.mrf.mxu0 }
  0x8c   :  { %v101_v5 = vadd.f32 %v1125_v3, %v100_v4 }
  0x8e   :  { %v105_v6 = vpack.c.bf16 %v101_v5, %v101_v5 }
  0x90   :  { %v127_v7 = vunpack.c.l.b16 %v105_v6 }
  0x92   :  { %v1336_v8 = vpack.c.b16 %v127_v7, %v127_v7 }
  0x93   :  { %v102_v9 = vpop.f32.mrf.mxu0 }
  0x94   :  { %v103_v10 = vadd.f32 %v1125_v3, %v102_v9  ;;  %248 = vrot.lane.b32.xlu2 %v1336_v8, %s1220_s2  ;;  %250 = vrot.lane.b32.xlu1 %v1336_v8, %s1221_s29 }
  0x95   :  { %129 = vrot.lane.b32.xlu0 %v1336_v8, %s1222_s30 }
  0x96   :  { %v106_v11 = vpack.c.bf16 %v103_v10, %v103_v10 }
  0x98   :  { %v152_v12 = vunpack.c.l.b16 %v106_v11 }
  0x9a   :  { %v1341_v13 = vpack.c.b16 %v152_v12, %v152_v12 }
  0x9c   :  { %271 = vrot.lane.b32.xlu2 %v1341_v13, %s1220_s2  ;;  %273 = vrot.lane.b32.xlu1 %v1341_v13, %s1221_s29 }
  0x9d   :  { %154 = vrot.lane.b32.xlu0 %v1341_v13, %s1222_s30 }
  0xa4   :  { %364 = vrot.lane.b32.xlu2 %v1336_v8, %s1223_s3  ;;  %389 = vrot.lane.b32.xlu1 %v1341_v13, %s1224_s16 }
  0xa5   :  { %366 = vrot.lane.b32.xlu0 %v1336_v8, %s1224_s16 }
  0xac   :  { %505 = vrot.lane.b32.xlu2 %v1341_v13, %s1225_s17  ;;  %482 = vrot.lane.b32.xlu1 %v1336_v8, %s1225_s17 }
  0xad   :  { %387 = vrot.lane.b32.xlu0 %v1341_v13, %s1223_s3 }
  0xb4   :  { %503 = vrot.lane.b32.xlu1 %v1341_v13, %s1226_s18 }
  0xb5   :  { %480 = vrot.lane.b32.xlu0 %v1336_v8, %s1226_s18 }
  0xee   :  { %v249_v14 = vpop.permute.xlu2 %248 }
  0xf6   :  { %v272_v19 = vpop.permute.xlu2 %271 }
  0xfe   :  { %v365_v24 = vpop.permute.xlu2 %364 }
 0x106   :  { %v251_v15 = vpop.permute.xlu1 %250  ;;  %v506_v29 = vpop.permute.xlu2 %505 }
 0x107   :  { %v130_v16 = vpop.permute.xlu0 %129  ;;  %v256_v17 = vsel %vm131_vm1, %v251_v15, 0  ;;  %v511_v32 = vsel %vm131_vm1, %v506_v29, 0 }
 0x108   :  { %v136_v18 = vsel %vm131_vm1, %v130_v16, 0  ;;  %265 = vmatpush.bf16.xpose.msrb.mxu0 %v256_v17 }
 0x109   :  { %145 = vmatpush.bf16.xpose.msra.mxu1 %v136_v18 }
 0x10e   :  { %v274_v20 = vpop.permute.xlu1 %273 }
 0x10f   :  { %v155_v21 = vpop.permute.xlu0 %154  ;;  %1023 = vmatmul.msk.bf16.vlgmr.msrb.gmra.mxu0 %vm131_vm1, %v249_v14  ;;  %v279_v22 = vsel %vm131_vm1, %v274_v20, 0 }
 0x110   :  { %1019 = vmatmul.msk.bf16.vlgmr.msra.gmra.mxu1 %vm131_vm1, %v105_v6  ;;  %v160_v23 = vsel %vm131_vm1, %v155_v21, 0 }
 0x111   :  { %169 = vmatpush.bf16.xpose.msra.mxu2 %v160_v23  ;;  %288 = vmatpush.bf16.xpose.msrb.mxu1 %v279_v22 }
 0x116   :  { %v390_v25 = vpop.permute.xlu1 %389 }
 0x117   :  { %v395_v26 = vsel %vm131_vm1, %v390_v25, 0  ;;  %v367_v27 = vpop.permute.xlu0 %366 }
 0x118   :  { %v372_v28 = vsel %vm131_vm1, %v367_v27, 0  ;;  %1020 = vmatmul.msk.bf16.vlgmr.msra.gmra.mxu2 %vm131_vm1, %v106_v11 }
 0x119   :  { %404 = vmatpush.bf16.xpose.msra.mxu1 %v395_v26  ;;  %381 = vmatpush.bf16.xpose.msra.mxu0 %v372_v28 }
 0x11e   :  { %v483_v30 = vpop.permute.xlu1 %482 }
 0x11f   :  { %v488_v31 = vsel %vm131_vm1, %v483_v30, 0  ;;  %v388_v33 = vpop.permute.xlu0 %387 }
 0x120   :  { %1024 = vmatmul.msk.bf16.vlgmr.msrb.gmra.mxu1 %vm131_vm1, %v272_v19  ;;  %1027 = vmatmul.msk.bf16.vlgmr.msra.gmra.mxu0 %vm131_vm1, %v365_v24 }
 0x121   :  { %520 = vmatpush.bf16.xpose.msrb.mxu1 %v511_v32  ;;  %497 = vmatpush.bf16.xpose.msrb.mxu0 %v488_v31 }
 0x126   :  { %v504_v35 = vpop.permute.xlu1 %503 }
 0x127   :  { %v481_v34 = vpop.permute.xlu0 %480 }
 0x130   :  { %1028 = vmatmul.msk.bf16.vlgmr.msra.gmra.mxu1 %vm131_vm1, %v388_v33  ;;  %1031 = vmatmul.msk.bf16.vlgmr.msrb.gmra.mxu0 %vm131_vm1, %v481_v34 }
 0x140   :  { %1032 = vmatmul.msk.bf16.vlgmr.msrb.gmra.mxu1 %vm131_vm1, %v504_v35 }
 0x18c   :  { %v267_v42 = vpop.f32.mrf.mxu0 }
 0x18d   :  { %v147_v43 = vpop.f32.mrf.mxu1  ;;  %v294_v44 = vmul.f32 0.35355338, %v267_v42 }
 0x18e   :  { %v175_v45 = vmul.f32 0.35355338, %v147_v43 }
 0x18f   :  { %v296_v46 = vadd.f32 %v294_v44, %v177_v41 }
 0x190   :  { %v179_v47 = vadd.f32 %v177_v41, %v175_v45 }
 0x191   :  { %v298_v48 = vsel %vm131_vm1, %v296_v46, -inf }
 0x192   :  { %299 = vmax.xlane.f32.xlu1 %v298_v48  ;;  %v181_v50 = vsel %vm131_vm1, %v179_v47, -inf }
 0x193   :  { %182 = vmax.xlane.f32.xlu2 %v181_v50 }
 0x194   :  { %v269_v51 = vpop.f32.mrf.mxu0 }
 0x195   :  { %v149_v52 = vpop.f32.mrf.mxu1 }
 0x19b   :  { %v171_v55 = vpop.f32.mrf.mxu2 }
 0x19c   :  { %v176_v56 = vmul.f32 0.35355338, %v171_v55 }
 0x19d   :  { %v290_v57 = vpop.f32.mrf.mxu1  ;;  %v383_v58 = vpop.f32.mrf.mxu0 }
 0x19e   :  { %v295_v59 = vmul.f32 0.35355338, %v290_v57  ;;  %v410_v60 = vmul.f32 0.35355338, %v383_v58  ;;  %v180_v61 = vadd.f32 %v178_v54, %v176_v56 }
 0x1a0   :  { %v184_v62 = vsel %vm131_vm1, %v180_v61, -inf  ;;  %v297_v63 = vadd.f32 %v295_v59, %v178_v54  ;;  %v1384_v0 = vadd.f32 %v410_v60, %v177_v41 }
 0x1a1   :  { %185 = vmax.xlane.f32.xlu0 %v184_v62 }
 0x1a2   :  { %v301_v1 = vsel %vm131_vm1, %v297_v63, -inf  ;;  %v414_v21 = vsel %vm131_vm1, %v1384_v0, -inf }
 0x1a3   :  { %302 = vmax.xlane.f32.xlu2 %v301_v1  ;;  %v173_v2 = vpop.f32.mrf.mxu2 }
 0x1a5   :  { %v292_v3 = vpop.f32.mrf.mxu1  ;;  %v385_v4 = vpop.f32.mrf.mxu0 }
 0x1ab   :  { %227 = vrot.lane.b32.xlu1 %v1341_v13, %s1228_s21 }
 0x1ad   :  { %v406_v5 = vpop.f32.mrf.mxu1  ;;  %v499_v6 = vpop.f32.mrf.mxu0 }
 0x1ae   :  { %v411_v14 = vmul.f32 0.35355338, %v406_v5  ;;  %v526_v18 = vmul.f32 0.35355338, %v499_v6 }
 0x1b0   :  { %v413_v16 = vadd.f32 %v411_v14, %v178_v54  ;;  %v528_v20 = vadd.f32 %v526_v18, %v177_v41 }
 0x1b2   :  { %v417_v19 = vsel %vm131_vm1, %v413_v16, -inf  ;;  %v530_v22 = vsel %vm131_vm1, %v528_v20, -inf }
 0x1b3   :  { %343 = vrot.lane.b32.xlu1 %v1341_v13, %s1229_s22 }
 0x1b5   :  { %322 = vrot.lane.b32.xlu0 %v1336_v8, %s1229_s22  ;;  %v408_v7 = vpop.f32.mrf.mxu1  ;;  %v501_v9 = vpop.f32.mrf.mxu0 }
 0x1bb   :  { %205 = vrot.lane.b32.xlu2 %v1336_v8, %s1228_s21 }
 0x1bd   :  { %v522_v10 = vpop.f32.mrf.mxu1 }
 0x1be   :  { %v527_v12 = vmul.f32 0.35355338, %v522_v10 }
 0x1c0   :  { %v529_v15 = vadd.f32 %v527_v12, %v178_v54 }
 0x1c2   :  { %v533_v17 = vsel %vm131_vm1, %v529_v15, -inf }
 0x1c5   :  { %v524_v11 = vpop.f32.mrf.mxu1 }
 0x1dd   :  { %534 = vmax.xlane.f32.xlu1 %v533_v17 }
 0x1df   :  { %418 = vmax.xlane.f32.xlu0 %v417_v19 }
 0x1e4   :  { %415 = vmax.xlane.f32.xlu2 %v414_v21 }
 0x1e7   :  { %531 = vmax.xlane.f32.xlu0 %v530_v22 }
 0x205   :  { %v300_v23 = vpop.xlane.xlu1 %299 }
 0x206   :  { %v304_v24 = vsub.f32 %v296_v46, %v300_v23  ;;  %v183_v25 = vpop.xlane.xlu2 %182 }
 0x207   :  { %v187_v26 = vsub.f32 %v179_v47, %v183_v25 }
 0x208   :  { %v306_v27 = vmul.f32 1.442695, %v304_v24 }
 0x209   :  { %v189_v28 = vmul.f32 1.442695, %v187_v26 }
 0x20a   :  { %1133 = vpow2.f32 %v306_v27 }
 0x20b   :  { %1135 = vpow2.f32 %v189_v28 }
 0x210   :  { %v1398_v29 = vpop.eup %1133 }
 0x211   :  { %v1400_v30 = vpop.eup %1135  ;;  %v310_v31 = vsel %vm131_vm1, %v1398_v29, 0.0 }
 0x212   :  { %v193_v32 = vsel %vm131_vm1, %v1400_v30, 0.0  ;;  %311 = vadd.xlane.f32.xlu0 %v310_v31 }
 0x213   :  { %194 = vadd.xlane.f32.xlu1 %v193_v32 }
 0x214   :  { %v186_v33 = vpop.xlane.xlu0 %185 }
 0x215   :  { %v188_v34 = vsub.f32 %v180_v61, %v186_v33 }
 0x216   :  { %v303_v35 = vpop.xlane.xlu2 %302 }
 0x217   :  { %v191_v37 = vmul.f32 1.442695, %v188_v34  ;;  %v305_v39 = vsub.f32 %v297_v63, %v303_v35 }
 0x219   :  { %1137 = vpow2.f32 %v191_v37  ;;  %v308_v40 = vmul.f32 1.442695, %v305_v39 }
 0x21b   :  { %1139 = vpow2.f32 %v308_v40 }
 0x21d   :  { %v228_v41 = vpop.permute.xlu1 %227 }
 0x21e   :  { %v206_v42 = vpop.permute.xlu2 %205  ;;  %v233_v43 = vsel %vm210_vm4, %v228_v41, 0 }
 0x21f   :  { %v1407_v44 = vpop.eup %1137  ;;  %v212_v45 = vsel %vm210_vm4, %v206_v42, 0 }
 0x220   :  { %221 = vmatpush.bf16.msra.mxu3 %v212_v45  ;;  %v196_v46 = vsel %vm131_vm1, %v1407_v44, 0.0 }
 0x221   :  { %v1412_v47 = vpop.eup %1139  ;;  %197 = vadd.xlane.f32.xlu0 %v196_v46 }
 0x222   :  { %v313_v48 = vsel %vm131_vm1, %v1412_v47, 0.0 }
 0x223   :  { %314 = vadd.xlane.f32.xlu2 %v313_v48 }
 0x224   :  { %242 = vmatpush.bf16.msrb.mxu3 %v233_v43 }
 0x225   :  { %v344_v52 = vpop.permute.xlu1 %343 }
 0x226   :  { %v349_v19 = vsel %vm210_vm4, %v344_v52, 0 }
 0x227   :  { %v323_v50 = vpop.permute.xlu0 %322 }
 0x228   :  { %v328_v51 = vsel %vm210_vm4, %v323_v50, 0 }
 0x229   :  { %337 = vmatpush.bf16.msrb.mxu2 %v328_v51 }
 0x22c   :  { %459 = vrot.lane.b32.xlu1 %v1341_v13, %s1230_s23 }
 0x23b   :  { %438 = vrot.lane.b32.xlu2 %v1336_v8, %s1230_s23 }
 0x250   :  { %v535_v53 = vpop.xlane.xlu1 %534 }
 0x251   :  { %v537_v54 = vsub.f32 %v529_v15, %v535_v53 }
 0x252   :  { %v419_v55 = vpop.xlane.xlu0 %418 }
 0x253   :  { %v421_v56 = vsub.f32 %v413_v16, %v419_v55  ;;  %v540_v58 = vmul.f32 1.442695, %v537_v54 }
 0x255   :  { %v424_v57 = vmul.f32 1.442695, %v421_v56 }
 0x257   :  { %1141 = vpow2.f32 %v424_v57  ;;  %v416_v59 = vpop.xlane.xlu2 %415 }
 0x258   :  { %v420_v60 = vsub.f32 %v1384_v0, %v416_v59  ;;  %1143 = vpow2.f32 %v540_v58 }
 0x25a   :  { %v422_v61 = vmul.f32 1.442695, %v420_v60  ;;  %v532_v62 = vpop.xlane.xlu0 %531 }
 0x25b   :  { %v536_v63 = vsub.f32 %v528_v20, %v532_v62 }
 0x25c   :  { %1145 = vpow2.f32 %v422_v61 }
 0x25d   :  { %v1142_v1 = vpop.eup %1141  ;;  %v538_v2 = vmul.f32 1.442695, %v536_v63 }
 0x25e   :  { %v429_v3 = vsel %vm131_vm1, %v1142_v1, 0.0  ;;  %v1421_v4 = vpop.eup %1143 }
 0x25f   :  { %1147 = vpow2.f32 %v538_v2  ;;  %430 = vadd.xlane.f32.xlu0 %v429_v3  ;;  %v545_v7 = vsel %vm131_vm1, %v1421_v4, 0.0 }
 0x262   :  { %v1146_v5 = vpop.eup %1145 }
 0x263   :  { %v426_v6 = vsel %vm131_vm1, %v1146_v5, 0.0 }
 0x264   :  { %427 = vadd.xlane.f32.xlu1 %v426_v6  ;;  %546 = vadd.xlane.f32.xlu2 %v545_v7 }
 0x265   :  { %v1148_v0 = vpop.eup %1147 }
 0x266   :  { %v542_v9 = vsel %vm131_vm1, %v1148_v0, 0.0 }
 0x267   :  { %543 = vadd.xlane.f32.xlu0 %v542_v9  ;;  %v1074_v9 = vld [vmem:[%s1551_s4 + $0x8] sm:$0xff] }
 0x268   :  { %658 = vmatpush.bf16.msra.mxu0 %v1074_v9 }
 0x27b   :  { %554 = vrot.lane.b32.xlu0 %v1336_v8, %s1231_s24 }
 0x27d   :  { %575 = vrot.lane.b32.xlu1 %v1341_v13, %s1231_s24 }
 0x285   :  { %v312_v10 = vpop.xlane.xlu0 %311 }
 0x286   :  { %v195_v11 = vpop.xlane.xlu1 %194  ;;  %1149 = vrcp.f32 %v312_v10  ;;  %v1073_v10 = vld [vmem:[%s1551_s4] sm:$0xff] }
 0x287   :  { %1151 = vrcp.f32 %v195_v11  ;;  %659 = vmatpush.bf16.msra.mxu0 %v1073_v10 }
 0x28c   :  { %v1150_v12 = vpop.eup %1149 }
 0x28d   :  { %v1152_v14 = vpop.eup %1151  ;;  %v318_v15 = vmul.f32 %v1150_v12, %v1398_v29 }
 0x28e   :  { %v201_v16 = vmul.f32 %v1152_v14, %v1400_v30 }
 0x28f   :  { %v320_v17 = vpack.c.bf16 %v318_v15, %v318_v15 }
 0x290   :  { %v203_v18 = vpack.c.bf16 %v201_v16, %v201_v16 }
 0x291   :  { %1025 = vmatmul.msk.bf16.vlgmr.msrb.gmra.mxu2 %vm131_vm1, %v320_v17 }
 0x292   :  { %1021 = vmatmul.msk.bf16.vlgmr.msra.gmra.mxu3 %vm131_vm1, %v203_v18 }
 0x293   :  { %358 = vmatpush.bf16.msra.mxu3 %v349_v19 }
 0x294   :  { %v198_v8 = vpop.xlane.xlu0 %197 }
 0x295   :  { %1153 = vrcp.f32 %v198_v8 }
 0x296   :  { %v315_v13 = vpop.xlane.xlu2 %314 }
 0x297   :  { %1155 = vrcp.f32 %v315_v13 }
 0x29b   :  { %v1154_v20 = vpop.eup %1153 }
 0x29c   :  { %v202_v21 = vmul.f32 %v1154_v20, %v1407_v44 }
 0x29d   :  { %v1156_v27 = vpop.eup %1155 }
 0x29e   :  { %v439_v22 = vpop.permute.xlu2 %438  ;;  %v460_v24 = vpop.permute.xlu1 %459  ;;  %v204_v25 = vpack.c.bf16 %v202_v21, %v202_v21  ;;  %v319_v28 = vmul.f32 %v1156_v27, %v1412_v47  ;;  %v1126_v27 = vld [vmem:[%s1552_s5] ss:$0 sm:$0xff]  ;;  %s1239_s5 = smov 4  }
 0x29f   :  { %v444_v23 = vsel %vm210_vm4, %v439_v22, 0  ;;  %v465_v26 = vsel %vm210_vm4, %v460_v24, 0 }
 0x2a0   :  { %453 = vmatpush.bf16.msra.mxu2 %v444_v23  ;;  %v321_v29 = vpack.c.bf16 %v319_v28, %v319_v28 }
 0x2a2   :  { %1022 = vmatmul.msk.bf16.vlgmr.msrb.gmra.mxu3 %vm131_vm1, %v204_v25 }
 0x2a3   :  { %474 = vmatpush.bf16.msrb.mxu3 %v465_v26  ;;  %v58_v26 = vld [vmem:[%s1548_s1] sm:$0xff]   ;;  %s987_s1 = sshll.u32 %s1561_s14, 4  ;;  %s988_s1 = int_to_ptr.hbm [resolvable:$true] %s987_s1 }
 0x2a4   :  { %v60_v28 = vunpack.c.l.bf16 %v58_v26 }
 0x2b2   :  { %1026 = vmatmul.msk.bf16.vlgmr.msra.gmra.mxu3 %vm131_vm1, %v321_v29 }
 0x2d2   :  { %v431_v30 = vpop.xlane.xlu0 %430 }
 0x2d3   :  { %1157 = vrcp.f32 %v431_v30 }
 0x2d7   :  { %v428_v31 = vpop.xlane.xlu1 %427  ;;  %v547_v39 = vpop.xlane.xlu2 %546 }
 0x2d8   :  { %1159 = vrcp.f32 %v428_v31 }
 0x2d9   :  { %v1158_v32 = vpop.eup %1157  ;;  %1161 = vrcp.f32 %v547_v39 }
 0x2da   :  { %v435_v33 = vmul.f32 %v1158_v32, %v1142_v1  ;;  %v544_v41 = vpop.xlane.xlu0 %543 }
 0x2db   :  { %1163 = vrcp.f32 %v544_v41 }
 0x2dc   :  { %v437_v34 = vpack.c.bf16 %v435_v33, %v435_v33  ;;  %v61_v33 = vunpack.c.h.bf16 %v58_v26  ;;  %v1079_v26 = vld [vmem:[%s1557_s10 + $0x10] sm:$0xff] }
 0x2de   :  { %1030 = vmatmul.msk.bf16.vlgmr.msrb.gmra.mxu3 %vm131_vm1, %v437_v34  ;;  %v1160_v35 = vpop.eup %1159 }
 0x2df   :  { %v434_v37 = vmul.f32 %v1160_v35, %v1146_v5  ;;  %v1162_v42 = vpop.eup %1161 }
 0x2e0   :  { %v551_v45 = vmul.f32 %v1162_v42, %v1421_v4 }
 0x2e1   :  { %v436_v40 = vpack.c.bf16 %v434_v37, %v434_v37  ;;  %v1164_v43 = vpop.eup %1163 }
 0x2e2   :  { %v550_v46 = vmul.f32 %v1164_v43, %v1148_v0  ;;  %v553_v51 = vpack.c.bf16 %v551_v45, %v551_v45 }
 0x2e3   :  { %1029 = vmatmul.msk.bf16.vlgmr.msra.gmra.mxu2 %vm131_vm1, %v436_v40  ;;  %v1235_v40 = vmov 32.0  }
 0x2e4   :  { %v552_v52 = vpack.c.bf16 %v550_v46, %v550_v46  ;;  %1165 = vrcp.f32 %v1235_v40 }
 0x2ea   :  { %v1166_v41 = vpop.eup %1165 }
 0x2eb   :  { %v677_v42 = vmul.f32 32.0, %v1166_v41  ;;  %vm681_vm7 = vweird.f32 %v1166_v41 }
 0x2ed   :  { %v555_v44 = vpop.permute.xlu0 %554  ;;  %v678_v43 = vsub.f32 1.0, %v677_v42 }
 0x2ee   :  { %v560_v47 = vsel %vm210_vm4, %v555_v44, 0 }
 0x2ef   :  { %v576_v48 = vpop.permute.xlu1 %575  ;;  %569 = vmatpush.bf16.msrb.mxu2 %v560_v47  ;;  %v679_v44 = vmul.f32 %v1166_v41, %v678_v43 }
 0x2f0   :  { %v581_v50 = vsel %vm210_vm4, %v576_v48, 0 }
 0x2f1   :  { %590 = vmatpush.bf16.msra.mxu3 %v581_v50  ;;  %v680_v45 = vadd.f32 %v1166_v41, %v679_v44 }
 0x2f3   :  { %1033 = vmatmul.msk.bf16.vlgmr.msrb.gmra.mxu2 %vm131_vm1, %v552_v52  ;;  %v1464_v46 = vsel %vm681_vm7, %v1166_v41, %v680_v45 }
 0x2f4   :  { %1034 = vmatmul.msk.bf16.vlgmr.msra.gmra.mxu3 %vm131_vm1, %v553_v51 }
 0x314   :  { %v339_v53 = vpop.f32.mrf.mxu2 }
 0x315   :  { %v223_v54 = vpop.f32.mrf.mxu3 }
 0x31c   :  { %v341_v55 = vpop.f32.mrf.mxu2 }
 0x31d   :  { %v225_v56 = vpop.f32.mrf.mxu3 }
 0x325   :  { %v244_v57 = vpop.f32.mrf.mxu3 }
 0x32d   :  { %v246_v58 = vpop.f32.mrf.mxu3 }
 0x32e   :  { %v1076_v58 = vld [vmem:[%s1555_s8 + $0x8] sm:$0xff] }
 0x32f   :  { %761 = vmatpush.bf16.msra.mxu1 %v1076_v58 }
 0x335   :  { %v360_v59 = vpop.f32.mrf.mxu3 }
 0x336   :  { %v1102_v60 = vpack.i.bf16 %v360_v59, %v339_v53 }
 0x338   :  { %1103 = vrot.lane.b32.xlu0 %v1102_v60, %s1232_s25 }
 0x33d   :  { %v362_v61 = vpop.f32.mrf.mxu3 }
 0x361   :  { %v476_v62 = vpop.f32.mrf.mxu3 }
 0x366   :  { %v455_v63 = vpop.f32.mrf.mxu2 }
 0x367   :  { %v1107_v1 = vpack.i.bf16 %v476_v62, %v455_v63  ;;  %v1075_v62 = vld [vmem:[%s1555_s8] sm:$0xff] }
 0x368   :  { %762 = vmatpush.bf16.msra.mxu1 %v1075_v62 }
 0x369   :  { %v478_v2 = vpop.f32.mrf.mxu3  ;;  %1108 = vrot.lane.b32.xlu1 %v1107_v1, %s1233_s26 }
 0x36e   :  { %v457_v3 = vpop.f32.mrf.mxu2 }
 0x376   :  { %v571_v4 = vpop.f32.mrf.mxu2 }
 0x377   :  { %v592_v5 = vpop.f32.mrf.mxu3 }
 0x378   :  { %v1112_v6 = vpack.i.bf16 %v592_v5, %v571_v4 }
 0x37a   :  { %1113 = vrot.lane.b32.xlu0 %v1112_v6, %s1234_s27 }
 0x37e   :  { %v573_v7 = vpop.f32.mrf.mxu2 }
 0x37f   :  { %v594_v0 = vpop.f32.mrf.mxu3 }
 0x3aa   :  { %v1104_v11 = vpop.permute.xlu0 %1103 }
 0x3ab   :  { %v1106_v14 = vunpack.i.h.bf16 %v1104_v11  ;;  %v1105_v15 = vunpack.i.l.bf16 %v1104_v11 }
 0x3ad   :  { %v621_v19 = vsel %vm131_vm1, %v244_v57, %v1106_v14  ;;  %v620_v8 = vsel %vm131_vm1, %v223_v54, %v1105_v15 }
 0x3db   :  { %v1109_v12 = vpop.permute.xlu1 %1108 }
 0x3dc   :  { %v1111_v16 = vunpack.i.h.bf16 %v1109_v12  ;;  %v1110_v17 = vunpack.i.l.bf16 %v1109_v12 }
 0x3de   :  { %v623_v21 = vsel %vm622_vm5, %v620_v8, %v1110_v17  ;;  %v624_v22 = vsel %vm622_vm5, %v621_v19, %v1111_v16  ;;  %v1127_v16 = vld [vmem:[%s1553_s6] ss:$0 sm:$0xff] }
 0x3df   :  { %v1128_v8 = vld [vmem:[%s1554_s7] ss:$0 sm:$0xff] }
 0x3ec   :  { %v1114_v18 = vpop.permute.xlu0 %1113 }
 0x3ed   :  { %v1116_v13 = vunpack.i.h.bf16 %v1114_v18  ;;  %v1115_v20 = vunpack.i.l.bf16 %v1114_v18 }
 0x3ef   :  { %v626_v23 = vsel %vm625_vm6, %v623_v21, %v1115_v20  ;;  %v627_v24 = vsel %vm625_vm6, %v624_v22, %v1116_v13 }
 0x3f0   :  { %v628_v25 = vpack.c.bf16 %v627_v24, %v626_v23 }
 0x3f2   :  { %1043 = vmatmul.msk.bf16.vlgmr.msra.gmra.mxu0 %vm87_vm0, %v628_v25  ;;  %v1080_v25 = vld [vmem:[%s1557_s10 + $0x18] sm:$0xff] }
 0x3f3   :  { %816 = vmatpush.bf16.msra.mxu2 %v1080_v25 }
 0x3f7   :  { %817 = vmatpush.bf16.msra.mxu2 %v1079_v26 }
 0x46f   :  { %v661_v29 = vpop.f32.mrf.mxu0 }
 0x470   :  { %v662_v30 = vadd.f32 %v1126_v27, %v661_v29 }
 0x472   :  { %v666_v31 = vadd.f32 %v662_v30, %v60_v28  ;;  %v1077_v28 = vld [vmem:[%s1557_s10] sm:$0xff] }
 0x473   :  { %v1129_v30 = vld [vmem:[%s1556_s9] ss:$0 sm:$0xff] }
 0x474   :  { %v670_v32 = vsel %vm87_vm0, %v666_v31, 0.0 }
 0x475   :  { %671 = vadd.xlane.f32.xlu1 %v670_v32 }
 0x477   :  { %v663_v34 = vpop.f32.mrf.mxu0 }
 0x478   :  { %v664_v35 = vadd.f32 %v1126_v27, %v663_v34  ;;  %v1078_v27 = vld [vmem:[%s1557_s10 + $0x8] sm:$0xff] }
 0x479   :  { %818 = vmatpush.bf16.msra.mxu2 %v1078_v27 }
 0x47a   :  { %v667_v37 = vadd.f32 %v664_v35, %v61_v33 }
 0x47c   :  { %v673_v39 = vsel %vm87_vm0, %v667_v37, 0.0 }
 0x47d   :  { %674 = vadd.xlane.f32.xlu2 %v673_v39  ;;  %819 = vmatpush.bf16.msra.mxu2 %v1077_v28  ;;  %v1130_v39 = vld [vmem:[%s1558_s11] ss:$0 sm:$0xff] }
 0x4e8   :  { %v672_v47 = vpop.xlane.xlu1 %671 }
 0x4e9   :  { %v683_v48 = vmul.f32 %v1464_v46, %v672_v47 }
 0x4eb   :  { %v685_v50 = vsub.f32 %v666_v31, %v683_v48 }
 0x4ed   :  { %v687_v51 = vmul.f32 %v685_v50, %v685_v50 }
 0x4ef   :  { %v689_v52 = vsel %vm87_vm0, %v687_v51, 0.0  ;;  %v1236_v51 = vmov 0  }
 0x4f0   :  { %v675_v53 = vpop.xlane.xlu2 %674  ;;  %690 = vadd.xlane.f32.xlu0 %v689_v52  ;;  %1117 = vset.pattern.permute.xlu2 %v1236_v51  ;;  %v1237_v52 = vmov 0.0  }
 0x4f1   :  { %v684_v54 = vmul.f32 %v1464_v46, %v675_v53  ;;  %1123 = vset.pattern.permute.xlu0 %v1236_v51  ;;  %1124 = vset.pattern.permute.xlu1 %v1236_v51 }
 0x4f3   :  { %v686_v55 = vsub.f32 %v667_v37, %v684_v54 }
 0x4f5   :  { %v688_v56 = vmul.f32 %v686_v55, %v686_v55 }
 0x4f7   :  { %v692_v57 = vsel %vm87_vm0, %v688_v56, 0.0 }
 0x4f8   :  { %693 = vadd.xlane.f32.xlu2 %v692_v57 }
 0x563   :  { %v691_v59 = vpop.xlane.xlu0 %690 }
 0x564   :  { %v695_v60 = vmul.f32 %v691_v59, %v1464_v46 }
 0x566   :  { %v697_v61 = vadd.f32 1e-05, %v695_v60 }
 0x568   :  { %1167 = vrsqrt.f32 %v697_v61  ;;  %vm705_vm9 = vweird.f32 %v697_v61 }
 0x56b   :  { %v694_v63 = vpop.xlane.xlu2 %693 }
 0x56c   :  { %v696_v1 = vmul.f32 %v694_v63, %v1464_v46 }
 0x56e   :  { %v1168_v2 = vpop.eup %1167  ;;  %v698_v3 = vadd.f32 1e-05, %v696_v1 }
 0x56f   :  { %v700_v4 = vmul.f32 %v1168_v2, %v697_v61  ;;  %vm706_vm8 = vweird.f32 %v1168_v2 }
 0x570   :  { %1169 = vrsqrt.f32 %v698_v3  ;;  %vm707_vm10 = vmor %vm705_vm9, %vm706_vm8  ;;  %vm715_vm12 = vweird.f32 %v698_v3 }
 0x571   :  { %v701_v5 = vmul.f32 %v1168_v2, %v700_v4 }
 0x573   :  { %v702_v6 = vmul.f32 0.5, %v701_v5 }
 0x575   :  { %v703_v7 = vsub.f32 1.5, %v702_v6 }
 0x576   :  { %v1170_v0 = vpop.eup %1169 }
 0x577   :  { %v704_v9 = vmul.f32 %v1168_v2, %v703_v7  ;;  %v710_v10 = vmul.f32 %v1170_v0, %v698_v3  ;;  %vm716_vm11 = vweird.f32 %v1170_v0 }
 0x578   :  { %vm717_vm13 = vmor %vm715_vm12, %vm716_vm11 }
 0x579   :  { %v711_v11 = vmul.f32 %v1170_v0, %v710_v10  ;;  %v708_v12 = vsel %vm707_vm10, %v1168_v2, %v704_v9 }
 0x57a   :  { %v719_v17 = vmul.f32 %v708_v12, %v685_v50  ;;  %v113_v50 = vshrl.u32 %v110_v36, 7 }
 0x57b   :  { %v712_v14 = vmul.f32 0.5, %v711_v11 }
 0x57c   :  { %v724_v13 = vmul.f32 %v1127_v16, %v719_v17  ;;  %vm120_vm1 = vcmp.lt.s32.totalorder %v113_v50, %v114_v38  ;;  %vm123_vm2 = vcmp.lt.s32.totalorder %v113_v50, %v117_v49 }
 0x57d   :  { %v713_v15 = vsub.f32 1.5, %v712_v14  ;;  %v1017_v53 = vsel %vm120_vm1, 1.0, %v1237_v52  ;;  %v1018_v56 = vsel %vm123_vm2, 1.0, %v1237_v52 }
 0x57e   :  { %v729_v22 = vadd.f32 %v1128_v8, %v724_v13  ;;  %v890_v54 = vsel %vm889_vm15, %v1017_v53, 0.0  ;;  %v897_v58 = vsel %vm889_vm15, %v1018_v56, 0.0 }
 0x57f   :  { %v714_v18 = vmul.f32 %v1170_v0, %v713_v15  ;;  %v898_v59 = vrot.slane %v897_v58, 4 }
 0x581   :  { %v718_v19 = vsel %vm717_vm13, %v1170_v0, %v714_v18  ;;  %v899_v36 = vadd.f32 %v898_v59, %v897_v58  ;;  %v1132_v59 = vld [vmem:[%s1560_s13] ss:$0 sm:$0xff] }
 0x582   :  { %v720_v20 = vmul.f32 %v718_v19, %v686_v55  ;;  %v891_v55 = vrot.slane %v890_v54, 4 }
 0x583   :  { %v900_v2 = vrot.slane %v899_v36, 2 }
 0x584   :  { %v725_v21 = vmul.f32 %v1127_v16, %v720_v20  ;;  %v892_v57 = vadd.f32 %v891_v55, %v890_v54  ;;  %v1131_v55 = vld [vmem:[%s1559_s12] ss:$0 sm:$0xff]  ;;  %s1238_s12 = smov [#allocation4]  }
 0x585   :  { %v901_v4 = vadd.f32 %v900_v2, %v899_v36  ;;  %s985_s13 = sshll.u32 %s1238_s12, 4  ;;  %s986_s13 = int_to_ptr.vmem [resolvable:$true] %s985_s13 }
 0x586   :  { %v730_v23 = vadd.f32 %v1128_v8, %v725_v21  ;;  %v893_v60 = vrot.slane %v892_v57, 2 }
 0x587   :  { %v902_v6 = vrot.slane %v901_v4, 1 }
 0x588   :  { %v731_v24 = vpack.c.bf16 %v730_v23, %v729_v22  ;;  %v894_v61 = vadd.f32 %v893_v60, %v892_v57 }
 0x589   :  { %v903_v7 = vadd.f32 %v902_v6, %v901_v4 }
 0x58a   :  { %1052 = vmatmul.msk.bf16.vlgmr.msra.gmra.mxu1 %vm87_vm0, %v731_v24  ;;  %v895_v62 = vrot.slane %v894_v61, 1 }
 0x58b   :  { %v907_v10 = vmax.f32 %v903_v7, 1.0  ;;  %vm905_vm12 = vcmp.gt.f32.partialorder %v903_v7, 0.0 }
 0x58c   :  { %v896_v63 = vadd.f32 %v895_v62, %v894_v61 }
 0x58d   :  { %vm928_vm8 = vweird.f32 %v907_v10 }
 0x58e   :  { %v906_v3 = vmax.f32 %v896_v63, 1.0  ;;  %vm904_vm7 = vcmp.gt.f32.partialorder %v896_v63, 0.0 }
 0x590   :  { %1171 = vrcp.f32 %v906_v3  ;;  %v919_v16 = vand.u32 2147483648, %v906_v3  ;;  %vm913_vm3 = vweird.f32 %v906_v3  ;;  %v917_v18 = vand.u32 2147483647, %v906_v3 }
 0x591   :  { %1173 = vrcp.f32 %v907_v10 }
 0x592   :  { %v920_v20 = vor.u32 1.1754944e-38, %v919_v16  ;;  %vm918_vm6 = vcmp.eq.f32.partialorder %v917_v18, 8.507059e+37 }
 0x596   :  { %v1172_v11 = vpop.eup %1171 }
 0x597   :  { %v909_v14 = vmul.f32 %v1172_v11, %v906_v3  ;;  %vm914_vm4 = vweird.f32 %v1172_v11  ;;  %v1174_v21 = vpop.eup %1173 }
 0x598   :  { %vm915_vm5 = vmor %vm913_vm3, %vm914_vm4  ;;  %vm929_vm9 = vweird.f32 %v1174_v21  ;;  %vm886_vm3 = vcmask 257024  }
 0x599   :  { %v910_v17 = vsub.f32 1.0, %v909_v14  ;;  %vm930_vm10 = vmor %vm928_vm8, %vm929_vm9 }
 0x59b   :  { %v911_v8 = vmul.f32 %v1172_v11, %v910_v17 }
 0x607   :  { %v764_v29 = vpop.f32.mrf.mxu1 }
 0x608   :  { %v765_v31 = vadd.f32 %v1129_v30, %v764_v29  ;;  %v934_v29 = vand.u32 2147483648, %v907_v10 }
 0x60a   :  { %v769_v34 = vmax.f32 %v765_v31, 0.0 }
 0x60f   :  { %v766_v32 = vpop.f32.mrf.mxu1 }
 0x610   :  { %v767_v33 = vadd.f32 %v1129_v30, %v766_v32  ;;  %v1118_v30 = vpack.i.bf16 %v1018_v56, %v1017_v53  ;;  %v932_v32 = vand.u32 2147483647, %v907_v10 }
 0x612   :  { %v770_v35 = vmax.f32 %v767_v33, 0.0  ;;  %v935_v33 = vor.u32 1.1754944e-38, %v934_v29  ;;  %vm933_vm11 = vcmp.eq.f32.partialorder %v932_v32, 8.507059e+37 }
 0x614   :  { %v771_v37 = vpack.c.bf16 %v770_v35, %v769_v34 }
 0x616   :  { %1069 = vmatmul.msk.bf16.vlgmr.msra.gmra.mxu2 %vm808_vm14, %v771_v37 }
 0x699   :  { %v821_v40 = vpop.f32.mrf.mxu2 }
 0x69a   :  { %v822_v41 = vadd.f32 %v1130_v39, %v821_v40 }
 0x69c   :  { %v826_v42 = vadd.f32 %v822_v41, %v729_v22  ;;  %v912_v22 = vadd.f32 %v1172_v11, %v911_v8 }
 0x69e   :  { %v830_v43 = vsel %vm87_vm0, %v826_v42, 0.0  ;;  %v916_v24 = vsel %vm915_vm5, %v1172_v11, %v912_v22  ;;  %vm978_vm5 = vcmask 253952  }
 0x69f   :  { %831 = vadd.xlane.f32.xlu2 %v830_v43  ;;  %v921_v25 = vsel %vm918_vm6, %v920_v20, %v916_v24 }
 0x6a0   :  { %v938_v26 = vsel %vm904_vm7, %v921_v25, 0.0 }
 0x6a1   :  { %v823_v44 = vpop.f32.mrf.mxu2  ;;  %968 = vperm.xlu0 %1123, %v938_v26  }
 0x6a2   :  { %v824_v45 = vadd.f32 %v1130_v39, %v823_v44 }
 0x6a4   :  { %v827_v47 = vadd.f32 %v824_v45, %v730_v23  ;;  %v924_v23 = vmul.f32 %v1174_v21, %v907_v10 }
 0x6a6   :  { %v833_v48 = vsel %vm87_vm0, %v827_v47, 0.0  ;;  %v925_v27 = vsub.f32 1.0, %v924_v23 }
 0x6a7   :  { %834 = vadd.xlane.f32.xlu2 %v833_v48 }
 0x6a8   :  { %v926_v28 = vmul.f32 %v1174_v21, %v925_v27 }
 0x6aa   :  { %v927_v31 = vadd.f32 %v1174_v21, %v926_v28 }
 0x6ac   :  { %v931_v34 = vsel %vm930_vm10, %v1174_v21, %v927_v31 }
 0x6ad   :  { %v936_v35 = vsel %vm933_vm11, %v935_v33, %v931_v34 }
 0x6ae   :  { %v939_v37 = vsel %vm905_vm12, %v936_v35, 0.0 }
 0x712   :  { %v832_v1 = vpop.xlane.xlu2 %831 }
 0x713   :  { %v836_v38 = vmul.f32 %v832_v1, %v1464_v46  ;;  %v969_v18 = vpop.permute.xlu0 %968 }
 0x715   :  { %v1511_v5 = vsub.f32 %v826_v42, %v836_v38 }
 0x717   :  { %v840_v49 = vmul.f32 %v1511_v5, %v1511_v5 }
 0x719   :  { %v842_v0 = vsel %vm87_vm0, %v840_v49, 0.0 }
 0x71a   :  { %843 = vadd.xlane.f32.xlu2 %v842_v0  ;;  %v835_v9 = vpop.xlane.xlu2 %834 }
 0x71b   :  { %v837_v12 = vmul.f32 %v835_v9, %v1464_v46 }
 0x71d   :  { %v1517_v15 = vsub.f32 %v827_v47, %v837_v12 }
 0x71f   :  { %v841_v19 = vmul.f32 %v1517_v15, %v1517_v15 }
 0x721   :  { %v845_v13 = vsel %vm87_vm0, %v841_v19, 0.0 }
 0x722   :  { %846 = vadd.xlane.f32.xlu1 %v845_v13 }
 0x732   :  { %1119 = vperm.xlu2 %1117, %v1118_v30  }
 0x73b   :  { %973 = vperm.xlu1 %1124, %v939_v37  }
 0x78d   :  { %v844_v39 = vpop.xlane.xlu2 %843 }
 0x78e   :  { %v848_v40 = vmul.f32 %v844_v39, %v1464_v46 }
 0x790   :  { %v850_v41 = vadd.f32 1e-05, %v848_v40 }
 0x792   :  { %1175 = vrsqrt.f32 %v850_v41  ;;  %vm858_vm14 = vweird.f32 %v850_v41 }
 0x795   :  { %v847_v42 = vpop.xlane.xlu1 %846 }
 0x796   :  { %v849_v43 = vmul.f32 %v847_v42, %v1464_v46  ;;  %v1120_v46 = vpop.permute.xlu2 %1119 }
 0x797   :  { %v1121_v36 = vunpack.i.l.bf16 %v1120_v46  ;;  %v1122_v7 = vunpack.i.h.bf16 %v1120_v46 }
 0x798   :  { %v1176_v44 = vpop.eup %1175  ;;  %v851_v45 = vadd.f32 1e-05, %v849_v43 }
 0x799   :  { %v853_v47 = vmul.f32 %v1176_v44, %v850_v41  ;;  %vm859_vm13 = vweird.f32 %v1176_v44 }
 0x79a   :  { %1177 = vrsqrt.f32 %v851_v45  ;;  %vm860_vm15 = vmor %vm858_vm14, %vm859_vm13  ;;  %vm868_vm2 = vweird.f32 %v851_v45 }
 0x79b   :  { %v854_v48 = vmul.f32 %v1176_v44, %v853_v47 }
 0x79d   :  { %v855_v50 = vmul.f32 0.5, %v854_v48 }
 0x79f   :  { %v856_v51 = vsub.f32 1.5, %v855_v50 }
 0x7a0   :  { %v1178_v52 = vpop.eup %1177 }
 0x7a1   :  { %v857_v53 = vmul.f32 %v1176_v44, %v856_v51  ;;  %v863_v54 = vmul.f32 %v1178_v52, %v851_v45  ;;  %vm869_vm1 = vweird.f32 %v1178_v52 }
 0x7a2   :  { %vm870_vm4 = vmor %vm868_vm2, %vm869_vm1 }
 0x7a3   :  { %v861_v56 = vsel %vm860_vm15, %v1176_v44, %v857_v53  ;;  %v864_v57 = vmul.f32 %v1178_v52, %v863_v54 }
 0x7a4   :  { %v872_v58 = vmul.f32 %v861_v56, %v1511_v5 }
 0x7a5   :  { %v865_v60 = vmul.f32 0.5, %v864_v57 }
 0x7a6   :  { %v877_v61 = vmul.f32 %v1131_v55, %v872_v58 }
 0x7a7   :  { %v866_v62 = vsub.f32 1.5, %v865_v60 }
 0x7a8   :  { %v882_v63 = vadd.f32 %v1132_v59, %v877_v61 }
 0x7a9   :  { %v867_v1 = vmul.f32 %v1178_v52, %v866_v62 }
 0x7aa   :  { %v884_v2 = vpack.c.bf16 %v882_v63, %v882_v63  ;;  %v950_v38 = vmul.f32 %v1121_v36, %v882_v63 }
 0x7ab   :  { %v871_v3 = vsel %vm870_vm4, %v1178_v52, %v867_v1 }
 0x7ac   :  { %v873_v4 = vmul.f32 %v871_v3, %v1517_v15  ;;  %887 = vst.msk [vmem:[#allocation4] sm:$0xf] %vm886_vm3, %v884_v2  ;;  %v952_v5 = vsel %vm87_vm0, %v950_v38, 0.0 }
 0x7ad   :  { %v953_v6 = vrot.slane %v952_v5, 4  ;;  %v974_v23 = vpop.permute.xlu1 %973 }
 0x7ae   :  { %v878_v49 = vmul.f32 %v1131_v55, %v873_v4 }
 0x7af   :  { %v954_v0 = vadd.f32 %v953_v6, %v952_v5 }
 0x7b0   :  { %v883_v9 = vadd.f32 %v1132_v59, %v878_v49 }
 0x7b1   :  { %v955_v10 = vrot.slane %v954_v0, 2 }
 0x7b2   :  { %v885_v11 = vpack.c.bf16 %v883_v9, %v883_v9  ;;  %v951_v12 = vmul.f32 %v1122_v7, %v883_v9 }
 0x7b3   :  { %v956_v14 = vadd.f32 %v955_v10, %v954_v0 }
 0x7b4   :  { %888 = vst.msk [vmem:[#allocation4 + $0x4] sm:$0xf] %vm886_vm3, %v885_v11  ;;  %v959_v15 = vsel %vm87_vm0, %v951_v12, 0.0 }
 0x7b5   :  { %v960_v16 = vrot.slane %v959_v15, 4  ;;  %v957_v17 = vrot.slane %v956_v14, 1  ;;  %993 = dma.vmem_to_hbm [thread:$0]  %s986_s13, 128, %s988_s1, [#allocation5], %s1228_s21, %s1228_s21, %s1239_s5  }
 0x7b7   :  { %v961_v19 = vadd.f32 %v960_v16, %v959_v15  ;;  %v958_v8 = vadd.f32 %v957_v17, %v956_v14 }
 0x7b9   :  { %v976_v13 = vmul.f32 %v969_v18, %v958_v8  ;;  %v962_v20 = vrot.slane %v961_v19, 2 }
 0x7bb   :  { %979 = vst.msk [vmem:[%s1562_s15] sm:$0x1] %vm978_vm5, %v976_v13  ;;  %v963_v21 = vadd.f32 %v962_v20, %v961_v19 }
 0x7bd   :  { %v964_v22 = vrot.slane %v963_v21, 1 }
 0x7bf   :  { %v965_v24 = vadd.f32 %v964_v22, %v963_v21 }
 0x7c1   :  { %v977_v25 = vmul.f32 %v974_v23, %v965_v24 }
 0x7c3   :  { %980 = vst.msk [vmem:[%s1562_s15 + $0x1] sm:$0x1] %vm978_vm5, %v977_v25 }
 0x7c4   :  { %1217 = dma.done.wait [#allocation5], 128  }
 0x7c5   :  { %1218 = vsyncadd [#allocation5], 4294967168 }
 0x7c6   :  { %1002 = vsyncpa [#allocation5], 1 }

// kernel: motion_encoder_forward.5
= control target key start
LH: loop header
LB: loop body
LE: loop exit
PB: predicated region body
PF: predicated region fallthrough
CT: control target
= control target key end

     0   :  { %s1344_s21 = smov [#allocation3]   ;;  %s1676_s0 = inlined_call_operand.vmem [shape: s32[2], index: 0, kind: input, shape index: {}]   ;;  %s1677_s1 = inlined_call_operand.vmem [shape: bf16[2,8,32], index: 1, kind: input, shape index: {}]   ;;  %s1678_s2 = inlined_call_operand.vmem [shape: bf16[32,96], index: 2, kind: input, shape index: {}]   ;;  %s1679_s3 = inlined_call_operand.vmem [shape: f32[1,96], index: 3, kind: input, shape index: {}]   ;;  %s1680_s4 = inlined_call_operand.vmem [shape: bf16[32,32], index: 4, kind: input, shape index: {}]   ;;  %s1681_s5 = inlined_call_operand.vmem [shape: f32[1,32], index: 5, kind: input, shape index: {}]   ;;  %s1682_s6 = inlined_call_operand.vmem [shape: f32[1,32], index: 6, kind: input, shape index: {}]   ;;  %s1683_s7 = inlined_call_operand.vmem [shape: f32[1,32], index: 7, kind: input, shape index: {}]   ;;  %s1684_s8 = inlined_call_operand.hbm [shape: bf16[32,64], index: 8, kind: input, shape index: {}]   ;;  %s1685_s9 = inlined_call_operand.hbm [shape: f32[1,64], index: 9, kind: input, shape index: {}]   ;;  %s1686_s10 = inlined_call_operand.vmem [shape: bf16[64,32], index: 10, kind: input, shape index: {}]   ;;  %s1687_s11 = inlined_call_operand.hbm [shape: f32[1,32], index: 11, kind: input, shape index: {}]   ;;  %s1688_s12 = inlined_call_operand.vmem [shape: f32[1,32], index: 12, kind: input, shape index: {}]   ;;  %s1689_s13 = inlined_call_operand.vmem [shape: f32[1,32], index: 13, kind: input, shape index: {}]   ;;  %s1690_s14 = inlined_call_operand.vmem [shape: bf16[2,8,32], index: 14, kind: output, shape index: {0}]   ;;  %s1691_s15 = inlined_call_operand.hbm [shape: f32[2,1,32], index: 15, kind: output, shape index: {1}]  }
   0x1   :  { %s22_s20 = sshll.u32 %s1676_s0, 4  ;;  %s23_s20 = int_to_ptr.vmem [resolvable:$true] %s22_s20 }
   0x2   :  { %25 = dma.vmem_to_smem %s23_s20, 16, %s1344_s21, [#allocation2] }
   0x3   :  { %1336 = dma.done.wait [#allocation2], 16 }
   0x4   :  { %1337 = vsyncadd [#allocation2], 4294967280 }
   0x5   :  { %28 = sfence }
   0x6   :  { %29 = vsyncpa [#allocation5], 0 }
   0x7   :  { %30 = vsyncpa [#allocation8], 0  ;;  %s64_s24 = sshll.u32 %s1685_s9, 4  ;;  %s65_s24 = int_to_ptr.hbm [resolvable:$true] %s64_s24 }
   0x8   :  { %31 = vsyncpa [#allocation6], 0  ;;  %s1345_s25 = smov [#allocation7]   ;;  %s50_s0 = sshll.u32 %s1684_s8, 4  ;;  %s51_s0 = int_to_ptr.hbm [resolvable:$true] %s50_s0 }
   0x9   :  { %s66_s26 = sshll.u32 %s1345_s25, 4  ;;  %s1346_s29 = smov [#allocation4]   ;;  %s67_s26 = int_to_ptr.vmem [resolvable:$true] %s66_s26 }
   0xa   :  { %69 = dma.hbm_to_vmem [thread:$0]  %s65_s24, 16, %s67_s26, [#allocation8]  }
   0xb   :  { %s52_s30 = sshll.u32 %s1346_s29, 4  ;;  %s1347_s16 = smov 64   ;;  %s53_s30 = int_to_ptr.vmem [resolvable:$true] %s52_s30 }
   0xc   :  { %s1348_s17 = smov 4   ;;  %s77_s19 = sshll.u32 %s1687_s11, 4  ;;  %s78_s19 = int_to_ptr.hbm [resolvable:$true] %s77_s19 }
   0xd   :  { %58 = dma.hbm_to_vmem [thread:$0]  %s51_s0, 256, %s53_s30, [#allocation5], %s1347_s16, %s1347_s16, %s1348_s17  }
   0xe   :  { %s1349_s20 = smov [#allocation9]  }
   0xf   :  { %s79_s21 = sshll.u32 %s1349_s20, 4  ;;  %s80_s21 = int_to_ptr.vmem [resolvable:$true] %s79_s21 }
  0x10   :  { %82 = dma.hbm_to_vmem [thread:$0]  %s78_s19, 16, %s80_s21, [#allocation8]  }
  0x11   :  { %1338 = dma.done.wait [#allocation5], 256  }
  0x12   :  { %1339 = vsyncadd [#allocation5], 4294967040 }
  0x13   :  { %1340 = dma.done.wait [#allocation8], 32  }
  0x14   :  { %1341 = vsyncadd [#allocation8], 4294967264  ;;  %v1117_v0 = vld [vmem:[%s1678_s2 + $0x8] sm:$0xff]  ;;  %v1116_v1 = vld [vmem:[%s1678_s2] sm:$0xff]  ;;  %vm130_vm0 = vcmask 261120   ;;  %s1350_s2 = smov 120   ;;  %v153_v36 = vlaneseq }
  0x15   :  { %140 = vmatpush.bf16.msra.mxu0 %v1117_v0  ;;  %v1115_v2 = vld [vmem:[%s1677_s1] sm:$0xff]  ;;  %s1351_s28 = smov 88   ;;  %s1352_s0 = smov 96   ;;  %vm174_vm1 = vcmask 64512   ;;  %v1357_v39 = vmov -1e+30  }
  0x16   :  { %v1174_v3 = vld [vmem:[%s1679_s3] ss:$0 sm:$0xff]  ;;  %s1353_s3 = smov 112   ;;  %s1354_s29 = smov 80   ;;  %v154_v37 = vand.u32 127, %v153_v36  ;;  %vm253_vm4 = vcmask 1043456  }
  0x17   :  { %s1355_s30 = smov 72   ;;  %s1356_s17 = smov 104   ;;  %vm665_vm5 = vcmask 130048   ;;  %vm668_vm6 = vcmask 195584   ;;  %vm851_vm14 = vcmask 523264   ;;  %vm932_vm15 = vcmask 7168  }
  0x18   :  { %s1510_s9 = sld [smem:[#allocation3]]  ;;  %s1358_s19 = smov 56  }
  0x19   :  { %141 = vmatpush.bf16.msra.mxu0 %v1116_v1  ;;  %s1516_s18 = sld [smem:[#allocation3 + $0x1]]  ;;  %s1360_s20 = smov 40  }
  0x1a   :  { %s1361_s21 = smov 8   ;;  %s1362_s8 = smov 16  }
  0x1b   :  { %s1363_s22 = smov 24   ;;  %s1367_s23 = smov [#allocation10]  }
  0x1c   :  { %1060 = vmatmul.msk.bf16.vlgmr.msra.gmra.mxu0 %vm130_vm0, %v1115_v2  ;;  %s1030_s24 = sshll.u32 %s1367_s23, 4  ;;  %s1031_s24 = int_to_ptr.vmem [resolvable:$true] %s1030_s24 }
  0x1e   :  { %v157_v38 = vstv %s1510_s9 }
  0x1f   :  { %vm158_vm2 = vcmp.lt.s32.totalorder %v154_v37, %v157_v38  ;;  %v160_v49 = vstv %s1516_s18 }
  0x20   :  { %v159_v40 = vsel %vm158_vm2, 0.0, %v1357_v39  ;;  %vm161_vm3 = vcmp.lt.s32.totalorder %v154_v37, %v160_v49 }
  0x21   :  { %v220_v41 = vperm.slane %v159_v40, 0  ;;  %v162_v53 = vsel %vm161_vm3, 0.0, %v1357_v39 }
  0x22   :  { %v221_v54 = vperm.slane %v162_v53, 0 }
  0x99   :  { %v143_v4 = vpop.f32.mrf.mxu0 }
  0x9a   :  { %v144_v5 = vadd.f32 %v1174_v3, %v143_v4 }
  0x9c   :  { %v148_v6 = vpack.c.bf16 %v144_v5, %v144_v5 }
  0x9e   :  { %v170_v7 = vunpack.c.l.b16 %v148_v6 }
  0xa0   :  { %v1476_v8 = vpack.c.b16 %v170_v7, %v170_v7 }
  0xa1   :  { %v145_v9 = vpop.f32.mrf.mxu0 }
  0xa2   :  { %v146_v10 = vadd.f32 %v1174_v3, %v145_v9  ;;  %291 = vrot.lane.b32.xlu2 %v1476_v8, %s1350_s2  ;;  %293 = vrot.lane.b32.xlu1 %v1476_v8, %s1351_s28 }
  0xa3   :  { %172 = vrot.lane.b32.xlu0 %v1476_v8, %s1352_s0 }
  0xa4   :  { %v149_v11 = vpack.c.bf16 %v146_v10, %v146_v10 }
  0xa6   :  { %v195_v12 = vunpack.c.l.b16 %v149_v11 }
  0xa8   :  { %v1481_v13 = vpack.c.b16 %v195_v12, %v195_v12 }
  0xaa   :  { %314 = vrot.lane.b32.xlu2 %v1481_v13, %s1350_s2  ;;  %316 = vrot.lane.b32.xlu1 %v1481_v13, %s1351_s28 }
  0xab   :  { %197 = vrot.lane.b32.xlu0 %v1481_v13, %s1352_s0 }
  0xb2   :  { %407 = vrot.lane.b32.xlu2 %v1476_v8, %s1353_s3  ;;  %432 = vrot.lane.b32.xlu1 %v1481_v13, %s1354_s29 }
  0xb3   :  { %409 = vrot.lane.b32.xlu0 %v1476_v8, %s1354_s29 }
  0xba   :  { %548 = vrot.lane.b32.xlu2 %v1481_v13, %s1355_s30  ;;  %525 = vrot.lane.b32.xlu1 %v1476_v8, %s1355_s30 }
  0xbb   :  { %430 = vrot.lane.b32.xlu0 %v1481_v13, %s1353_s3 }
  0xc2   :  { %546 = vrot.lane.b32.xlu1 %v1481_v13, %s1356_s17 }
  0xc3   :  { %523 = vrot.lane.b32.xlu0 %v1476_v8, %s1356_s17 }
  0xfc   :  { %v292_v14 = vpop.permute.xlu2 %291 }
 0x104   :  { %v315_v19 = vpop.permute.xlu2 %314 }
 0x10c   :  { %v408_v24 = vpop.permute.xlu2 %407 }
 0x114   :  { %v294_v15 = vpop.permute.xlu1 %293  ;;  %v549_v29 = vpop.permute.xlu2 %548 }
 0x115   :  { %v173_v16 = vpop.permute.xlu0 %172  ;;  %v299_v17 = vsel %vm174_vm1, %v294_v15, 0  ;;  %v554_v32 = vsel %vm174_vm1, %v549_v29, 0 }
 0x116   :  { %v179_v18 = vsel %vm174_vm1, %v173_v16, 0  ;;  %308 = vmatpush.bf16.xpose.msrb.mxu0 %v299_v17 }
 0x117   :  { %188 = vmatpush.bf16.xpose.msra.mxu1 %v179_v18 }
 0x11c   :  { %v317_v20 = vpop.permute.xlu1 %316 }
 0x11d   :  { %v198_v21 = vpop.permute.xlu0 %197  ;;  %1068 = vmatmul.msk.bf16.vlgmr.msrb.gmra.mxu0 %vm174_vm1, %v292_v14  ;;  %v322_v22 = vsel %vm174_vm1, %v317_v20, 0 }
 0x11e   :  { %1064 = vmatmul.msk.bf16.vlgmr.msra.gmra.mxu1 %vm174_vm1, %v148_v6  ;;  %v203_v23 = vsel %vm174_vm1, %v198_v21, 0 }
 0x11f   :  { %212 = vmatpush.bf16.xpose.msra.mxu2 %v203_v23  ;;  %331 = vmatpush.bf16.xpose.msrb.mxu1 %v322_v22 }
 0x124   :  { %v433_v25 = vpop.permute.xlu1 %432 }
 0x125   :  { %v438_v26 = vsel %vm174_vm1, %v433_v25, 0  ;;  %v410_v27 = vpop.permute.xlu0 %409 }
 0x126   :  { %v415_v28 = vsel %vm174_vm1, %v410_v27, 0  ;;  %1065 = vmatmul.msk.bf16.vlgmr.msra.gmra.mxu2 %vm174_vm1, %v149_v11 }
 0x127   :  { %447 = vmatpush.bf16.xpose.msra.mxu1 %v438_v26  ;;  %424 = vmatpush.bf16.xpose.msra.mxu0 %v415_v28 }
 0x12c   :  { %v526_v30 = vpop.permute.xlu1 %525 }
 0x12d   :  { %v531_v31 = vsel %vm174_vm1, %v526_v30, 0  ;;  %v431_v33 = vpop.permute.xlu0 %430 }
 0x12e   :  { %1069 = vmatmul.msk.bf16.vlgmr.msrb.gmra.mxu1 %vm174_vm1, %v315_v19  ;;  %1072 = vmatmul.msk.bf16.vlgmr.msra.gmra.mxu0 %vm174_vm1, %v408_v24 }
 0x12f   :  { %563 = vmatpush.bf16.xpose.msrb.mxu1 %v554_v32  ;;  %540 = vmatpush.bf16.xpose.msrb.mxu0 %v531_v31 }
 0x134   :  { %v547_v35 = vpop.permute.xlu1 %546 }
 0x135   :  { %v524_v34 = vpop.permute.xlu0 %523 }
 0x13e   :  { %1073 = vmatmul.msk.bf16.vlgmr.msra.gmra.mxu1 %vm174_vm1, %v431_v33  ;;  %1076 = vmatmul.msk.bf16.vlgmr.msrb.gmra.mxu0 %vm174_vm1, %v524_v34 }
 0x14e   :  { %1077 = vmatmul.msk.bf16.vlgmr.msrb.gmra.mxu1 %vm174_vm1, %v547_v35 }
 0x19a   :  { %v310_v42 = vpop.f32.mrf.mxu0 }
 0x19b   :  { %v190_v43 = vpop.f32.mrf.mxu1  ;;  %v337_v44 = vmul.f32 0.35355338, %v310_v42 }
 0x19c   :  { %v218_v45 = vmul.f32 0.35355338, %v190_v43 }
 0x19d   :  { %v339_v46 = vadd.f32 %v337_v44, %v220_v41 }
 0x19e   :  { %v222_v47 = vadd.f32 %v220_v41, %v218_v45 }
 0x19f   :  { %v341_v48 = vsel %vm174_vm1, %v339_v46, -inf }
 0x1a0   :  { %342 = vmax.xlane.f32.xlu1 %v341_v48  ;;  %v224_v50 = vsel %vm174_vm1, %v222_v47, -inf }
 0x1a1   :  { %225 = vmax.xlane.f32.xlu2 %v224_v50 }
 0x1a2   :  { %v312_v51 = vpop.f32.mrf.mxu0 }
 0x1a3   :  { %v192_v52 = vpop.f32.mrf.mxu1 }
 0x1a9   :  { %v214_v55 = vpop.f32.mrf.mxu2 }
 0x1aa   :  { %v219_v56 = vmul.f32 0.35355338, %v214_v55 }
 0x1ab   :  { %v333_v57 = vpop.f32.mrf.mxu1  ;;  %v426_v58 = vpop.f32.mrf.mxu0 }
 0x1ac   :  { %v338_v59 = vmul.f32 0.35355338, %v333_v57  ;;  %v453_v60 = vmul.f32 0.35355338, %v426_v58  ;;  %v223_v61 = vadd.f32 %v221_v54, %v219_v56 }
 0x1ae   :  { %v227_v62 = vsel %vm174_vm1, %v223_v61, -inf  ;;  %v340_v63 = vadd.f32 %v338_v59, %v221_v54  ;;  %v1524_v0 = vadd.f32 %v453_v60, %v220_v41 }
 0x1af   :  { %228 = vmax.xlane.f32.xlu0 %v227_v62 }
 0x1b0   :  { %v344_v1 = vsel %vm174_vm1, %v340_v63, -inf  ;;  %v457_v21 = vsel %vm174_vm1, %v1524_v0, -inf }
 0x1b1   :  { %345 = vmax.xlane.f32.xlu2 %v344_v1  ;;  %v216_v2 = vpop.f32.mrf.mxu2 }
 0x1b3   :  { %v335_v3 = vpop.f32.mrf.mxu1  ;;  %v428_v4 = vpop.f32.mrf.mxu0 }
 0x1b9   :  { %270 = vrot.lane.b32.xlu1 %v1481_v13, %s1347_s16 }
 0x1bb   :  { %v449_v5 = vpop.f32.mrf.mxu1  ;;  %v542_v6 = vpop.f32.mrf.mxu0 }
 0x1bc   :  { %v454_v14 = vmul.f32 0.35355338, %v449_v5  ;;  %v569_v18 = vmul.f32 0.35355338, %v542_v6 }
 0x1be   :  { %v456_v16 = vadd.f32 %v454_v14, %v221_v54  ;;  %v571_v20 = vadd.f32 %v569_v18, %v220_v41 }
 0x1c0   :  { %v460_v19 = vsel %vm174_vm1, %v456_v16, -inf  ;;  %v573_v22 = vsel %vm174_vm1, %v571_v20, -inf }
 0x1c1   :  { %386 = vrot.lane.b32.xlu1 %v1481_v13, %s1358_s19 }
 0x1c3   :  { %365 = vrot.lane.b32.xlu0 %v1476_v8, %s1358_s19  ;;  %v451_v7 = vpop.f32.mrf.mxu1  ;;  %v544_v9 = vpop.f32.mrf.mxu0 }
 0x1c9   :  { %248 = vrot.lane.b32.xlu2 %v1476_v8, %s1347_s16  ;;  %s1359_s16 = smov 48  }
 0x1cb   :  { %v565_v10 = vpop.f32.mrf.mxu1 }
 0x1cc   :  { %v570_v12 = vmul.f32 0.35355338, %v565_v10 }
 0x1ce   :  { %v572_v15 = vadd.f32 %v570_v12, %v221_v54 }
 0x1d0   :  { %v576_v17 = vsel %vm174_vm1, %v572_v15, -inf }
 0x1d3   :  { %v567_v11 = vpop.f32.mrf.mxu1 }
 0x1eb   :  { %577 = vmax.xlane.f32.xlu1 %v576_v17 }
 0x1ed   :  { %461 = vmax.xlane.f32.xlu0 %v460_v19 }
 0x1f2   :  { %458 = vmax.xlane.f32.xlu2 %v457_v21 }
 0x1f5   :  { %574 = vmax.xlane.f32.xlu0 %v573_v22 }
 0x213   :  { %v343_v23 = vpop.xlane.xlu1 %342 }
 0x214   :  { %v347_v24 = vsub.f32 %v339_v46, %v343_v23  ;;  %v226_v25 = vpop.xlane.xlu2 %225 }
 0x215   :  { %v230_v26 = vsub.f32 %v222_v47, %v226_v25 }
 0x216   :  { %v349_v27 = vmul.f32 1.442695, %v347_v24 }
 0x217   :  { %v232_v28 = vmul.f32 1.442695, %v230_v26 }
 0x218   :  { %1182 = vpow2.f32 %v349_v27 }
 0x219   :  { %1184 = vpow2.f32 %v232_v28 }
 0x21e   :  { %v1538_v29 = vpop.eup %1182 }
 0x21f   :  { %v1540_v30 = vpop.eup %1184  ;;  %v353_v31 = vsel %vm174_vm1, %v1538_v29, 0.0 }
 0x220   :  { %v236_v32 = vsel %vm174_vm1, %v1540_v30, 0.0  ;;  %354 = vadd.xlane.f32.xlu0 %v353_v31 }
 0x221   :  { %237 = vadd.xlane.f32.xlu1 %v236_v32 }
 0x222   :  { %v229_v33 = vpop.xlane.xlu0 %228 }
 0x223   :  { %v231_v34 = vsub.f32 %v223_v61, %v229_v33 }
 0x224   :  { %v346_v35 = vpop.xlane.xlu2 %345 }
 0x225   :  { %v234_v37 = vmul.f32 1.442695, %v231_v34  ;;  %v348_v39 = vsub.f32 %v340_v63, %v346_v35 }
 0x227   :  { %1186 = vpow2.f32 %v234_v37  ;;  %v351_v40 = vmul.f32 1.442695, %v348_v39 }
 0x229   :  { %1188 = vpow2.f32 %v351_v40 }
 0x22b   :  { %v271_v41 = vpop.permute.xlu1 %270 }
 0x22c   :  { %v249_v42 = vpop.permute.xlu2 %248  ;;  %v276_v43 = vsel %vm253_vm4, %v271_v41, 0 }
 0x22d   :  { %v1547_v44 = vpop.eup %1186  ;;  %v255_v45 = vsel %vm253_vm4, %v249_v42, 0 }
 0x22e   :  { %264 = vmatpush.bf16.msra.mxu3 %v255_v45  ;;  %v239_v46 = vsel %vm174_vm1, %v1547_v44, 0.0 }
 0x22f   :  { %v1552_v47 = vpop.eup %1188  ;;  %240 = vadd.xlane.f32.xlu0 %v239_v46 }
 0x230   :  { %v356_v48 = vsel %vm174_vm1, %v1552_v47, 0.0 }
 0x231   :  { %357 = vadd.xlane.f32.xlu2 %v356_v48 }
 0x232   :  { %285 = vmatpush.bf16.msrb.mxu3 %v276_v43 }
 0x233   :  { %v387_v52 = vpop.permute.xlu1 %386 }
 0x234   :  { %v392_v19 = vsel %vm253_vm4, %v387_v52, 0 }
 0x235   :  { %v366_v50 = vpop.permute.xlu0 %365 }
 0x236   :  { %v371_v51 = vsel %vm253_vm4, %v366_v50, 0 }
 0x237   :  { %380 = vmatpush.bf16.msrb.mxu2 %v371_v51 }
 0x23a   :  { %502 = vrot.lane.b32.xlu1 %v1481_v13, %s1359_s16 }
 0x249   :  { %481 = vrot.lane.b32.xlu2 %v1476_v8, %s1359_s16 }
 0x25e   :  { %v578_v53 = vpop.xlane.xlu1 %577 }
 0x25f   :  { %v580_v54 = vsub.f32 %v572_v15, %v578_v53 }
 0x260   :  { %v462_v55 = vpop.xlane.xlu0 %461 }
 0x261   :  { %v464_v56 = vsub.f32 %v456_v16, %v462_v55  ;;  %v583_v58 = vmul.f32 1.442695, %v580_v54 }
 0x263   :  { %v467_v57 = vmul.f32 1.442695, %v464_v56 }
 0x265   :  { %1190 = vpow2.f32 %v467_v57  ;;  %v459_v59 = vpop.xlane.xlu2 %458 }
 0x266   :  { %v463_v60 = vsub.f32 %v1524_v0, %v459_v59  ;;  %1192 = vpow2.f32 %v583_v58 }
 0x268   :  { %v465_v61 = vmul.f32 1.442695, %v463_v60  ;;  %v575_v62 = vpop.xlane.xlu0 %574 }
 0x269   :  { %v579_v63 = vsub.f32 %v571_v20, %v575_v62 }
 0x26a   :  { %1194 = vpow2.f32 %v465_v61 }
 0x26b   :  { %v1191_v1 = vpop.eup %1190  ;;  %v581_v2 = vmul.f32 1.442695, %v579_v63 }
 0x26c   :  { %v472_v3 = vsel %vm174_vm1, %v1191_v1, 0.0  ;;  %v1561_v4 = vpop.eup %1192 }
 0x26d   :  { %1196 = vpow2.f32 %v581_v2  ;;  %473 = vadd.xlane.f32.xlu0 %v472_v3  ;;  %v588_v7 = vsel %vm174_vm1, %v1561_v4, 0.0 }
 0x270   :  { %v1195_v5 = vpop.eup %1194 }
 0x271   :  { %v469_v6 = vsel %vm174_vm1, %v1195_v5, 0.0 }
 0x272   :  { %470 = vadd.xlane.f32.xlu1 %v469_v6  ;;  %589 = vadd.xlane.f32.xlu2 %v588_v7 }
 0x273   :  { %v1197_v0 = vpop.eup %1196 }
 0x274   :  { %v585_v9 = vsel %vm174_vm1, %v1197_v0, 0.0 }
 0x275   :  { %586 = vadd.xlane.f32.xlu0 %v585_v9  ;;  %v1119_v9 = vld [vmem:[%s1680_s4 + $0x8] sm:$0xff] }
 0x276   :  { %701 = vmatpush.bf16.msra.mxu0 %v1119_v9 }
 0x289   :  { %597 = vrot.lane.b32.xlu0 %v1476_v8, %s1360_s20 }
 0x28b   :  { %618 = vrot.lane.b32.xlu1 %v1481_v13, %s1360_s20 }
 0x293   :  { %v355_v10 = vpop.xlane.xlu0 %354 }
 0x294   :  { %v238_v11 = vpop.xlane.xlu1 %237  ;;  %1198 = vrcp.f32 %v355_v10  ;;  %v1118_v10 = vld [vmem:[%s1680_s4] sm:$0xff]  ;;  %s1368_s4 = smov 1  }
 0x295   :  { %1200 = vrcp.f32 %v238_v11  ;;  %702 = vmatpush.bf16.msra.mxu0 %v1118_v10 }
 0x29a   :  { %v1199_v12 = vpop.eup %1198 }
 0x29b   :  { %v1201_v14 = vpop.eup %1200  ;;  %v361_v15 = vmul.f32 %v1199_v12, %v1538_v29 }
 0x29c   :  { %v244_v16 = vmul.f32 %v1201_v14, %v1540_v30 }
 0x29d   :  { %v363_v17 = vpack.c.bf16 %v361_v15, %v361_v15 }
 0x29e   :  { %v246_v18 = vpack.c.bf16 %v244_v16, %v244_v16 }
 0x29f   :  { %1070 = vmatmul.msk.bf16.vlgmr.msrb.gmra.mxu2 %vm174_vm1, %v363_v17 }
 0x2a0   :  { %1066 = vmatmul.msk.bf16.vlgmr.msra.gmra.mxu3 %vm174_vm1, %v246_v18 }
 0x2a1   :  { %401 = vmatpush.bf16.msra.mxu3 %v392_v19 }
 0x2a2   :  { %v241_v8 = vpop.xlane.xlu0 %240 }
 0x2a3   :  { %1202 = vrcp.f32 %v241_v8 }
 0x2a4   :  { %v358_v13 = vpop.xlane.xlu2 %357 }
 0x2a5   :  { %1204 = vrcp.f32 %v358_v13 }
 0x2a9   :  { %v1203_v20 = vpop.eup %1202 }
 0x2aa   :  { %v245_v21 = vmul.f32 %v1203_v20, %v1547_v44 }
 0x2ab   :  { %v1205_v27 = vpop.eup %1204 }
 0x2ac   :  { %v482_v22 = vpop.permute.xlu2 %481  ;;  %v503_v24 = vpop.permute.xlu1 %502  ;;  %v247_v25 = vpack.c.bf16 %v245_v21, %v245_v21  ;;  %v362_v28 = vmul.f32 %v1205_v27, %v1552_v47  ;;  %v1175_v27 = vld [vmem:[%s1681_s5] ss:$0 sm:$0xff] }
 0x2ad   :  { %v487_v23 = vsel %vm253_vm4, %v482_v22, 0  ;;  %v508_v26 = vsel %vm253_vm4, %v503_v24, 0 }
 0x2ae   :  { %496 = vmatpush.bf16.msra.mxu2 %v487_v23  ;;  %v364_v29 = vpack.c.bf16 %v362_v28, %v362_v28 }
 0x2b0   :  { %1067 = vmatmul.msk.bf16.vlgmr.msrb.gmra.mxu3 %vm174_vm1, %v247_v25 }
 0x2b1   :  { %517 = vmatpush.bf16.msrb.mxu3 %v508_v26  ;;  %v101_v26 = vld [vmem:[%s1677_s1] sm:$0xff]  }
 0x2b2   :  { %v103_v28 = vunpack.c.l.bf16 %v101_v26 }
 0x2c0   :  { %1071 = vmatmul.msk.bf16.vlgmr.msra.gmra.mxu3 %vm174_vm1, %v364_v29 }
 0x2e0   :  { %v474_v30 = vpop.xlane.xlu0 %473 }
 0x2e1   :  { %1206 = vrcp.f32 %v474_v30 }
 0x2e5   :  { %v471_v31 = vpop.xlane.xlu1 %470  ;;  %v590_v39 = vpop.xlane.xlu2 %589 }
 0x2e6   :  { %1208 = vrcp.f32 %v471_v31 }
 0x2e7   :  { %v1207_v32 = vpop.eup %1206  ;;  %1210 = vrcp.f32 %v590_v39 }
 0x2e8   :  { %v478_v33 = vmul.f32 %v1207_v32, %v1191_v1  ;;  %v587_v41 = vpop.xlane.xlu0 %586 }
 0x2e9   :  { %1212 = vrcp.f32 %v587_v41 }
 0x2ea   :  { %v480_v34 = vpack.c.bf16 %v478_v33, %v478_v33  ;;  %v104_v33 = vunpack.c.h.bf16 %v101_v26  ;;  %v1124_v26 = vld [vmem:[%s1686_s10 + $0x10] sm:$0xff] }
 0x2ec   :  { %1075 = vmatmul.msk.bf16.vlgmr.msrb.gmra.mxu3 %vm174_vm1, %v480_v34  ;;  %v1209_v35 = vpop.eup %1208 }
 0x2ed   :  { %v477_v37 = vmul.f32 %v1209_v35, %v1195_v5  ;;  %v1211_v42 = vpop.eup %1210 }
 0x2ee   :  { %v594_v45 = vmul.f32 %v1211_v42, %v1561_v4 }
 0x2ef   :  { %v479_v40 = vpack.c.bf16 %v477_v37, %v477_v37  ;;  %v1213_v43 = vpop.eup %1212 }
 0x2f0   :  { %v593_v46 = vmul.f32 %v1213_v43, %v1197_v0  ;;  %v596_v51 = vpack.c.bf16 %v594_v45, %v594_v45 }
 0x2f1   :  { %1074 = vmatmul.msk.bf16.vlgmr.msra.gmra.mxu2 %vm174_vm1, %v479_v40  ;;  %v1364_v40 = vmov 32.0  }
 0x2f2   :  { %v595_v52 = vpack.c.bf16 %v593_v46, %v593_v46  ;;  %1214 = vrcp.f32 %v1364_v40 }
 0x2f8   :  { %v1215_v41 = vpop.eup %1214 }
 0x2f9   :  { %v720_v42 = vmul.f32 32.0, %v1215_v41  ;;  %vm724_vm7 = vweird.f32 %v1215_v41 }
 0x2fb   :  { %v598_v44 = vpop.permute.xlu0 %597  ;;  %v721_v43 = vsub.f32 1.0, %v720_v42 }
 0x2fc   :  { %v603_v47 = vsel %vm253_vm4, %v598_v44, 0 }
 0x2fd   :  { %v619_v48 = vpop.permute.xlu1 %618  ;;  %612 = vmatpush.bf16.msrb.mxu2 %v603_v47  ;;  %v722_v44 = vmul.f32 %v1215_v41, %v721_v43 }
 0x2fe   :  { %v624_v50 = vsel %vm253_vm4, %v619_v48, 0 }
 0x2ff   :  { %633 = vmatpush.bf16.msra.mxu3 %v624_v50  ;;  %v723_v45 = vadd.f32 %v1215_v41, %v722_v44 }
 0x301   :  { %1078 = vmatmul.msk.bf16.vlgmr.msrb.gmra.mxu2 %vm174_vm1, %v595_v52  ;;  %v1605_v46 = vsel %vm724_vm7, %v1215_v41, %v723_v45 }
 0x302   :  { %1079 = vmatmul.msk.bf16.vlgmr.msra.gmra.mxu3 %vm174_vm1, %v596_v51 }
 0x322   :  { %v382_v53 = vpop.f32.mrf.mxu2 }
 0x323   :  { %v266_v54 = vpop.f32.mrf.mxu3 }
 0x32a   :  { %v384_v55 = vpop.f32.mrf.mxu2 }
 0x32b   :  { %v268_v56 = vpop.f32.mrf.mxu3 }
 0x333   :  { %v287_v57 = vpop.f32.mrf.mxu3 }
 0x33b   :  { %v289_v58 = vpop.f32.mrf.mxu3 }
 0x33c   :  { %v1121_v58 = vld [vmem:[#allocation4 + $0x8] sm:$0xff] }
 0x33d   :  { %804 = vmatpush.bf16.msra.mxu1 %v1121_v58 }
 0x343   :  { %v403_v59 = vpop.f32.mrf.mxu3 }
 0x344   :  { %v1151_v60 = vpack.i.bf16 %v403_v59, %v382_v53 }
 0x346   :  { %1152 = vrot.lane.b32.xlu0 %v1151_v60, %s1361_s21 }
 0x34b   :  { %v405_v61 = vpop.f32.mrf.mxu3 }
 0x36f   :  { %v519_v62 = vpop.f32.mrf.mxu3 }
 0x374   :  { %v498_v63 = vpop.f32.mrf.mxu2 }
 0x375   :  { %v1156_v1 = vpack.i.bf16 %v519_v62, %v498_v63  ;;  %v1120_v62 = vld [vmem:[#allocation4] sm:$0xff] }
 0x376   :  { %805 = vmatpush.bf16.msra.mxu1 %v1120_v62 }
 0x377   :  { %v521_v2 = vpop.f32.mrf.mxu3  ;;  %1157 = vrot.lane.b32.xlu1 %v1156_v1, %s1362_s8 }
 0x37c   :  { %v500_v3 = vpop.f32.mrf.mxu2 }
 0x384   :  { %v614_v4 = vpop.f32.mrf.mxu2 }
 0x385   :  { %v635_v5 = vpop.f32.mrf.mxu3 }
 0x386   :  { %v1161_v6 = vpack.i.bf16 %v635_v5, %v614_v4 }
 0x388   :  { %1162 = vrot.lane.b32.xlu0 %v1161_v6, %s1363_s22 }
 0x38c   :  { %v616_v7 = vpop.f32.mrf.mxu2 }
 0x38d   :  { %v637_v0 = vpop.f32.mrf.mxu3 }
 0x3b8   :  { %v1153_v11 = vpop.permute.xlu0 %1152 }
 0x3b9   :  { %v1155_v14 = vunpack.i.h.bf16 %v1153_v11  ;;  %v1154_v15 = vunpack.i.l.bf16 %v1153_v11 }
 0x3bb   :  { %v664_v19 = vsel %vm174_vm1, %v287_v57, %v1155_v14  ;;  %v663_v8 = vsel %vm174_vm1, %v266_v54, %v1154_v15 }
 0x3e9   :  { %v1158_v12 = vpop.permute.xlu1 %1157 }
 0x3ea   :  { %v1160_v16 = vunpack.i.h.bf16 %v1158_v12  ;;  %v1159_v17 = vunpack.i.l.bf16 %v1158_v12 }
 0x3ec   :  { %v666_v21 = vsel %vm665_vm5, %v663_v8, %v1159_v17  ;;  %v667_v22 = vsel %vm665_vm5, %v664_v19, %v1160_v16  ;;  %v1176_v16 = vld [vmem:[%s1682_s6] ss:$0 sm:$0xff] }
 0x3ed   :  { %v1177_v8 = vld [vmem:[%s1683_s7] ss:$0 sm:$0xff] }
 0x3fa   :  { %v1163_v18 = vpop.permute.xlu0 %1162 }
 0x3fb   :  { %v1165_v13 = vunpack.i.h.bf16 %v1163_v18  ;;  %v1164_v20 = vunpack.i.l.bf16 %v1163_v18 }
 0x3fd   :  { %v669_v23 = vsel %vm668_vm6, %v666_v21, %v1164_v20  ;;  %v670_v24 = vsel %vm668_vm6, %v667_v22, %v1165_v13 }
 0x3fe   :  { %v671_v25 = vpack.c.bf16 %v670_v24, %v669_v23 }
 0x400   :  { %1088 = vmatmul.msk.bf16.vlgmr.msra.gmra.mxu0 %vm130_vm0, %v671_v25  ;;  %v1125_v25 = vld [vmem:[%s1686_s10 + $0x18] sm:$0xff] }
 0x401   :  { %859 = vmatpush.bf16.msra.mxu2 %v1125_v25 }
 0x405   :  { %860 = vmatpush.bf16.msra.mxu2 %v1124_v26 }
 0x47d   :  { %v704_v29 = vpop.f32.mrf.mxu0 }
 0x47e   :  { %v705_v30 = vadd.f32 %v1175_v27, %v704_v29 }
 0x480   :  { %v709_v31 = vadd.f32 %v705_v30, %v103_v28  ;;  %v1122_v28 = vld [vmem:[%s1686_s10] sm:$0xff]  ;;  %v1178_v30 = vld [vmem:[#allocation7] ss:$0 sm:$0xff] }
 0x482   :  { %v713_v32 = vsel %vm130_vm0, %v709_v31, 0.0 }
 0x483   :  { %714 = vadd.xlane.f32.xlu1 %v713_v32 }
 0x485   :  { %v706_v34 = vpop.f32.mrf.mxu0 }
 0x486   :  { %v707_v35 = vadd.f32 %v1175_v27, %v706_v34  ;;  %v1123_v27 = vld [vmem:[%s1686_s10 + $0x8] sm:$0xff] }
 0x487   :  { %861 = vmatpush.bf16.msra.mxu2 %v1123_v27 }
 0x488   :  { %v710_v37 = vadd.f32 %v707_v35, %v104_v33 }
 0x48a   :  { %v716_v39 = vsel %vm130_vm0, %v710_v37, 0.0 }
 0x48b   :  { %717 = vadd.xlane.f32.xlu2 %v716_v39  ;;  %862 = vmatpush.bf16.msra.mxu2 %v1122_v28  ;;  %v1179_v39 = vld [vmem:[#allocation9] ss:$0 sm:$0xff] }
 0x4f6   :  { %v715_v47 = vpop.xlane.xlu1 %714 }
 0x4f7   :  { %v726_v48 = vmul.f32 %v1605_v46, %v715_v47 }
 0x4f9   :  { %v728_v50 = vsub.f32 %v709_v31, %v726_v48 }
 0x4fb   :  { %v730_v51 = vmul.f32 %v728_v50, %v728_v50 }
 0x4fd   :  { %v732_v52 = vsel %vm130_vm0, %v730_v51, 0.0  ;;  %v1365_v51 = vmov 0  }
 0x4fe   :  { %v718_v53 = vpop.xlane.xlu2 %717  ;;  %733 = vadd.xlane.f32.xlu0 %v732_v52  ;;  %1166 = vset.pattern.permute.xlu2 %v1365_v51  ;;  %v1366_v52 = vmov 0.0  }
 0x4ff   :  { %v727_v54 = vmul.f32 %v1605_v46, %v718_v53  ;;  %1172 = vset.pattern.permute.xlu0 %v1365_v51  ;;  %1173 = vset.pattern.permute.xlu1 %v1365_v51 }
 0x501   :  { %v729_v55 = vsub.f32 %v710_v37, %v727_v54 }
 0x503   :  { %v731_v56 = vmul.f32 %v729_v55, %v729_v55 }
 0x505   :  { %v735_v57 = vsel %vm130_vm0, %v731_v56, 0.0 }
 0x506   :  { %736 = vadd.xlane.f32.xlu2 %v735_v57 }
 0x571   :  { %v734_v59 = vpop.xlane.xlu0 %733 }
 0x572   :  { %v738_v60 = vmul.f32 %v734_v59, %v1605_v46 }
 0x574   :  { %v740_v61 = vadd.f32 1e-05, %v738_v60 }
 0x576   :  { %1216 = vrsqrt.f32 %v740_v61  ;;  %vm748_vm9 = vweird.f32 %v740_v61 }
 0x579   :  { %v737_v63 = vpop.xlane.xlu2 %736 }
 0x57a   :  { %v739_v1 = vmul.f32 %v737_v63, %v1605_v46 }
 0x57c   :  { %v1217_v2 = vpop.eup %1216  ;;  %v741_v3 = vadd.f32 1e-05, %v739_v1 }
 0x57d   :  { %v743_v4 = vmul.f32 %v1217_v2, %v740_v61  ;;  %vm749_vm8 = vweird.f32 %v1217_v2 }
 0x57e   :  { %1218 = vrsqrt.f32 %v741_v3  ;;  %vm750_vm10 = vmor %vm748_vm9, %vm749_vm8  ;;  %vm758_vm12 = vweird.f32 %v741_v3 }
 0x57f   :  { %v744_v5 = vmul.f32 %v1217_v2, %v743_v4 }
 0x581   :  { %v745_v6 = vmul.f32 0.5, %v744_v5 }
 0x583   :  { %v746_v7 = vsub.f32 1.5, %v745_v6 }
 0x584   :  { %v1219_v0 = vpop.eup %1218 }
 0x585   :  { %v747_v9 = vmul.f32 %v1217_v2, %v746_v7  ;;  %v753_v10 = vmul.f32 %v1219_v0, %v741_v3  ;;  %vm759_vm11 = vweird.f32 %v1219_v0 }
 0x586   :  { %vm760_vm13 = vmor %vm758_vm12, %vm759_vm11 }
 0x587   :  { %v754_v11 = vmul.f32 %v1219_v0, %v753_v10  ;;  %v751_v12 = vsel %vm750_vm10, %v1217_v2, %v747_v9 }
 0x588   :  { %v762_v17 = vmul.f32 %v751_v12, %v728_v50  ;;  %v156_v50 = vshrl.u32 %v153_v36, 7 }
 0x589   :  { %v755_v14 = vmul.f32 0.5, %v754_v11 }
 0x58a   :  { %v767_v13 = vmul.f32 %v1176_v16, %v762_v17  ;;  %vm163_vm1 = vcmp.lt.s32.totalorder %v156_v50, %v157_v38  ;;  %vm166_vm2 = vcmp.lt.s32.totalorder %v156_v50, %v160_v49 }
 0x58b   :  { %v756_v15 = vsub.f32 1.5, %v755_v14  ;;  %v1062_v53 = vsel %vm163_vm1, 1.0, %v1366_v52  ;;  %v1063_v56 = vsel %vm166_vm2, 1.0, %v1366_v52 }
 0x58c   :  { %v772_v22 = vadd.f32 %v1177_v8, %v767_v13  ;;  %v933_v54 = vsel %vm932_vm15, %v1062_v53, 0.0  ;;  %v940_v58 = vsel %vm932_vm15, %v1063_v56, 0.0 }
 0x58d   :  { %v757_v18 = vmul.f32 %v1219_v0, %v756_v15  ;;  %v941_v59 = vrot.slane %v940_v58, 4 }
 0x58f   :  { %v761_v19 = vsel %vm760_vm13, %v1219_v0, %v757_v18  ;;  %v942_v36 = vadd.f32 %v941_v59, %v940_v58  ;;  %v1181_v59 = vld [vmem:[%s1689_s13] ss:$0 sm:$0xff] }
 0x590   :  { %v763_v20 = vmul.f32 %v761_v19, %v729_v55  ;;  %v934_v55 = vrot.slane %v933_v54, 4 }
 0x591   :  { %v943_v2 = vrot.slane %v942_v36, 2 }
 0x592   :  { %v768_v21 = vmul.f32 %v1176_v16, %v763_v20  ;;  %v935_v57 = vadd.f32 %v934_v55, %v933_v54  ;;  %v1180_v55 = vld [vmem:[%s1688_s12] ss:$0 sm:$0xff] }
 0x593   :  { %v944_v4 = vadd.f32 %v943_v2, %v942_v36 }
 0x594   :  { %v773_v23 = vadd.f32 %v1177_v8, %v768_v21  ;;  %v936_v60 = vrot.slane %v935_v57, 2 }
 0x595   :  { %v945_v6 = vrot.slane %v944_v4, 1 }
 0x596   :  { %v774_v24 = vpack.c.bf16 %v773_v23, %v772_v22  ;;  %v937_v61 = vadd.f32 %v936_v60, %v935_v57 }
 0x597   :  { %v946_v7 = vadd.f32 %v945_v6, %v944_v4 }
 0x598   :  { %1097 = vmatmul.msk.bf16.vlgmr.msra.gmra.mxu1 %vm130_vm0, %v774_v24  ;;  %v938_v62 = vrot.slane %v937_v61, 1 }
 0x599   :  { %v950_v10 = vmax.f32 %v946_v7, 1.0  ;;  %vm948_vm12 = vcmp.gt.f32.partialorder %v946_v7, 0.0 }
 0x59a   :  { %v939_v63 = vadd.f32 %v938_v62, %v937_v61 }
 0x59b   :  { %vm971_vm8 = vweird.f32 %v950_v10 }
 0x59c   :  { %v949_v3 = vmax.f32 %v939_v63, 1.0  ;;  %vm947_vm7 = vcmp.gt.f32.partialorder %v939_v63, 0.0 }
 0x59e   :  { %1220 = vrcp.f32 %v949_v3  ;;  %v962_v16 = vand.u32 2147483648, %v949_v3  ;;  %vm956_vm3 = vweird.f32 %v949_v3  ;;  %v960_v18 = vand.u32 2147483647, %v949_v3 }
 0x59f   :  { %1222 = vrcp.f32 %v950_v10 }
 0x5a0   :  { %v963_v20 = vor.u32 1.1754944e-38, %v962_v16  ;;  %vm961_vm6 = vcmp.eq.f32.partialorder %v960_v18, 8.507059e+37 }
 0x5a4   :  { %v1221_v11 = vpop.eup %1220 }
 0x5a5   :  { %v952_v14 = vmul.f32 %v1221_v11, %v949_v3  ;;  %vm957_vm4 = vweird.f32 %v1221_v11  ;;  %v1223_v21 = vpop.eup %1222 }
 0x5a6   :  { %vm958_vm5 = vmor %vm956_vm3, %vm957_vm4  ;;  %vm972_vm9 = vweird.f32 %v1223_v21  ;;  %vm929_vm3 = vcmask 257024  }
 0x5a7   :  { %v953_v17 = vsub.f32 1.0, %v952_v14  ;;  %vm973_vm10 = vmor %vm971_vm8, %vm972_vm9 }
 0x5a9   :  { %v954_v8 = vmul.f32 %v1221_v11, %v953_v17 }
 0x615   :  { %v807_v29 = vpop.f32.mrf.mxu1 }
 0x616   :  { %v808_v31 = vadd.f32 %v1178_v30, %v807_v29  ;;  %v977_v29 = vand.u32 2147483648, %v950_v10 }
 0x618   :  { %v812_v34 = vmax.f32 %v808_v31, 0.0 }
 0x61d   :  { %v809_v32 = vpop.f32.mrf.mxu1 }
 0x61e   :  { %v810_v33 = vadd.f32 %v1178_v30, %v809_v32  ;;  %v1167_v30 = vpack.i.bf16 %v1063_v56, %v1062_v53  ;;  %v975_v32 = vand.u32 2147483647, %v950_v10 }
 0x620   :  { %v813_v35 = vmax.f32 %v810_v33, 0.0  ;;  %v978_v33 = vor.u32 1.1754944e-38, %v977_v29  ;;  %vm976_vm11 = vcmp.eq.f32.partialorder %v975_v32, 8.507059e+37 }
 0x622   :  { %v814_v37 = vpack.c.bf16 %v813_v35, %v812_v34 }
 0x624   :  { %1114 = vmatmul.msk.bf16.vlgmr.msra.gmra.mxu2 %vm851_vm14, %v814_v37 }
 0x6a7   :  { %v864_v40 = vpop.f32.mrf.mxu2 }
 0x6a8   :  { %v865_v41 = vadd.f32 %v1179_v39, %v864_v40 }
 0x6aa   :  { %v869_v42 = vadd.f32 %v865_v41, %v772_v22  ;;  %v955_v22 = vadd.f32 %v1221_v11, %v954_v8 }
 0x6ac   :  { %v873_v43 = vsel %vm130_vm0, %v869_v42, 0.0  ;;  %v959_v24 = vsel %vm958_vm5, %v1221_v11, %v955_v22  ;;  %vm1021_vm5 = vcmask 253952  }
 0x6ad   :  { %874 = vadd.xlane.f32.xlu2 %v873_v43  ;;  %v964_v25 = vsel %vm961_vm6, %v963_v20, %v959_v24 }
 0x6ae   :  { %v981_v26 = vsel %vm947_vm7, %v964_v25, 0.0 }
 0x6af   :  { %v866_v44 = vpop.f32.mrf.mxu2  ;;  %1011 = vperm.xlu0 %1172, %v981_v26  }
 0x6b0   :  { %v867_v45 = vadd.f32 %v1179_v39, %v866_v44 }
 0x6b2   :  { %v870_v47 = vadd.f32 %v867_v45, %v773_v23  ;;  %v967_v23 = vmul.f32 %v1223_v21, %v950_v10 }
 0x6b4   :  { %v876_v48 = vsel %vm130_vm0, %v870_v47, 0.0  ;;  %v968_v27 = vsub.f32 1.0, %v967_v23 }
 0x6b5   :  { %877 = vadd.xlane.f32.xlu2 %v876_v48 }
 0x6b6   :  { %v969_v28 = vmul.f32 %v1223_v21, %v968_v27 }
 0x6b8   :  { %v970_v31 = vadd.f32 %v1223_v21, %v969_v28 }
 0x6ba   :  { %v974_v34 = vsel %vm973_vm10, %v1223_v21, %v970_v31 }
 0x6bb   :  { %v979_v35 = vsel %vm976_vm11, %v978_v33, %v974_v34 }
 0x6bc   :  { %v982_v37 = vsel %vm948_vm12, %v979_v35, 0.0 }
 0x720   :  { %v875_v1 = vpop.xlane.xlu2 %874 }
 0x721   :  { %v879_v38 = vmul.f32 %v875_v1, %v1605_v46  ;;  %v1012_v18 = vpop.permute.xlu0 %1011 }
 0x723   :  { %v1640_v5 = vsub.f32 %v869_v42, %v879_v38 }
 0x725   :  { %v883_v49 = vmul.f32 %v1640_v5, %v1640_v5 }
 0x727   :  { %v885_v0 = vsel %vm130_vm0, %v883_v49, 0.0 }
 0x728   :  { %886 = vadd.xlane.f32.xlu2 %v885_v0  ;;  %v878_v9 = vpop.xlane.xlu2 %877 }
 0x729   :  { %v880_v12 = vmul.f32 %v878_v9, %v1605_v46 }
 0x72b   :  { %v1646_v15 = vsub.f32 %v870_v47, %v880_v12 }
 0x72d   :  { %v884_v19 = vmul.f32 %v1646_v15, %v1646_v15 }
 0x72f   :  { %v888_v13 = vsel %vm130_vm0, %v884_v19, 0.0 }
 0x730   :  { %889 = vadd.xlane.f32.xlu1 %v888_v13 }
 0x740   :  { %1168 = vperm.xlu2 %1166, %v1167_v30  }
 0x749   :  { %1016 = vperm.xlu1 %1173, %v982_v37  }
 0x79b   :  { %v887_v39 = vpop.xlane.xlu2 %886 }
 0x79c   :  { %v891_v40 = vmul.f32 %v887_v39, %v1605_v46 }
 0x79e   :  { %v893_v41 = vadd.f32 1e-05, %v891_v40 }
 0x7a0   :  { %1224 = vrsqrt.f32 %v893_v41  ;;  %vm901_vm14 = vweird.f32 %v893_v41 }
 0x7a3   :  { %v890_v42 = vpop.xlane.xlu1 %889 }
 0x7a4   :  { %v892_v43 = vmul.f32 %v890_v42, %v1605_v46  ;;  %v1169_v46 = vpop.permute.xlu2 %1168 }
 0x7a5   :  { %v1170_v36 = vunpack.i.l.bf16 %v1169_v46  ;;  %v1171_v7 = vunpack.i.h.bf16 %v1169_v46 }
 0x7a6   :  { %v1225_v44 = vpop.eup %1224  ;;  %v894_v45 = vadd.f32 1e-05, %v892_v43 }
 0x7a7   :  { %v896_v47 = vmul.f32 %v1225_v44, %v893_v41  ;;  %vm902_vm13 = vweird.f32 %v1225_v44 }
 0x7a8   :  { %1226 = vrsqrt.f32 %v894_v45  ;;  %vm903_vm15 = vmor %vm901_vm14, %vm902_vm13  ;;  %vm911_vm2 = vweird.f32 %v894_v45 }
 0x7a9   :  { %v897_v48 = vmul.f32 %v1225_v44, %v896_v47 }
 0x7ab   :  { %v898_v50 = vmul.f32 0.5, %v897_v48 }
 0x7ad   :  { %v899_v51 = vsub.f32 1.5, %v898_v50 }
 0x7ae   :  { %v1227_v52 = vpop.eup %1226 }
 0x7af   :  { %v900_v53 = vmul.f32 %v1225_v44, %v899_v51  ;;  %v906_v54 = vmul.f32 %v1227_v52, %v894_v45  ;;  %vm912_vm1 = vweird.f32 %v1227_v52 }
 0x7b0   :  { %vm913_vm4 = vmor %vm911_vm2, %vm912_vm1 }
 0x7b1   :  { %v904_v56 = vsel %vm903_vm15, %v1225_v44, %v900_v53  ;;  %v907_v57 = vmul.f32 %v1227_v52, %v906_v54 }
 0x7b2   :  { %v915_v58 = vmul.f32 %v904_v56, %v1640_v5 }
 0x7b3   :  { %v908_v60 = vmul.f32 0.5, %v907_v57 }
 0x7b4   :  { %v920_v61 = vmul.f32 %v1180_v55, %v915_v58 }
 0x7b5   :  { %v909_v62 = vsub.f32 1.5, %v908_v60 }
 0x7b6   :  { %v925_v63 = vadd.f32 %v1181_v59, %v920_v61 }
 0x7b7   :  { %v910_v1 = vmul.f32 %v1227_v52, %v909_v62 }
 0x7b8   :  { %v927_v2 = vpack.c.bf16 %v925_v63, %v925_v63  ;;  %v993_v38 = vmul.f32 %v1170_v36, %v925_v63 }
 0x7b9   :  { %v914_v3 = vsel %vm913_vm4, %v1227_v52, %v910_v1 }
 0x7ba   :  { %v916_v4 = vmul.f32 %v914_v3, %v1646_v15  ;;  %930 = vst.msk [vmem:[%s1690_s14] sm:$0xf] %vm929_vm3, %v927_v2  ;;  %v995_v5 = vsel %vm130_vm0, %v993_v38, 0.0 }
 0x7bb   :  { %v996_v6 = vrot.slane %v995_v5, 4  ;;  %v1017_v23 = vpop.permute.xlu1 %1016 }
 0x7bc   :  { %v921_v49 = vmul.f32 %v1180_v55, %v916_v4 }
 0x7bd   :  { %v997_v0 = vadd.f32 %v996_v6, %v995_v5 }
 0x7be   :  { %v926_v9 = vadd.f32 %v1181_v59, %v921_v49 }
 0x7bf   :  { %v998_v10 = vrot.slane %v997_v0, 2 }
 0x7c0   :  { %v928_v11 = vpack.c.bf16 %v926_v9, %v926_v9  ;;  %v994_v12 = vmul.f32 %v1171_v7, %v926_v9 }
 0x7c1   :  { %v999_v14 = vadd.f32 %v998_v10, %v997_v0 }
 0x7c2   :  { %931 = vst.msk [vmem:[%s1690_s14 + $0x4] sm:$0xf] %vm929_vm3, %v928_v11  ;;  %v1002_v15 = vsel %vm130_vm0, %v994_v12, 0.0  ;;  %s1032_s14 = sshll.u32 %s1691_s15, 4  ;;  %s1033_s14 = int_to_ptr.hbm [resolvable:$true] %s1032_s14 }
 0x7c3   :  { %v1003_v16 = vrot.slane %v1002_v15, 4  ;;  %v1000_v17 = vrot.slane %v999_v14, 1 }
 0x7c5   :  { %v1004_v19 = vadd.f32 %v1003_v16, %v1002_v15  ;;  %v1001_v8 = vadd.f32 %v1000_v17, %v999_v14 }
 0x7c7   :  { %v1019_v13 = vmul.f32 %v1012_v18, %v1001_v8  ;;  %v1005_v20 = vrot.slane %v1004_v19, 2 }
 0x7c9   :  { %1022 = vst.msk [vmem:[#allocation10] sm:$0x1] %vm1021_vm5, %v1019_v13  ;;  %v1006_v21 = vadd.f32 %v1005_v20, %v1004_v19 }
 0x7cb   :  { %v1007_v22 = vrot.slane %v1006_v21, 1 }
 0x7cd   :  { %v1008_v24 = vadd.f32 %v1007_v22, %v1006_v21 }
 0x7cf   :  { %v1020_v25 = vmul.f32 %v1017_v23, %v1008_v24 }
 0x7d1   :  { %1023 = vst.msk [vmem:[#allocation10 + $0x1] sm:$0x1] %vm1021_vm5, %v1020_v25 }
 0x7d2   :  { %1038 = dma.vmem_to_hbm [thread:$0]  %s1031_s24, 32, %s1033_s14, [#allocation6], %s1362_s8, %s1362_s8, %s1368_s4  }
 0x7d3   :  { %1342 = dma.done.wait [#allocation6], 32  }
 0x7d4   :  { %1343 = vsyncadd [#allocation6], 4294967264 }
 0x7d5   :  { %1045 = vsyncpa [#allocation5], 1 }
 0x7d6   :  { %1046 = vsyncpa [#allocation8], 1 }
 0x7d7   :  { %1047 = vsyncpa [#allocation6], 1 }

</bundles_post_ra>
